<compile_context>
chip_gen: v7x
topology: tpu7x:2x2x1
jax: 0.10.0
libtpu: 0.0.40
codegen_flags: <defaults>
</compile_context>

<pallas_src>
import functools

import jax
import jax.numpy as jnp
from jax.experimental import pallas as pl
from jax.experimental.pallas import tpu as pltpu

LANE = 128


def _round_up(x, m):
    return (x + m - 1) // m * m


# ----------------------------- Pallas kernel ---------------------------------

def fused_gcn_kernel(a_ref, x_ref, w0_ref, w_ref, b_ref, wf_ref, bf_ref,
                     probs_ref, emb_ref, x_carry, *, ax_first_layer0):
    """One grid step == one GCNConv layer; A_hat / activations stay resident in VMEM.

      a_ref    : (Np, Np)   bf16  normalized adjacency (resident)
      x_ref    : (Np, Fin)  bf16  input node features (consumed at layer 0 only)
      w0_ref   : (Fin, Fp)  bf16  layer-0 conv weight (resident)
      w_ref    : (Fp, Fp)   bf16  layer-l conv weight, l >= 1 (pipelined; dummy at l == 0)
      b_ref    : (1, Fp)    f32   layer-l conv bias (pipelined)
      wf_ref   : (Fp, Lp)   bf16  final linear weight (resident)
      bf_ref   : (1, Lp)    f32   final linear bias (resident)
      probs_ref: (Np, Lp)   f32   sigmoid(final linear)      -- written at last layer
      emb_ref  : (Np, Fp)   f32   final conv embeddings      -- written at last layer
      x_carry  : (Np, Fp)   bf16  activation carried across grid steps
    """
    layer = pl.program_id(0)

    def conv_finish(h):
        h = h + b_ref[...]
        # ELU (alpha=1.0), f32 elementwise; exp(min(h,0)) keeps the inactive branch finite.
        act = jnp.where(h > 0.0, h, jnp.exp(jnp.minimum(h, 0.0)) - 1.0)
        x_carry[...] = act.astype(jnp.bfloat16)

    @pl.when(layer == 0)
    def _():
        if ax_first_layer0:   # static (trace-time) choice: contract the narrower width first
            ax = jnp.dot(a_ref[...], x_ref[...], preferred_element_type=jnp.float32)
            h = jnp.dot(ax.astype(jnp.bfloat16), w0_ref[...],
                        preferred_element_type=jnp.float32)
        else:
            xw = jnp.dot(x_ref[...], w0_ref[...], preferred_element_type=jnp.float32)
            h = jnp.dot(a_ref[...], xw.astype(jnp.bfloat16),
                        preferred_element_type=jnp.float32)
        conv_finish(h)

    @pl.when(layer > 0)
    def _():
        xw = jnp.dot(x_carry[...], w_ref[...], preferred_element_type=jnp.float32)
        h = jnp.dot(a_ref[...], xw.astype(jnp.bfloat16),
                    preferred_element_type=jnp.float32)
        conv_finish(h)

    @pl.when(layer == pl.num_programs(0) - 1)
    def _():
        emb_ref[...] = x_carry[...].astype(jnp.float32)
        logits = jnp.dot(x_carry[...], wf_ref[...],
                         preferred_element_type=jnp.float32) + bf_ref[...]
        # exact (non-approx) reciprocal keeps outputs strictly in [0, 1]
        probs_ref[...] = pl.reciprocal(1.0 + jnp.exp(-logits), approx=False)


# -------------------------------- JAX glue ------------------------------------

def build_normalized_adjacency(edge_index, num_nodes):
    """Dense A_hat = D^{-1/2} (A + 2I) D^{-1/2}  (improved=True)."""
    # TODO(synk): the edge_index -> dense adjacency scatter has no clean Pallas equivalent;
    # it is host-side JAX glue executed once, outside the fused hot-path kernel.
    src, dst = edge_index[0], edge_index[1]
    adj = jnp.zeros((num_nodes, num_nodes), jnp.float32).at[dst, src].add(1.0)
    adj = adj + 2.0 * jnp.eye(num_nodes, dtype=jnp.float32)   # improved self loops (w=2)
    deg = adj.sum(axis=1)
    dinv = jnp.where(deg > 0, 1.0 / jnp.sqrt(deg), 0.0)
    return dinv[:, None] * adj * dinv[None, :]


def init_params(key, num_features, hidden_channels, embedding_size,
                num_labels, num_conv_layers):
    """Deterministic glorot-uniform weights / small biases for every layer."""
    def glorot(k, fan_in, fan_out):
        lim = jnp.sqrt(6.0 / (fan_in + fan_out))
        return jax.random.uniform(k, (fan_in, fan_out), jnp.float32, -lim, lim)

    dims = []
    if num_conv_layers > 1:
        dims.append((num_features, hidden_channels))
        for _ in range(2, num_conv_layers):
            dims.append((hidden_channels, hidden_channels))
        dims.append((hidden_channels, embedding_size))
    else:
        dims.append((num_features, embedding_size))

    keys = jax.random.split(key, len(dims) + 2)
    conv_params = []
    for i, (fi, fo) in enumerate(dims):
        conv_params.append((glorot(keys[i], fi, fo), jnp.zeros((1, fo), jnp.float32)))

    w_fin = glorot(keys[-2], embedding_size, num_labels)
    b_fin = 0.01 * jax.random.normal(keys[-1], (1, num_labels), jnp.float32)
    return conv_params, (w_fin, b_fin)


def _vmem_budget_bytes():
    """Generation-aware on-chip budget: ~48 MiB on v7x (64 MiB), ~96 MiB on v5e/v6e (128 MiB)."""
    try:
        cap = pltpu.get_tpu_info().vmem_capacity_bytes
    except Exception:
        cap = 64 * 1024 * 1024
    return int(0.75 * cap)


def _resident_spec(shape, single_buffer):
    """Constant-index (resident) block; single-buffered when supported."""
    index_map = lambda l: (0,) * len(shape)
    if single_buffer:
        return pl.BlockSpec(shape, index_map, pipeline_mode=pl.Buffered(1))
    return pl.BlockSpec(shape, index_map)


def gcn_forward(x, edge_index, conv_params, final_params, return_embeddings=False):
    n, f_in = x.shape
    num_layers = len(conv_params)
    out_dims = [w.shape[1] for (w, _) in conv_params]
    emb_dim = out_dims[-1]
    w_fin, b_fin = final_params
    num_labels = w_fin.shape[1]

    # Lane-dense padded sizes (input feature dim padded separately from hidden/embedding).
    np_ = _round_up(max(n, 8), LANE)
    f_in_p = _round_up(f_in, LANE)
    fp = _round_up(max(out_dims), LANE)
    lp = _round_up(num_labels, LANE)

    # Dense normalized adjacency (JAX glue), padded + stored bf16 for the MXU.
    a_hat = build_normalized_adjacency(edge_index, n)
    a_pad = jnp.zeros((np_, np_), jnp.bfloat16).at[:n, :n].set(a_hat.astype(jnp.bfloat16))
    x_pad = jnp.zeros((np_, f_in_p), jnp.bfloat16).at[:n, :f_in].set(x.astype(jnp.bfloat16))

    # Layer-0 weight gets its own (f_in_p, fp) operand; remaining layers are stacked (fp, fp).
    w0, b0 = conv_params[0]
    w0_pad = (jnp.zeros((f_in_p, fp), jnp.float32)
              .at[:w0.shape[0], :w0.shape[1]].set(w0).astype(jnp.bfloat16))

    # Stacked weights: slot 0 is an unused dummy so the index_map stays the identity.
    w_stack = jnp.zeros((num_layers, fp, fp), jnp.float32)
    b_stack = jnp.zeros((num_layers, 1, fp), jnp.float32)
    b_stack = b_stack.at[0, :, :b0.shape[1]].set(b0)
    for i in range(1, num_layers):
        w, b = conv_params[i]
        w_stack = w_stack.at[i, :w.shape[0], :w.shape[1]].set(w)
        b_stack = b_stack.at[i, :, :b.shape[1]].set(b)
    w_stack = w_stack.astype(jnp.bfloat16)

    wf_pad = (jnp.zeros((fp, lp), jnp.float32)
              .at[:w_fin.shape[0], :num_labels].set(w_fin).astype(jnp.bfloat16))
    bf_pad = jnp.zeros((1, lp), jnp.float32).at[:, :num_labels].set(b_fin)

    ax_first_layer0 = f_in_p < fp   # contract the narrower width on the Np^2 matmul

    # --- cost estimate ---------------------------------------------------------
    flops = (2 * np_ * f_in_p * fp + 2 * np_ * np_ * min(f_in_p, fp)            # layer 0
             + (num_layers - 1) * (2 * np_ * fp * fp + 2 * np_ * np_ * fp)      # layers 1..L-1
             + 2 * np_ * fp * lp)                                               # final linear
    transcendentals = num_layers * np_ * fp + np_ * lp
    bytes_accessed = (a_pad.size * 2 + x_pad.size * 2 + w0_pad.size * 2
                      + w_stack.size * 2 + b_stack.size * 4
                      + wf_pad.size * 2 + bf_pad.size * 4
                      + np_ * lp * 4 + np_ * fp * 4)

    # --- VMEM accounting (includes per-spec buffer counts) ---------------------
    def vmem_need(resident_bufs, out_bufs):
        return (resident_bufs * (a_pad.size * 2 + x_pad.size * 2 + w0_pad.size * 2
                                 + wf_pad.size * 2 + bf_pad.size * 4)
                + 2 * (fp * fp * 2 + fp * 4)                  # double-buffered W_l / b_l
                + out_bufs * (np_ * lp * 4 + np_ * fp * 4)    # probs / embeddings
                + np_ * fp * 2)                               # bf16 activation carry

    budget = _vmem_budget_bytes()
    need = vmem_need(1, 2)
    # TODO(synk): row-tiled streaming fallback (stream A_hat row blocks per layer) for graphs
    # whose fully-resident footprint exceeds the on-chip budget.
    assert need < budget, (
        f"graph too large for the fully-resident fused kernel "
        f"({need / 2**20:.1f} MiB > {budget / 2**20:.1f} MiB); needs the streaming variant")
    vmem_limit = min(budget, max(4 * vmem_need(2, 2), 32 * 1024 * 1024))

    def run(single_buffer):
        res = lambda shape: _resident_spec(shape, single_buffer)
        return pl.pallas_call(
            functools.partial(fused_gcn_kernel, ax_first_layer0=ax_first_layer0),
            out_shape=(jax.ShapeDtypeStruct((np_, lp), jnp.float32),
                       jax.ShapeDtypeStruct((np_, fp), jnp.float32)),
            grid_spec=pltpu.PrefetchScalarGridSpec(
                num_scalar_prefetch=0,
                grid=(num_layers,),
                in_specs=[
                    res((np_, np_)),                                            # A_hat (resident)
                    res((np_, f_in_p)),                                         # X in  (resident)
                    res((f_in_p, fp)),                                          # W0    (resident)
                    pl.BlockSpec((pl.Squeezed(), fp, fp), lambda l: (l, 0, 0)),  # W_l (pipelined)
                    pl.BlockSpec((pl.Squeezed(), 1, fp), lambda l: (l, 0, 0)),   # b_l (pipelined)
                    res((fp, lp)),                                              # W_final (resident)
                    res((1, lp)),                                               # b_final (resident)
                ],
                out_specs=(
                    pl.BlockSpec((np_, lp), lambda l: (0, 0)),   # probs (written at last layer)
                    pl.BlockSpec((np_, fp), lambda l: (0, 0)),   # embeddings (written at last layer)
                ),
                scratch_shapes=[pltpu.VMEM((np_, fp), jnp.bfloat16)],
            ),
            compiler_params=pltpu.CompilerParams(
                dimension_semantics=("arbitrary",),      # layers are sequential
                vmem_limit_bytes=vmem_limit,
            ),
            cost_estimate=pl.CostEstimate(flops=int(flops),
                                          transcendentals=int(transcendentals),
                                          bytes_accessed=int(bytes_accessed)),
        )(a_pad, x_pad, w0_pad, w_stack, b_stack, wf_pad, bf_pad)

    try:
        probs, emb = jax.block_until_ready(run(single_buffer=True))
    except Exception:
        # Installed jax rejected pipeline_mode=pl.Buffered(1): fall back to default buffering.
        probs, emb = jax.block_until_ready(run(single_buffer=False))

    if return_embeddings:
        return emb[:n, :emb_dim]
    return probs[:n, :num_labels]


# ----------------------------- pure-JAX reference ------------------------------

def gcn_reference(x, edge_index, conv_params, final_params):
    """Same math, same bf16 matmul precision, no Pallas — for correctness check."""
    a_bf = build_normalized_adjacency(edge_index, x.shape[0]).astype(jnp.bfloat16)
    h = x
    for w, b in conv_params:
        xw = jnp.dot(h.astype(jnp.bfloat16), w.astype(jnp.bfloat16),
                     preferred_element_type=jnp.float32)
        z = jnp.dot(a_bf, xw.astype(jnp.bfloat16),
                    preferred_element_type=jnp.float32) + b
        h = jnp.where(z > 0.0, z, jnp.exp(jnp.minimum(z, 0.0)) - 1.0)
    w_f, b_f = final_params
    logits = jnp.dot(h.astype(jnp.bfloat16), w_f.astype(jnp.bfloat16),
                     preferred_element_type=jnp.float32) + b_f
    return 1.0 / (1.0 + jnp.exp(-logits))


# ----------------------------------- main ---------------------------------------

if __name__ == "__main__":
    # Small, module-consistent shapes
    num_nodes = 32
    num_edges = 64
    num_features = 16
    hidden_channels = 32
    embedding_size = 16
    num_labels = 8
    num_conv_layers = 3
    dropout = 0.5  # inactive in eval mode

    key = jax.random.PRNGKey(0)
    k_x, k_src, k_dst, k_params = jax.random.split(key, 4)

    x = jax.random.normal(k_x, (num_nodes, num_features), jnp.float32)
    src = jax.random.randint(k_src, (num_edges,), 0, num_nodes, jnp.int32)
    dst = jax.random.randint(k_dst, (num_edges,), 0, num_nodes, jnp.int32)
    edge_index = jnp.stack([src, dst], axis=0)  # (2, E)

    conv_params, final_params = init_params(
        k_params, num_features, hidden_channels, embedding_size,
        num_labels, num_conv_layers)

    out = gcn_forward(x, edge_index, conv_params, final_params)
    out = jax.block_until_ready(out)

    assert out.shape == (num_nodes, num_labels)
    assert bool(jnp.all((out >= 0.0) & (out <= 1.0)))

    ref = jax.block_until_ready(gcn_reference(x, edge_index, conv_params, final_params))
    max_err = float(jnp.max(jnp.abs(out - ref)))
    assert max_err < 1e-2, f"mismatch vs reference: {max_err}"

    # embeddings path exercised too
    emb = jax.block_until_ready(
        gcn_forward(x, edge_index, conv_params, final_params, return_embeddings=True))
    assert emb.shape == (num_nodes, embedding_size)

    print("KERNEL_OK")
</pallas_src>

<mosaic_0001>
module attributes {stable_mosaic.version = 11 : i64} {
  func.func @fused_gcn_kernel(%arg0: i32, %arg1: memref<128x128xbf16, #tpu.memory_space<vmem>>, %arg2: memref<128x128xbf16, #tpu.memory_space<vmem>>, %arg3: memref<128x128xbf16, #tpu.memory_space<vmem>>, %arg4: memref<1x128x128xbf16, #tpu.memory_space<vmem>>, %arg5: memref<1x1x128xf32, #tpu.memory_space<vmem>>, %arg6: memref<128x128xbf16, #tpu.memory_space<vmem>>, %arg7: memref<1x128xf32, #tpu.memory_space<vmem>>, %arg8: memref<128x128xf32, #tpu.memory_space<vmem>>, %arg9: memref<128x128xf32, #tpu.memory_space<vmem>>, %arg10: memref<128x128xbf16, #tpu.memory_space<vmem>>) attributes {dimension_semantics = [#tpu.dimension_semantics<arbitrary>], iteration_bounds = array<i64: 3>, scalar_prefetch = 0 : i64, scratch_operands = 1 : i64, tpu.core_type = #tpu.core_type<tc>, window_params = [{pipeline_mode = #tpu.pipeline_mode<synchronous>, transform_indices = @transform_0, window_bounds = array<i64: 128, 128>}, {pipeline_mode = #tpu.pipeline_mode<synchronous>, transform_indices = @transform_1, window_bounds = array<i64: 128, 128>}, {pipeline_mode = #tpu.pipeline_mode<synchronous>, transform_indices = @transform_2, window_bounds = array<i64: 128, 128>}, {transform_indices = @transform_3, window_bounds = array<i64: 1, 128, 128>}, {transform_indices = @transform_4, window_bounds = array<i64: 1, 1, 128>}, {pipeline_mode = #tpu.pipeline_mode<synchronous>, transform_indices = @transform_5, window_bounds = array<i64: 128, 128>}, {pipeline_mode = #tpu.pipeline_mode<synchronous>, transform_indices = @transform_6, window_bounds = array<i64: 1, 128>}, {pipeline_mode = #tpu.pipeline_mode<synchronous>, transform_indices = @transform_7, window_bounds = array<i64: 128, 128>}, {pipeline_mode = #tpu.pipeline_mode<synchronous>, transform_indices = @transform_8, window_bounds = array<i64: 128, 128>}]} {
    %c0_i32 = arith.constant 0 : i32
    %0 = arith.cmpi eq, %arg0, %c0_i32 : i32
    %1 = arith.extui %0 : i1 to i32
    %c0_i32_0 = arith.constant 0 : i32
    %2 = arith.cmpi ne, %1, %c0_i32_0 : i32
    scf.if %2 {
      %c0 = arith.constant 0 : index
      %c0_4 = arith.constant 0 : index
      %9 = vector.load %arg2[%c0, %c0_4] : memref<128x128xbf16, #tpu.memory_space<vmem>>, vector<128x128xbf16>
      %c0_5 = arith.constant 0 : index
      %c0_6 = arith.constant 0 : index
      %10 = vector.load %arg3[%c0_5, %c0_6] : memref<128x128xbf16, #tpu.memory_space<vmem>>, vector<128x128xbf16>
      %cst = arith.constant dense<0.000000e+00> : vector<128x128xf32>
      %11 = tpu.matmul %9, %10, %cst {dimension_numbers = #tpu.dot_dimension_numbers<[1], [0], [0], [1], [0, 0, 1, 1], [], []>} : vector<128x128xbf16>, vector<128x128xbf16>, vector<128x128xf32> -> vector<128x128xf32>
      %c0_7 = arith.constant 0 : index
      %c0_8 = arith.constant 0 : index
      %12 = vector.load %arg1[%c0_7, %c0_8] : memref<128x128xbf16, #tpu.memory_space<vmem>>, vector<128x128xbf16>
      %13 = arith.truncf %11 : vector<128x128xf32> to vector<128x128xbf16>
      %cst_9 = arith.constant dense<0.000000e+00> : vector<128x128xf32>
      %14 = tpu.matmul %12, %13, %cst_9 {dimension_numbers = #tpu.dot_dimension_numbers<[1], [0], [0], [1], [0, 0, 1, 1], [], []>} : vector<128x128xbf16>, vector<128x128xbf16>, vector<128x128xf32> -> vector<128x128xf32>
      %c0_10 = arith.constant 0 : index
      %c0_11 = arith.constant 0 : index
      %c0_12 = arith.constant 0 : index
      %15 = vector.load %arg5[%c0_10, %c0_11, %c0_12] : memref<1x1x128xf32, #tpu.memory_space<vmem>>, vector<1x1x128xf32>
      %16 = vector.shape_cast %15 : vector<1x1x128xf32> to vector<1x128xf32>
      %17 = vector.broadcast %16 : vector<1x128xf32> to vector<128x128xf32>
      %18 = arith.addf %14, %17 : vector<128x128xf32>
      %cst_13 = arith.constant 0.000000e+00 : f32
      %19 = vector.broadcast %cst_13 : f32 to vector<128x128xf32>
      %20 = arith.cmpf ogt, %18, %19 : vector<128x128xf32>
      %cst_14 = arith.constant 0.000000e+00 : f32
      %21 = vector.broadcast %cst_14 : f32 to vector<128x128xf32>
      %22 = arith.minimumf %18, %21 : vector<128x128xf32>
      %23 = math.exp %22 : vector<128x128xf32>
      %cst_15 = arith.constant 1.000000e+00 : f32
      %24 = vector.broadcast %cst_15 : f32 to vector<128x128xf32>
      %25 = arith.subf %23, %24 : vector<128x128xf32>
      %26 = arith.select %20, %18, %25 : vector<128x128xi1>, vector<128x128xf32>
      %27 = arith.truncf %26 : vector<128x128xf32> to vector<128x128xbf16>
      %c0_16 = arith.constant 0 : index
      %c0_17 = arith.constant 0 : index
      %28 = vector.load %arg10[%c0_16, %c0_17] : memref<128x128xbf16, #tpu.memory_space<vmem>>, vector<128x128xbf16>
      tpu.vector_store %arg10[%c0_16, %c0_17], %27 {strides = array<i32>} : memref<128x128xbf16, #tpu.memory_space<vmem>>, vector<128x128xbf16>,
    } else {
    }
    %c0_i32_1 = arith.constant 0 : i32
    %3 = arith.cmpi sgt, %arg0, %c0_i32_1 : i32
    %4 = arith.extui %3 : i1 to i32
    %c0_i32_2 = arith.constant 0 : i32
    %5 = arith.cmpi ne, %4, %c0_i32_2 : i32
    scf.if %5 {
      %c0 = arith.constant 0 : index
      %c0_4 = arith.constant 0 : index
      %9 = vector.load %arg10[%c0, %c0_4] : memref<128x128xbf16, #tpu.memory_space<vmem>>, vector<128x128xbf16>
      %c0_5 = arith.constant 0 : index
      %c0_6 = arith.constant 0 : index
      %c0_7 = arith.constant 0 : index
      %10 = vector.load %arg4[%c0_5, %c0_6, %c0_7] : memref<1x128x128xbf16, #tpu.memory_space<vmem>>, vector<1x128x128xbf16>
      %11 = vector.shape_cast %10 : vector<1x128x128xbf16> to vector<128x128xbf16>
      %cst = arith.constant dense<0.000000e+00> : vector<128x128xf32>
      %12 = tpu.matmul %9, %11, %cst {dimension_numbers = #tpu.dot_dimension_numbers<[1], [0], [0], [1], [0, 0, 1, 1], [], []>} : vector<128x128xbf16>, vector<128x128xbf16>, vector<128x128xf32> -> vector<128x128xf32>
      %c0_8 = arith.constant 0 : index
      %c0_9 = arith.constant 0 : index
      %13 = vector.load %arg1[%c0_8, %c0_9] : memref<128x128xbf16, #tpu.memory_space<vmem>>, vector<128x128xbf16>
      %14 = arith.truncf %12 : vector<128x128xf32> to vector<128x128xbf16>
      %cst_10 = arith.constant dense<0.000000e+00> : vector<128x128xf32>
      %15 = tpu.matmul %13, %14, %cst_10 {dimension_numbers = #tpu.dot_dimension_numbers<[1], [0], [0], [1], [0, 0, 1, 1], [], []>} : vector<128x128xbf16>, vector<128x128xbf16>, vector<128x128xf32> -> vector<128x128xf32>
      %c0_11 = arith.constant 0 : index
      %c0_12 = arith.constant 0 : index
      %c0_13 = arith.constant 0 : index
      %16 = vector.load %arg5[%c0_11, %c0_12, %c0_13] : memref<1x1x128xf32, #tpu.memory_space<vmem>>, vector<1x1x128xf32>
      %17 = vector.shape_cast %16 : vector<1x1x128xf32> to vector<1x128xf32>
      %18 = vector.broadcast %17 : vector<1x128xf32> to vector<128x128xf32>
      %19 = arith.addf %15, %18 : vector<128x128xf32>
      %cst_14 = arith.constant 0.000000e+00 : f32
      %20 = vector.broadcast %cst_14 : f32 to vector<128x128xf32>
      %21 = arith.cmpf ogt, %19, %20 : vector<128x128xf32>
      %cst_15 = arith.constant 0.000000e+00 : f32
      %22 = vector.broadcast %cst_15 : f32 to vector<128x128xf32>
      %23 = arith.minimumf %19, %22 : vector<128x128xf32>
      %24 = math.exp %23 : vector<128x128xf32>
      %cst_16 = arith.constant 1.000000e+00 : f32
      %25 = vector.broadcast %cst_16 : f32 to vector<128x128xf32>
      %26 = arith.subf %24, %25 : vector<128x128xf32>
      %27 = arith.select %21, %19, %26 : vector<128x128xi1>, vector<128x128xf32>
      %28 = arith.truncf %27 : vector<128x128xf32> to vector<128x128xbf16>
      %c0_17 = arith.constant 0 : index
      %c0_18 = arith.constant 0 : index
      %29 = vector.load %arg10[%c0_17, %c0_18] : memref<128x128xbf16, #tpu.memory_space<vmem>>, vector<128x128xbf16>
      tpu.vector_store %arg10[%c0_17, %c0_18], %28 {strides = array<i32>} : memref<128x128xbf16, #tpu.memory_space<vmem>>, vector<128x128xbf16>,
    } else {
    }
    %c2_i32 = arith.constant 2 : i32
    %6 = arith.cmpi eq, %arg0, %c2_i32 : i32
    %7 = arith.extui %6 : i1 to i32
    %c0_i32_3 = arith.constant 0 : i32
    %8 = arith.cmpi ne, %7, %c0_i32_3 : i32
    scf.if %8 {
      %c0 = arith.constant 0 : index
      %c0_4 = arith.constant 0 : index
      %9 = vector.load %arg10[%c0, %c0_4] : memref<128x128xbf16, #tpu.memory_space<vmem>>, vector<128x128xbf16>
      %10 = arith.extf %9 : vector<128x128xbf16> to vector<128x128xf32>
      %c0_5 = arith.constant 0 : index
      %c0_6 = arith.constant 0 : index
      %11 = vector.load %arg9[%c0_5, %c0_6] : memref<128x128xf32, #tpu.memory_space<vmem>>, vector<128x128xf32>
      tpu.vector_store %arg9[%c0_5, %c0_6], %10 {strides = array<i32>} : memref<128x128xf32, #tpu.memory_space<vmem>>, vector<128x128xf32>,
      %c0_7 = arith.constant 0 : index
      %c0_8 = arith.constant 0 : index
      %12 = vector.load %arg10[%c0_7, %c0_8] : memref<128x128xbf16, #tpu.memory_space<vmem>>, vector<128x128xbf16>
      %c0_9 = arith.constant 0 : index
      %c0_10 = arith.constant 0 : index
      %13 = vector.load %arg6[%c0_9, %c0_10] : memref<128x128xbf16, #tpu.memory_space<vmem>>, vector<128x128xbf16>
      %cst = arith.constant dense<0.000000e+00> : vector<128x128xf32>
      %14 = tpu.matmul %12, %13, %cst {dimension_numbers = #tpu.dot_dimension_numbers<[1], [0], [0], [1], [0, 0, 1, 1], [], []>} : vector<128x128xbf16>, vector<128x128xbf16>, vector<128x128xf32> -> vector<128x128xf32>
      %c0_11 = arith.constant 0 : index
      %c0_12 = arith.constant 0 : index
      %15 = vector.load %arg7[%c0_11, %c0_12] : memref<1x128xf32, #tpu.memory_space<vmem>>, vector<1x128xf32>
      %16 = vector.broadcast %15 : vector<1x128xf32> to vector<128x128xf32>
      %17 = arith.addf %14, %16 : vector<128x128xf32>
      %cst_13 = arith.constant 0.000000e+00 : f32
      %18 = vector.broadcast %cst_13 : f32 to vector<128x128xf32>
      %19 = arith.subf %18, %17 : vector<128x128xf32>
      %20 = math.exp %19 : vector<128x128xf32>
      %cst_14 = arith.constant 1.000000e+00 : f32
      %21 = vector.broadcast %cst_14 : f32 to vector<128x128xf32>
      %22 = arith.addf %21, %20 : vector<128x128xf32>
      %23 = tpu.reciprocal %22 : vector<128x128xf32> -> vector<128x128xf32>
      %c0_15 = arith.constant 0 : index
      %c0_16 = arith.constant 0 : index
      %24 = vector.load %arg8[%c0_15, %c0_16] : memref<128x128xf32, #tpu.memory_space<vmem>>, vector<128x128xf32>
      tpu.vector_store %arg8[%c0_15, %c0_16], %23 {strides = array<i32>} : memref<128x128xf32, #tpu.memory_space<vmem>>, vector<128x128xf32>,
    } else {
    }
    return
  }
  func.func @transform_0(%arg0: i32) -> (i32, i32) {
    %c0_i32 = arith.constant 0 : i32
    %c0_i32_0 = arith.constant 0 : i32
    %c0_i32_1 = arith.constant 0 : i32
    return %c0_i32, %c0_i32_0 : i32, i32
  }
  func.func @transform_1(%arg0: i32) -> (i32, i32) {
    %c0_i32 = arith.constant 0 : i32
    %c0_i32_0 = arith.constant 0 : i32
    %c0_i32_1 = arith.constant 0 : i32
    return %c0_i32, %c0_i32_0 : i32, i32
  }
  func.func @transform_2(%arg0: i32) -> (i32, i32) {
    %c0_i32 = arith.constant 0 : i32
    %c0_i32_0 = arith.constant 0 : i32
    %c0_i32_1 = arith.constant 0 : i32
    return %c0_i32, %c0_i32_0 : i32, i32
  }
  func.func @transform_3(%arg0: i32) -> (i32, i32, i32) {
    %c0_i32 = arith.constant 0 : i32
    %c0_i32_0 = arith.constant 0 : i32
    %c0_i32_1 = arith.constant 0 : i32
    return %arg0, %c0_i32, %c0_i32_0 : i32, i32, i32
  }
  func.func @transform_4(%arg0: i32) -> (i32, i32, i32) {
    %c0_i32 = arith.constant 0 : i32
    %c0_i32_0 = arith.constant 0 : i32
    %c0_i32_1 = arith.constant 0 : i32
    return %arg0, %c0_i32, %c0_i32_0 : i32, i32, i32
  }
  func.func @transform_5(%arg0: i32) -> (i32, i32) {
    %c0_i32 = arith.constant 0 : i32
    %c0_i32_0 = arith.constant 0 : i32
    %c0_i32_1 = arith.constant 0 : i32
    return %c0_i32, %c0_i32_0 : i32, i32
  }
  func.func @transform_6(%arg0: i32) -> (i32, i32) {
    %c0_i32 = arith.constant 0 : i32
    %c0_i32_0 = arith.constant 0 : i32
    %c0_i32_1 = arith.constant 0 : i32
    return %c0_i32, %c0_i32_0 : i32, i32
  }
  func.func @transform_7(%arg0: i32) -> (i32, i32) {
    %c0_i32 = arith.constant 0 : i32
    %c0_i32_0 = arith.constant 0 : i32
    %c0_i32_1 = arith.constant 0 : i32
    return %c0_i32, %c0_i32_0 : i32, i32
  }
  func.func @transform_8(%arg0: i32) -> (i32, i32) {
    %c0_i32 = arith.constant 0 : i32
    %c0_i32_0 = arith.constant 0 : i32
    %c0_i32_1 = arith.constant 0 : i32
    return %c0_i32, %c0_i32_0 : i32, i32
  }
}

module attributes {stable_mosaic.version = 11 : i64} {
  func.func @fused_gcn_kernel(%arg0: i32, %arg1: memref<128x128xbf16, #tpu.memory_space<vmem>>, %arg2: memref<128x128xbf16, #tpu.memory_space<vmem>>, %arg3: memref<128x128xbf16, #tpu.memory_space<vmem>>, %arg4: memref<1x128x128xbf16, #tpu.memory_space<vmem>>, %arg5: memref<1x1x128xf32, #tpu.memory_space<vmem>>, %arg6: memref<128x128xbf16, #tpu.memory_space<vmem>>, %arg7: memref<1x128xf32, #tpu.memory_space<vmem>>, %arg8: memref<128x128xf32, #tpu.memory_space<vmem>>, %arg9: memref<128x128xf32, #tpu.memory_space<vmem>>, %arg10: memref<128x128xbf16, #tpu.memory_space<vmem>>) attributes {dimension_semantics = [#tpu.dimension_semantics<arbitrary>], iteration_bounds = array<i64: 3>, scalar_prefetch = 0 : i64, scratch_operands = 1 : i64, tpu.core_type = #tpu.core_type<tc>, window_params = [{pipeline_mode = #tpu.pipeline_mode<synchronous>, transform_indices = @transform_0, window_bounds = array<i64: 128, 128>}, {pipeline_mode = #tpu.pipeline_mode<synchronous>, transform_indices = @transform_1, window_bounds = array<i64: 128, 128>}, {pipeline_mode = #tpu.pipeline_mode<synchronous>, transform_indices = @transform_2, window_bounds = array<i64: 128, 128>}, {transform_indices = @transform_3, window_bounds = array<i64: 1, 128, 128>}, {transform_indices = @transform_4, window_bounds = array<i64: 1, 1, 128>}, {pipeline_mode = #tpu.pipeline_mode<synchronous>, transform_indices = @transform_5, window_bounds = array<i64: 128, 128>}, {pipeline_mode = #tpu.pipeline_mode<synchronous>, transform_indices = @transform_6, window_bounds = array<i64: 1, 128>}, {pipeline_mode = #tpu.pipeline_mode<synchronous>, transform_indices = @transform_7, window_bounds = array<i64: 128, 128>}, {pipeline_mode = #tpu.pipeline_mode<synchronous>, transform_indices = @transform_8, window_bounds = array<i64: 128, 128>}]} {
    %c0_i32 = arith.constant 0 : i32
    %0 = arith.cmpi eq, %arg0, %c0_i32 : i32
    %1 = arith.extui %0 : i1 to i32
    %c0_i32_0 = arith.constant 0 : i32
    %2 = arith.cmpi ne, %1, %c0_i32_0 : i32
    scf.if %2 {
      %c0 = arith.constant 0 : index
      %c0_4 = arith.constant 0 : index
      %9 = vector.load %arg2[%c0, %c0_4] : memref<128x128xbf16, #tpu.memory_space<vmem>>, vector<128x128xbf16>
      %c0_5 = arith.constant 0 : index
      %c0_6 = arith.constant 0 : index
      %10 = vector.load %arg3[%c0_5, %c0_6] : memref<128x128xbf16, #tpu.memory_space<vmem>>, vector<128x128xbf16>
      %cst = arith.constant dense<0.000000e+00> : vector<128x128xf32>
      %11 = tpu.matmul %9, %10, %cst {dimension_numbers = #tpu.dot_dimension_numbers<[1], [0], [0], [1], [0, 0, 1, 1], [], []>} : vector<128x128xbf16>, vector<128x128xbf16>, vector<128x128xf32> -> vector<128x128xf32>
      %c0_7 = arith.constant 0 : index
      %c0_8 = arith.constant 0 : index
      %12 = vector.load %arg1[%c0_7, %c0_8] : memref<128x128xbf16, #tpu.memory_space<vmem>>, vector<128x128xbf16>
      %13 = arith.truncf %11 : vector<128x128xf32> to vector<128x128xbf16>
      %cst_9 = arith.constant dense<0.000000e+00> : vector<128x128xf32>
      %14 = tpu.matmul %12, %13, %cst_9 {dimension_numbers = #tpu.dot_dimension_numbers<[1], [0], [0], [1], [0, 0, 1, 1], [], []>} : vector<128x128xbf16>, vector<128x128xbf16>, vector<128x128xf32> -> vector<128x128xf32>
      %c0_10 = arith.constant 0 : index
      %c0_11 = arith.constant 0 : index
      %c0_12 = arith.constant 0 : index
      %15 = vector.load %arg5[%c0_10, %c0_11, %c0_12] : memref<1x1x128xf32, #tpu.memory_space<vmem>>, vector<1x1x128xf32>
      %16 = vector.shape_cast %15 : vector<1x1x128xf32> to vector<1x128xf32>
      %17 = vector.broadcast %16 : vector<1x128xf32> to vector<128x128xf32>
      %18 = arith.addf %14, %17 : vector<128x128xf32>
      %cst_13 = arith.constant 0.000000e+00 : f32
      %19 = vector.broadcast %cst_13 : f32 to vector<128x128xf32>
      %20 = arith.cmpf ogt, %18, %19 : vector<128x128xf32>
      %cst_14 = arith.constant 0.000000e+00 : f32
      %21 = vector.broadcast %cst_14 : f32 to vector<128x128xf32>
      %22 = arith.minimumf %18, %21 : vector<128x128xf32>
      %23 = math.exp %22 : vector<128x128xf32>
      %cst_15 = arith.constant 1.000000e+00 : f32
      %24 = vector.broadcast %cst_15 : f32 to vector<128x128xf32>
      %25 = arith.subf %23, %24 : vector<128x128xf32>
      %26 = arith.select %20, %18, %25 : vector<128x128xi1>, vector<128x128xf32>
      %27 = arith.truncf %26 : vector<128x128xf32> to vector<128x128xbf16>
      %c0_16 = arith.constant 0 : index
      %c0_17 = arith.constant 0 : index
      %28 = vector.load %arg10[%c0_16, %c0_17] : memref<128x128xbf16, #tpu.memory_space<vmem>>, vector<128x128xbf16>
      tpu.vector_store %arg10[%c0_16, %c0_17], %27 {strides = array<i32>} : memref<128x128xbf16, #tpu.memory_space<vmem>>, vector<128x128xbf16>,
    } else {
    }
    %c0_i32_1 = arith.constant 0 : i32
    %3 = arith.cmpi sgt, %arg0, %c0_i32_1 : i32
    %4 = arith.extui %3 : i1 to i32
    %c0_i32_2 = arith.constant 0 : i32
    %5 = arith.cmpi ne, %4, %c0_i32_2 : i32
    scf.if %5 {
      %c0 = arith.constant 0 : index
      %c0_4 = arith.constant 0 : index
      %9 = vector.load %arg10[%c0, %c0_4] : memref<128x128xbf16, #tpu.memory_space<vmem>>, vector<128x128xbf16>
      %c0_5 = arith.constant 0 : index
      %c0_6 = arith.constant 0 : index
      %c0_7 = arith.constant 0 : index
      %10 = vector.load %arg4[%c0_5, %c0_6, %c0_7] : memref<1x128x128xbf16, #tpu.memory_space<vmem>>, vector<1x128x128xbf16>
      %11 = vector.shape_cast %10 : vector<1x128x128xbf16> to vector<128x128xbf16>
      %cst = arith.constant dense<0.000000e+00> : vector<128x128xf32>
      %12 = tpu.matmul %9, %11, %cst {dimension_numbers = #tpu.dot_dimension_numbers<[1], [0], [0], [1], [0, 0, 1, 1], [], []>} : vector<128x128xbf16>, vector<128x128xbf16>, vector<128x128xf32> -> vector<128x128xf32>
      %c0_8 = arith.constant 0 : index
      %c0_9 = arith.constant 0 : index
      %13 = vector.load %arg1[%c0_8, %c0_9] : memref<128x128xbf16, #tpu.memory_space<vmem>>, vector<128x128xbf16>
      %14 = arith.truncf %12 : vector<128x128xf32> to vector<128x128xbf16>
      %cst_10 = arith.constant dense<0.000000e+00> : vector<128x128xf32>
      %15 = tpu.matmul %13, %14, %cst_10 {dimension_numbers = #tpu.dot_dimension_numbers<[1], [0], [0], [1], [0, 0, 1, 1], [], []>} : vector<128x128xbf16>, vector<128x128xbf16>, vector<128x128xf32> -> vector<128x128xf32>
      %c0_11 = arith.constant 0 : index
      %c0_12 = arith.constant 0 : index
      %c0_13 = arith.constant 0 : index
      %16 = vector.load %arg5[%c0_11, %c0_12, %c0_13] : memref<1x1x128xf32, #tpu.memory_space<vmem>>, vector<1x1x128xf32>
      %17 = vector.shape_cast %16 : vector<1x1x128xf32> to vector<1x128xf32>
      %18 = vector.broadcast %17 : vector<1x128xf32> to vector<128x128xf32>
      %19 = arith.addf %15, %18 : vector<128x128xf32>
      %cst_14 = arith.constant 0.000000e+00 : f32
      %20 = vector.broadcast %cst_14 : f32 to vector<128x128xf32>
      %21 = arith.cmpf ogt, %19, %20 : vector<128x128xf32>
      %cst_15 = arith.constant 0.000000e+00 : f32
      %22 = vector.broadcast %cst_15 : f32 to vector<128x128xf32>
      %23 = arith.minimumf %19, %22 : vector<128x128xf32>
      %24 = math.exp %23 : vector<128x128xf32>
      %cst_16 = arith.constant 1.000000e+00 : f32
      %25 = vector.broadcast %cst_16 : f32 to vector<128x128xf32>
      %26 = arith.subf %24, %25 : vector<128x128xf32>
      %27 = arith.select %21, %19, %26 : vector<128x128xi1>, vector<128x128xf32>
      %28 = arith.truncf %27 : vector<128x128xf32> to vector<128x128xbf16>
      %c0_17 = arith.constant 0 : index
      %c0_18 = arith.constant 0 : index
      %29 = vector.load %arg10[%c0_17, %c0_18] : memref<128x128xbf16, #tpu.memory_space<vmem>>, vector<128x128xbf16>
      tpu.vector_store %arg10[%c0_17, %c0_18], %28 {strides = array<i32>} : memref<128x128xbf16, #tpu.memory_space<vmem>>, vector<128x128xbf16>,
    } else {
    }
    %c2_i32 = arith.constant 2 : i32
    %6 = arith.cmpi eq, %arg0, %c2_i32 : i32
    %7 = arith.extui %6 : i1 to i32
    %c0_i32_3 = arith.constant 0 : i32
    %8 = arith.cmpi ne, %7, %c0_i32_3 : i32
    scf.if %8 {
      %c0 = arith.constant 0 : index
      %c0_4 = arith.constant 0 : index
      %9 = vector.load %arg10[%c0, %c0_4] : memref<128x128xbf16, #tpu.memory_space<vmem>>, vector<128x128xbf16>
      %10 = arith.extf %9 : vector<128x128xbf16> to vector<128x128xf32>
      %c0_5 = arith.constant 0 : index
      %c0_6 = arith.constant 0 : index
      %11 = vector.load %arg9[%c0_5, %c0_6] : memref<128x128xf32, #tpu.memory_space<vmem>>, vector<128x128xf32>
      tpu.vector_store %arg9[%c0_5, %c0_6], %10 {strides = array<i32>} : memref<128x128xf32, #tpu.memory_space<vmem>>, vector<128x128xf32>,
      %c0_7 = arith.constant 0 : index
      %c0_8 = arith.constant 0 : index
      %12 = vector.load %arg10[%c0_7, %c0_8] : memref<128x128xbf16, #tpu.memory_space<vmem>>, vector<128x128xbf16>
      %c0_9 = arith.constant 0 : index
      %c0_10 = arith.constant 0 : index
      %13 = vector.load %arg6[%c0_9, %c0_10] : memref<128x128xbf16, #tpu.memory_space<vmem>>, vector<128x128xbf16>
      %cst = arith.constant dense<0.000000e+00> : vector<128x128xf32>
      %14 = tpu.matmul %12, %13, %cst {dimension_numbers = #tpu.dot_dimension_numbers<[1], [0], [0], [1], [0, 0, 1, 1], [], []>} : vector<128x128xbf16>, vector<128x128xbf16>, vector<128x128xf32> -> vector<128x128xf32>
      %c0_11 = arith.constant 0 : index
      %c0_12 = arith.constant 0 : index
      %15 = vector.load %arg7[%c0_11, %c0_12] : memref<1x128xf32, #tpu.memory_space<vmem>>, vector<1x128xf32>
      %16 = vector.broadcast %15 : vector<1x128xf32> to vector<128x128xf32>
      %17 = arith.addf %14, %16 : vector<128x128xf32>
      %cst_13 = arith.constant 0.000000e+00 : f32
      %18 = vector.broadcast %cst_13 : f32 to vector<128x128xf32>
      %19 = arith.subf %18, %17 : vector<128x128xf32>
      %20 = math.exp %19 : vector<128x128xf32>
      %cst_14 = arith.constant 1.000000e+00 : f32
      %21 = vector.broadcast %cst_14 : f32 to vector<128x128xf32>
      %22 = arith.addf %21, %20 : vector<128x128xf32>
      %23 = tpu.reciprocal %22 : vector<128x128xf32> -> vector<128x128xf32>
      %c0_15 = arith.constant 0 : index
      %c0_16 = arith.constant 0 : index
      %24 = vector.load %arg8[%c0_15, %c0_16] : memref<128x128xf32, #tpu.memory_space<vmem>>, vector<128x128xf32>
      tpu.vector_store %arg8[%c0_15, %c0_16], %23 {strides = array<i32>} : memref<128x128xf32, #tpu.memory_space<vmem>>, vector<128x128xf32>,
    } else {
    }
    return
  }
  func.func @transform_0(%arg0: i32) -> (i32, i32) {
    %c0_i32 = arith.constant 0 : i32
    %c0_i32_0 = arith.constant 0 : i32
    %c0_i32_1 = arith.constant 0 : i32
    return %c0_i32, %c0_i32_0 : i32, i32
  }
  func.func @transform_1(%arg0: i32) -> (i32, i32) {
    %c0_i32 = arith.constant 0 : i32
    %c0_i32_0 = arith.constant 0 : i32
    %c0_i32_1 = arith.constant 0 : i32
    return %c0_i32, %c0_i32_0 : i32, i32
  }
  func.func @transform_2(%arg0: i32) -> (i32, i32) {
    %c0_i32 = arith.constant 0 : i32
    %c0_i32_0 = arith.constant 0 : i32
    %c0_i32_1 = arith.constant 0 : i32
    return %c0_i32, %c0_i32_0 : i32, i32
  }
  func.func @transform_3(%arg0: i32) -> (i32, i32, i32) {
    %c0_i32 = arith.constant 0 : i32
    %c0_i32_0 = arith.constant 0 : i32
    %c0_i32_1 = arith.constant 0 : i32
    return %arg0, %c0_i32, %c0_i32_0 : i32, i32, i32
  }
  func.func @transform_4(%arg0: i32) -> (i32, i32, i32) {
    %c0_i32 = arith.constant 0 : i32
    %c0_i32_0 = arith.constant 0 : i32
    %c0_i32_1 = arith.constant 0 : i32
    return %arg0, %c0_i32, %c0_i32_0 : i32, i32, i32
  }
  func.func @transform_5(%arg0: i32) -> (i32, i32) {
    %c0_i32 = arith.constant 0 : i32
    %c0_i32_0 = arith.constant 0 : i32
    %c0_i32_1 = arith.constant 0 : i32
    return %c0_i32, %c0_i32_0 : i32, i32
  }
  func.func @transform_6(%arg0: i32) -> (i32, i32) {
    %c0_i32 = arith.constant 0 : i32
    %c0_i32_0 = arith.constant 0 : i32
    %c0_i32_1 = arith.constant 0 : i32
    return %c0_i32, %c0_i32_0 : i32, i32
  }
  func.func @transform_7(%arg0: i32) -> (i32, i32) {
    %c0_i32 = arith.constant 0 : i32
    %c0_i32_0 = arith.constant 0 : i32
    %c0_i32_1 = arith.constant 0 : i32
    return %c0_i32, %c0_i32_0 : i32, i32
  }
  func.func @transform_8(%arg0: i32) -> (i32, i32) {
    %c0_i32 = arith.constant 0 : i32
    %c0_i32_0 = arith.constant 0 : i32
    %c0_i32_1 = arith.constant 0 : i32
    return %c0_i32, %c0_i32_0 : i32, i32
  }
}

</mosaic_0001>

<bundles_post_ra>
// kernel: tpu_custom_call.1
= control target key start
LH: loop header
LB: loop body
LE: loop exit
PB: predicated region body
PF: predicated region fallthrough
CT: control target
= control target key end

     0   :  { %14 = vsyncpa [#allocation4], 0  ;;  %s3270_s0 = inlined_call_operand.hbm [shape: bf16[128,128], index: 0, kind: input, shape index: {}]   ;;  %s3271_s1 = inlined_call_operand.hbm [shape: bf16[128,128], index: 1, kind: input, shape index: {}]   ;;  %s3272_s2 = inlined_call_operand.hbm [shape: bf16[128,128], index: 2, kind: input, shape index: {}]   ;;  %s3273_s3 = inlined_call_operand.hbm [shape: bf16[3,128,128], index: 3, kind: input, shape index: {}]   ;;  %s3274_s4 = inlined_call_operand.vmem [shape: f32[3,1,128], index: 4, kind: input, shape index: {}]   ;;  %s3275_s5 = inlined_call_operand.hbm [shape: bf16[128,128], index: 5, kind: input, shape index: {}]   ;;  %s3276_s6 = inlined_call_operand.vmem [shape: f32[1,128], index: 6, kind: input, shape index: {}]   ;;  %s3277_s7 = inlined_call_operand.hbm [shape: f32[128,128], index: 7, kind: output, shape index: {0}]   ;;  %s3278_s8 = inlined_call_operand.hbm [shape: f32[128,128], index: 8, kind: output, shape index: {1}]  }
   0x1   :  { %15 = vsyncpa [#allocation7], 0 }
   0x2   :  { %16 = vsyncpa [#allocation10], 0 }
   0x3   :  { %18 = vsyncpa [#allocation10 + $0x1], 0 }
   0x4   :  { %19 = vsyncpa [#allocation5], 0 }
   0x5   :  { %20 = vsyncpa [#allocation14], 0  ;;  %s2755_s27 = smov 0   ;;  %s2757_s28 = smov 0  }
   0x6   :  { %s2759_s29 = smov 0   ;;  %s2761_s30 = smov 0  }
   0x7 LB: > { %s2774_s9 = sadd.s32 4294967295, %s2697_s30   ;;  %p109_p0 = scmp.ne.s32.totalorder %s2689_s28, %s2685_s27  ;;  %s2697_s30 = sphi %s2761_s30, %s3299_s30   ;;  %s2693_s29 = sphi %s2759_s29, %s3298_s29   ;;  %s2689_s28 = sphi %s2757_s28, %s3297_s28   ;;  %s2685_s27 = sphi %s2755_s27, %s3296_s27  }
   0x8   : > { %p3279_p1 = scmp.eq.s32.totalorder %s2774_s9, 0  ;;  %p1811_p2 = scmp.ge.s32.totalorder %s2697_s30, 1 }
   0x9   : > { %p230_p3 = scmp.lt.s32.totalorder %s2697_s30, 4  ;;  %s2699_s12 = smov [#allocation6]  }
   0xa   : > { %p2783_p5 = por %p3279_p1, %p109_p0  ;;  %s255_s13 = sshll.u32 %s2699_s12, 4  ;;  %s2793_s13 = int_to_ptr.vmem [resolvable:$true] %s255_s13 }
   0xb   : > { %p2787_p6 = pnand %p1811_p2, %p230_p3  ;;  %s2700_s15 = smov [#allocation11]  }
   0xc   : > { %s3282_s10 = scalar_select %p2783_p5, 1, 0 }
   0xd   : > { %s3283_s11 = scalar_select %p2787_p6, 1, 0 }
   0xe   : > { %p2201_p7 = pneg %p2787_p6  ;;  %s281_s16 = sshll.u32 %s2700_s15, 4  ;;  %s2801_s16 = int_to_ptr.vmem [resolvable:$true] %s281_s16 }
   0xf   : > { %s2701_s17 = smov [#allocation3]   ;;  %s2449_s21 = scalar_lea.hbm %s3271_s1, 1024 }
  0x10   : > { %p2797_p8 = pnand %p2201_p7, %p3279_p1  ;;  %s2803_s18 = sshll.u32 %s2701_s17, 4  ;;  %s243_s18 = int_to_ptr.vmem [resolvable:$true] %s2803_s18 }
  0x11   : > { %p2450_p9 = scmp.ne.s32.totalorder %s3271_s1, %s2449_s21  ;;  %p2456_p13 = scmp.lt.u32.totalorder %s2449_s21, %s3271_s1 }
  0x12   : > { %p2813_p10 = pneg %p2797_p8 }
  0x14   : > { %p2452_p11 = pnand %p2813_p10, %p2450_p9 }
  0x16   : > { %p2453_p12 = pneg %p2452_p11 }
  0x18   : > { %p2458_p0 = pnand %p2456_p13, %p2453_p12 }
  0x1a   : > { %2461 = shalt.err (!%p2458_p0)
}
  0x1b   : > { %s2462_s27 = scalar_lea.vmem %s2793_s13, 1024  ;;  %p2470_p4 = scmp.lt.s32.totalorder %s2793_s13, %s2793_s13 }
  0x1c   : > { %p2463_p2 = scmp.ne.s32.totalorder %s2793_s13, %s2462_s27  ;;  %p2471_p1 = scmp.lt.s32.totalorder %s2462_s27, %s2462_s27 }
  0x1e   : > { %p2465_p3 = pnand %p2463_p2, %p2813_p10  ;;  %p2472_p9 = por %p2471_p1, %p2470_p4 }
  0x20   : > { %p2466_p7 = pneg %p2465_p3 }
  0x22   : > { %p2473_p11 = pnand %p2472_p9, %p2466_p7 }
  0x24   : > { %2476 = shalt.err (!%p2473_p11)
}
  0x25   : > { %s2702_s12 = smov 64   ;;  %s2703_s15 = smov 4  }
  0x26   : > { %2207 = dma.hbm_to_vmem [thread:$0]  (!%p2797_p8), %s3271_s1, 1024, %s2793_s13, [#allocation7], %s2702_s12, %s2702_s12, %s2703_s15  }
  0x27   : > { %s2477_s22 = scalar_lea.hbm %s3275_s5, 1024 }
  0x28   : > { %p2478_p1 = scmp.ne.s32.totalorder %s3275_s5, %s2477_s22  ;;  %p2484_p13 = scmp.lt.u32.totalorder %s2477_s22, %s3275_s5 }
  0x2a   : > { %p2480_p4 = pnand %p2478_p1, %p2813_p10 }
  0x2c   : > { %p2481_p12 = pneg %p2480_p4 }
  0x2e   : > { %p2486_p0 = pnand %p2484_p13, %p2481_p12 }
  0x30   : > { %2489 = shalt.err (!%p2486_p0)
}
  0x31   : > { %s2490_s13 = scalar_lea.vmem %s2801_s16, 1024  ;;  %p2498_p9 = scmp.lt.s32.totalorder %s2801_s16, %s2801_s16 }
  0x32   : > { %p2491_p2 = scmp.ne.s32.totalorder %s2801_s16, %s2490_s13  ;;  %p2499_p11 = scmp.lt.s32.totalorder %s2490_s13, %s2490_s13 }
  0x34   : > { %p2493_p3 = pnand %p2491_p2, %p2813_p10  ;;  %p2500_p1 = por %p2499_p11, %p2498_p9 }
  0x36   : > { %p2494_p7 = pneg %p2493_p3 }
  0x38   : > { %p2501_p4 = pnand %p2500_p1, %p2494_p7 }
  0x3a   : > { %2504 = shalt.err (!%p2501_p4)
}
  0x3b   : > { %2213 = dma.hbm_to_vmem [thread:$0]  (!%p2797_p8), %s3275_s5, 1024, %s2801_s16, [#allocation10], %s2702_s12, %s2702_s12, %s2703_s15  }
  0x3c   : > { %s2505_s22 = scalar_lea.hbm %s3270_s0, 1024 }
  0x3d   : > { %p2506_p12 = scmp.ne.s32.totalorder %s3270_s0, %s2505_s22  ;;  %p2512_p2 = scmp.lt.u32.totalorder %s2505_s22, %s3270_s0 }
  0x3f   : > { %p2508_p13 = pnand %p2506_p12, %p2813_p10 }
  0x41   : > { %p2509_p0 = pneg %p2508_p13 }
  0x43   : > { %p2514_p3 = pnand %p2512_p2, %p2509_p0 }
  0x45   : > { %2517 = shalt.err (!%p2514_p3)
}
  0x46   : > { %s2518_s13 = scalar_lea.vmem %s243_s18, 1024  ;;  %p2526_p1 = scmp.lt.s32.totalorder %s243_s18, %s243_s18 }
  0x47   : > { %p2519_p7 = scmp.ne.s32.totalorder %s243_s18, %s2518_s13  ;;  %p2527_p4 = scmp.lt.s32.totalorder %s2518_s13, %s2518_s13 }
  0x49   : > { %p2521_p9 = pnand %p2519_p7, %p2813_p10  ;;  %p2528_p5 = por %p2527_p4, %p2526_p1 }
  0x4b   : > { %p2522_p11 = pneg %p2521_p9 }
  0x4d   : > { %p2529_p6 = pnand %p2528_p5, %p2522_p11 }
  0x4f   : > { %2532 = shalt.err (!%p2529_p6)
}
  0x50   : > { %2204 = dma.hbm_to_vmem [thread:$0]  (!%p2797_p8), %s3270_s0, 1024, %s243_s18, [#allocation4], %s2702_s12, %s2702_s12, %s2703_s15  }
  0x51   : > { %s2704_s19 = smov [#allocation8]   ;;  %s2533_s23 = scalar_lea.hbm %s3272_s2, 1024 }
  0x52   : > { %s268_s20 = sshll.u32 %s2704_s19, 4  ;;  %p2534_p5 = scmp.ne.s32.totalorder %s3272_s2, %s2533_s23  ;;  %s269_s20 = int_to_ptr.vmem [resolvable:$true] %s268_s20 }
  0x53   : > { %p2540_p13 = scmp.lt.u32.totalorder %s2533_s23, %s3272_s2 }
  0x54   : > { %p2536_p6 = pnand %p2534_p5, %p2813_p10 }
  0x56   : > { %p2537_p12 = pneg %p2536_p6 }
  0x58   : > { %p2542_p0 = pnand %p2540_p13, %p2537_p12 }
  0x5a   : > { %2545 = shalt.err (!%p2542_p0)
}
  0x5b   : > { %s2546_s18 = scalar_lea.vmem %s269_s20, 1024  ;;  %p2554_p9 = scmp.lt.s32.totalorder %s269_s20, %s269_s20 }
  0x5c   : > { %p2547_p2 = scmp.ne.s32.totalorder %s269_s20, %s2546_s18  ;;  %p2555_p11 = scmp.lt.s32.totalorder %s2546_s18, %s2546_s18 }
  0x5e   : > { %p2549_p3 = pnand %p2547_p2, %p2813_p10  ;;  %p2556_p1 = por %p2555_p11, %p2554_p9 }
  0x60   : > { %p2550_p7 = pneg %p2549_p3 }
  0x62   : > { %p2557_p4 = pnand %p2556_p1, %p2550_p7 }
  0x64   : > { %2560 = shalt.err (!%p2557_p4)
}
  0x65   : > { %2210 = dma.hbm_to_vmem [thread:$0]  (!%p2797_p8), %s3272_s2, 1024, %s269_s20, [#allocation7], %s2702_s12, %s2702_s12, %s2703_s15  }
  0x66   : > { %s2907_s24 = sadd.s32 1, %s2697_s30   ;;  %s96_s14 = sadd.s32 1, %s2693_s29 }
  0x67   : > { %s93_s19 = ssub.s32 %s2697_s30, %s2907_s24  ;;  %p103_p10 = scmp.ne.s32.totalorder %s2693_s29, %s2689_s28 }
  0x68   : > { %p94_p5 = scmp.eq.s32.totalorder %s93_s19, 0  ;;  %p104_p6 = scmp.eq.s32.totalorder %s2697_s30, 0 }
  0x69   : > { %p2222_p12 = scmp.lt.s32.totalorder %s2697_s30, 3  ;;  %s298_s21 = sand.u32 1, %s2697_s30  }
  0x6a   : > { %s2918_s22 = scalar_select %p94_p5, %s2693_s29, %s96_s14  }
  0x6b   : > { %p105_p13 = por %p104_p6, %p103_p10  ;;  %s300_s23 = sand.u32 1, %s2693_s29  }
  0x6c   : > { %s1918_s25 = sshll.u32 %s2697_s30, 10  ;;  %s1817_s26 = sshll.u32 %s300_s23, 6 }
  0x6d   : > { %s2925_s20 = scalar_lea.hbm %s3273_s3, %s1918_s25  ;;  %p2927_p8 = pnand %p2222_p12, %p105_p13 }
  0x6e   : > { %s302_s16 = scalar_lea.vmem [#allocation9], %s1817_s26  ;;  %s2933_s30 = scalar_lea.sflag [#allocation10], %s298_s21 }
  0x6f   : > { %s309_s17 = sshll.u32 %s302_s16, 4  ;;  %s2561_s14 = scalar_lea.hbm %s2925_s20, 1024  ;;  %s2931_s17 = int_to_ptr.vmem [resolvable:$true] %s309_s17 }
  0x70   : > { %p2562_p0 = scmp.ne.s32.totalorder %s2925_s20, %s2561_s14  ;;  %p2563_p2 = pneg %p2927_p8 }
  0x71   : > { %s2566_s25 = scalar_lea.hbm %s3273_s3, 3072  ;;  %p2567_p9 = scmp.lt.u32.totalorder %s2925_s20, %s3273_s3 }
  0x72   : > { %p2564_p3 = pnand %p2563_p2, %p2562_p0  ;;  %p2568_p11 = scmp.lt.u32.totalorder %s2566_s25, %s2561_s14 }
  0x73   : > { %p2570_p4 = scmp.lt.u32.totalorder %s2561_s14, %s2925_s20 }
  0x74   : > { %p2565_p7 = pneg %p2564_p3  ;;  %p2569_p1 = por %p2568_p11, %p2567_p9 }
  0x76   : > { %p2571_p10 = por %p2570_p4, %p2569_p1 }
  0x78   : > { %p2572_p5 = pnand %p2571_p10, %p2565_p7 }
  0x7a   : > { %2575 = shalt.err (!%p2572_p5)
}
  0x7b   : > { %s2576_s21 = scalar_lea.vmem %s2931_s17, 1024  ;;  %s2705_s26 = smov [#allocation9]  }
  0x7c   : > { %p2577_p6 = scmp.ne.s32.totalorder %s2931_s17, %s2576_s21  ;;  %s2581_s16 = sshll.u32 %s2705_s26, 4  ;;  %s2582_s16 = int_to_ptr.vmem [resolvable:$false] %s2581_s16 }
  0x7d   : > { %s2583_s19 = scalar_lea.vmem %s2582_s16, 2048  ;;  %p2584_p0 = scmp.lt.s32.totalorder %s2931_s17, %s2582_s16 }
  0x7e   : > { %p2579_p12 = pnand %p2577_p6, %p2563_p2  ;;  %p2585_p3 = scmp.lt.s32.totalorder %s2583_s19, %s2576_s21 }
  0x80   : > { %p2580_p13 = pneg %p2579_p12  ;;  %p2586_p9 = por %p2585_p3, %p2584_p0 }
  0x82   : > { %p2587_p11 = pnand %p2586_p9, %p2580_p13 }
  0x84   : > { %2590 = shalt.err (!%p2587_p11)
}
  0x85   : > { %2217 = dma.hbm_to_vmem [thread:$0]  (!%p2927_p8), %s2925_s20, 1024, %s2931_s17, %s2933_s30, %s2702_s12, %s2702_s12, %s2703_s15  }
  0x86   : > { %p3287_p2 = scmp.ne.s32.totalorder %s3283_s11, 0 }
  0x87   : > { %p3288_p7 = scmp.eq.s32.totalorder (!%p3287_p2), %s2774_s9, 0 }
  0x88   : > { %327 = sbr.rel (%p3287_p2) target bundleno = 1605 (0x645), region = 48 }
  0x8f   : > { %2660 = dma.done.wait (%p3288_p7), [#allocation4], 1024   ;;  %p3289_p1 = pmov %p3288_p7 }
  0x91   : > { %2662 = vsyncadd (%p3289_p1), [#allocation4], 4294966272  ;;  %p3290_p4 = pmov %p3289_p1 }
  0x92   : > { %p3291_p10 = pmov %p3289_p1 }
  0x93   : > { %2664 = dma.done.wait (%p3290_p4), [#allocation7], 2048  }
  0x94   : > { %2666 = vsyncadd (%p3291_p10), [#allocation7], 4294965248  ;;  %s341_s18 = sand.u32 1, %s2774_s9   ;;  %s343_s12 = sand.u32 1, %s2689_s28  }
  0x95   : > { %s1824_s15 = sshll.u32 %s343_s12, 6  ;;  %s342_s11 = scalar_lea.sflag [#allocation10], %s341_s18 }
  0x96   : > { %s2976_s20 = scalar_lea.vmem [#allocation9], %s1824_s15  ;;  %p3292_p8 = scmp.ne.s32.totalorder %s3282_s10, 0 }
  0x98   : > { %2668 = dma.done.wait (%p3292_p8), %s342_s11, 1024  }
  0x99   : > { %2670 = vsyncadd (%p3292_p8), %s342_s11, 4294966272  ;;  %p3293_p5 = pmov %p3289_p1 }
  0x9a   : > { %p3294_p6 = pmov %p3289_p1 }
  0x9b   : > { %2672 = dma.done.wait (%p3293_p5), [#allocation10], 1024  }
  0x9c   : > { %2674 = vsyncadd (%p3294_p6), [#allocation10], 4294966272  ;;  %p380_p12 = scmp.lt.s32.totalorder %s2774_s9, 2  ;;  %p3295_p13 = scmp.ne.s32.totalorder %s2774_s9, 0 }
  0x9d   : > { %v2273_v0 = vld [vmem:[#allocation8] sm:$0xff] (!%p3295_p13)   ;;  %v2274_v1 = vld [vmem:[#allocation8 + $0x8] sm:$0xff] (!%p3295_p13)   ;;  %v2275_v2 = vld [vmem:[#allocation8 + $0x10] sm:$0xff] (!%p3295_p13)  }
  0x9e   : > { %s381_s17 = scalar_select %p380_p12, %s2774_s9, 2 }
  0x9f   : > { %387 = sbr.rel (%p3295_p13) target bundleno = 702 (0x2be), region = 72  ;;  %1999 = vmatprep.subr.bf16.mxu0 (!%p3295_p13), %v2273_v0  ;;  %v2276_v3 = vld [vmem:[#allocation8 + $0x18] sm:$0xff] (!%p3295_p13)   ;;  %v2281_v4 = vld [vmem:[#allocation6] sm:$0xff] (!%p3295_p13)   ;;  %v2278_v6 = vld [vmem:[#allocation8 + $0x28] sm:$0xff] (!%p3295_p13)  }
  0xa0   : > { %s2991_s23 = scalar_lea.vmem %s3274_s4, %s381_s17  ;;  %2000 = vmatpush3.bf16.msra.mxu0 (!%p3295_p13), %v2273_v0  ;;  %2015 = vmatprep.mubr.bf16.mxu0 (!%p3295_p13), %v2281_v4  ;;  %v2277_v5 = vld [vmem:[#allocation8 + $0x20] sm:$0xff] (!%p3295_p13)   ;;  %v2279_v7 = vld [vmem:[#allocation8 + $0x30] sm:$0xff] (!%p3295_p13)   ;;  %v2280_v8 = vld [vmem:[#allocation8 + $0x38] sm:$0xff] (!%p3295_p13)  }
  0xa1   : > { %2001 = vmatprep.subr.bf16.mxu0 (!%p3295_p13), %v2274_v1  ;;  %v2282_v9 = vld [vmem:[#allocation6 + $0x8] sm:$0xff] (!%p3295_p13)   ;;  %v2283_v10 = vld [vmem:[#allocation6 + $0x10] sm:$0xff] (!%p3295_p13)   ;;  %v2284_v11 = vld [vmem:[#allocation6 + $0x18] sm:$0xff] (!%p3295_p13)  }
  0xa2   : > { %v2285_v12 = vld [vmem:[#allocation6 + $0x20] sm:$0xff] (!%p3295_p13)   ;;  %v2286_v13 = vld [vmem:[#allocation6 + $0x28] sm:$0xff] (!%p3295_p13)   ;;  %v2287_v14 = vld [vmem:[#allocation6 + $0x30] sm:$0xff] (!%p3295_p13)  }
  0xa3   : > { %v2288_v15 = vld [vmem:[#allocation6 + $0x38] sm:$0xff] (!%p3295_p13)   ;;  %v2289_v16 = vld [vmem:[#allocation3] sm:$0xff] (!%p3295_p13)   ;;  %v2290_v41 = vld [vmem:[#allocation3 + $0x8] sm:$0xff] (!%p3295_p13)  }
  0xa4   : > { %2002 = vmatpush3.bf16.msra.mxu0 (!%p3295_p13), %v2274_v1  ;;  %2047 = vmatprep.mubr.bf16.mxu1 (!%p3295_p13), %v2289_v16  ;;  %v2291_v42 = vld [vmem:[#allocation3 + $0x10] sm:$0xff] (!%p3295_p13)   ;;  %v2292_v43 = vld [vmem:[#allocation3 + $0x18] sm:$0xff] (!%p3295_p13)   ;;  %v2293_v44 = vld [vmem:[#allocation3 + $0x20] sm:$0xff] (!%p3295_p13)  }
  0xa5   : > { %2003 = vmatprep.subr.bf16.mxu0 (!%p3295_p13), %v2275_v2  ;;  %v2294_v45 = vld [vmem:[#allocation3 + $0x28] sm:$0xff] (!%p3295_p13)   ;;  %v2295_v46 = vld [vmem:[#allocation3 + $0x30] sm:$0xff] (!%p3295_p13)   ;;  %v2296_v47 = vld [vmem:[#allocation3 + $0x38] sm:$0xff] (!%p3295_p13)  }
  0xa6   : > { %v2996_v48 = vld [vmem:[%s2991_s23] ss:$0 sm:$0xff] }
  0xa8   : > { %2004 = vmatpush3.bf16.msra.mxu0 %v2275_v2 }
  0xa9   : > { %2005 = vmatprep.subr.bf16.mxu0 %v2276_v3 }
  0xac   : > { %2006 = vmatpush3.bf16.msra.mxu0 %v2276_v3 }
  0xad   : > { %2007 = vmatprep.subr.bf16.mxu0 %v2277_v5 }
  0xb0   : > { %2008 = vmatpush3.bf16.msra.mxu0 %v2277_v5 }
  0xb1   : > { %2009 = vmatprep.subr.bf16.mxu0 %v2278_v6 }
  0xb4   : > { %2010 = vmatpush3.bf16.msra.mxu0 %v2278_v6 }
  0xb5   : > { %2011 = vmatprep.subr.bf16.mxu0 %v2279_v7 }
  0xb8   : > { %2012 = vmatpush3.bf16.msra.mxu0 %v2279_v7 }
  0xb9   : > { %2013 = vmatprep.subr.bf16.mxu0 %v2280_v8 }
  0xbc   : > { %2014 = vmatpush3.bf16.msra.mxu0 %v2280_v8 }
  0xbf   : > { %2016 = vmatmul.mubr.bf16.vlgmr.msra.gmra.mrb[0].mxu0 %v2282_v9 }
  0xc0   : > { %2019 = vmatprep.mubr.bf16.mxu0 %v2283_v10 }
  0xc7   : > { %2020 = vmatmul.mubr.bf16.gmra.mrb[4].mxu0 %v2284_v11 }
  0xc8   : > { %2023 = vmatprep.mubr.bf16.mxu0 %v2285_v12 }
  0xcf   : > { %2024 = vmatmul.mubr.bf16.gmra.mrb[8].mxu0 %v2286_v13 }
  0xd0   : > { %2027 = vmatprep.mubr.bf16.mxu0 %v2287_v14 }
  0xd7   : > { %2028 = vmatmul.mubr.bf16.gmra.mrb[12].mxu0 %v2288_v15 }
 0x192   : > { %v2017_v17 = vpop.f32.mrb[0].mxu0 }
 0x193   : > { %v550_v18 = vpop.f32.mrb[1].mxu0 }
 0x194   : > { %v2018_v19 = vpop.f32.mrb[2].mxu0 }
 0x195   : > { %v630_v20 = vpack.c.bf16 %v2018_v19, %v2017_v17  ;;  %v553_v21 = vpop.f32.mrb[3].mxu0 }
 0x196   : > { %v629_v22 = vpack.c.bf16 %v553_v21, %v550_v18 }
 0x198   : > { %2031 = vmatprep.subr.bf16.mxu1 %v629_v22 }
 0x199   : > { %2032 = vmatpush3.bf16.msra.mxu1 %v629_v22 }
 0x19a   : > { %v2021_v23 = vpop.f32.mrb[4].mxu0  ;;  %2033 = vmatprep.subr.bf16.mxu1 %v630_v20 }
 0x19b   : > { %v566_v24 = vpop.f32.mrb[5].mxu0 }
 0x19c   : > { %v2022_v25 = vpop.f32.mrb[6].mxu0 }
 0x19d   : > { %v632_v26 = vpack.c.bf16 %v2022_v25, %v2021_v23  ;;  %v569_v27 = vpop.f32.mrb[7].mxu0  ;;  %2034 = vmatpush3.bf16.msra.mxu1 %v630_v20 }
 0x19e   : > { %v631_v28 = vpack.c.bf16 %v569_v27, %v566_v24 }
 0x1a0   : > { %2035 = vmatprep.subr.bf16.mxu1 %v631_v28 }
 0x1a1   : > { %2036 = vmatpush3.bf16.msra.mxu1 %v631_v28 }
 0x1a2   : > { %v2025_v29 = vpop.f32.mrb[8].mxu0  ;;  %2037 = vmatprep.subr.bf16.mxu1 %v632_v26 }
 0x1a3   : > { %v582_v30 = vpop.f32.mrb[9].mxu0 }
 0x1a4   : > { %v2026_v31 = vpop.f32.mrb[10].mxu0 }
 0x1a5   : > { %v634_v32 = vpack.c.bf16 %v2026_v31, %v2025_v29  ;;  %v585_v33 = vpop.f32.mrb[11].mxu0  ;;  %2038 = vmatpush3.bf16.msra.mxu1 %v632_v26 }
 0x1a6   : > { %v633_v34 = vpack.c.bf16 %v585_v33, %v582_v30 }
 0x1a8   : > { %2039 = vmatprep.subr.bf16.mxu1 %v633_v34 }
 0x1a9   : > { %2040 = vmatpush3.bf16.msra.mxu1 %v633_v34 }
 0x1aa   : > { %v2029_v35 = vpop.f32.mrb[12].mxu0  ;;  %2041 = vmatprep.subr.bf16.mxu1 %v634_v32 }
 0x1ab   : > { %v598_v36 = vpop.f32.mrb[13].mxu0 }
 0x1ac   : > { %v2030_v37 = vpop.f32.mrb[14].mxu0 }
 0x1ad   : > { %v636_v38 = vpack.c.bf16 %v2030_v37, %v2029_v35  ;;  %v601_v39 = vpop.f32.mrb[15].mxu0  ;;  %2042 = vmatpush3.bf16.msra.mxu1 %v634_v32 }
 0x1ae   : > { %v635_v40 = vpack.c.bf16 %v601_v39, %v598_v36 }
 0x1b0   : > { %2043 = vmatprep.subr.bf16.mxu1 %v635_v40 }
 0x1b1   : > { %2044 = vmatpush3.bf16.msra.mxu1 %v635_v40 }
 0x1b2   : > { %2045 = vmatprep.subr.bf16.mxu1 %v636_v38 }
 0x1b5   : > { %2046 = vmatpush3.bf16.msra.mxu1 %v636_v38 }
 0x1b8   : > { %2048 = vmatmul.mubr.bf16.vlgmr.msra.gmra.mrb[0].mxu1 %v2290_v41 }
 0x1b9   : > { %2051 = vmatprep.mubr.bf16.mxu1 %v2291_v42 }
 0x1c0   : > { %2052 = vmatmul.mubr.bf16.gmra.mrb[4].mxu1 %v2292_v43 }
 0x1c1   : > { %2055 = vmatprep.mubr.bf16.mxu1 %v2293_v44 }
 0x1c8   : > { %2056 = vmatmul.mubr.bf16.gmra.mrb[8].mxu1 %v2294_v45 }
 0x1c9   : > { %2059 = vmatprep.mubr.bf16.mxu1 %v2295_v46 }
 0x1d0   : > { %2060 = vmatmul.mubr.bf16.gmra.mrb[12].mxu1 %v2296_v47 }
 0x28b   : > { %v2049_v49 = vpop.f32.mrb[0].mxu1 }
 0x28c   : > { %v735_v50 = vadd.f32 %v2049_v49, %v2996_v48  ;;  %v726_v51 = vpop.f32.mrb[1].mxu1 }
 0x28d   : > { %v3000_v52 = vadd.f32 %v2996_v48, %v726_v51  ;;  %v2050_v53 = vpop.f32.mrb[2].mxu1 }
 0x28e   : > { %v807_v54 = vmin.f32 %v735_v50, 0.0  ;;  %v738_v55 = vadd.f32 %v2050_v53, %v2996_v48  ;;  %v729_v56 = vpop.f32.mrb[3].mxu1  ;;  %vm791_vm0 = vcmp.gt.f32.partialorder %v735_v50, 0.0 }
 0x28f   : > { %v805_v57 = vmin.f32 %v3000_v52, 0.0  ;;  %v730_v58 = vadd.f32 %v2996_v48, %v729_v56  ;;  %vm789_vm1 = vcmp.gt.f32.partialorder %v3000_v52, 0.0 }
 0x290   : > { %v825_v59 = vmul.f32 1.442695, %v807_v54  ;;  %v808_v60 = vmin.f32 %v738_v55, 0.0  ;;  %vm792_vm2 = vcmp.gt.f32.partialorder %v738_v55, 0.0 }
 0x291   : > { %v821_v61 = vmul.f32 1.442695, %v805_v57  ;;  %v806_v62 = vmin.f32 %v730_v58, 0.0  ;;  %vm790_vm3 = vcmp.gt.f32.partialorder %v730_v58, 0.0 }
 0x292   : > { %2297 = vpow2.f32 %v825_v59  ;;  %v827_v63 = vmul.f32 1.442695, %v808_v60 }
 0x293   : > { %2299 = vpow2.f32 %v821_v61  ;;  %v823_v0 = vmul.f32 1.442695, %v806_v62  ;;  %v2053_v1 = vpop.f32.mrb[4].mxu1 }
 0x294   : > { %2301 = vpow2.f32 %v827_v63  ;;  %v3006_v2 = vadd.f32 %v2053_v1, %v2996_v48  ;;  %v742_v3 = vpop.f32.mrb[5].mxu1 }
 0x295   : > { %2303 = vpow2.f32 %v823_v0  ;;  %v3009_v4 = vadd.f32 %v2996_v48, %v742_v3  ;;  %v2054_v5 = vpop.f32.mrb[6].mxu1 }
 0x296   : > { %v811_v6 = vmin.f32 %v3006_v2, 0.0  ;;  %v3013_v7 = vadd.f32 %v2054_v5, %v2996_v48  ;;  %v745_v8 = vpop.f32.mrb[7].mxu1  ;;  %vm795_vm4 = vcmp.gt.f32.partialorder %v3006_v2, 0.0 }
 0x297   : > { %v809_v9 = vmin.f32 %v3009_v4, 0.0  ;;  %v3017_v10 = vadd.f32 %v2996_v48, %v745_v8  ;;  %vm793_vm5 = vcmp.gt.f32.partialorder %v3009_v4, 0.0 }
 0x298   : > { %v833_v11 = vmul.f32 1.442695, %v811_v6  ;;  %v812_v12 = vmin.f32 %v3013_v7, 0.0  ;;  %vm796_vm6 = vcmp.gt.f32.partialorder %v3013_v7, 0.0 }
 0x299   : > { %v829_v13 = vmul.f32 1.442695, %v809_v9  ;;  %v810_v14 = vmin.f32 %v3017_v10, 0.0  ;;  %vm794_vm7 = vcmp.gt.f32.partialorder %v3017_v10, 0.0 }
 0x29a   : > { %2305 = vpow2.f32 %v833_v11  ;;  %v835_v15 = vmul.f32 1.442695, %v812_v12 }
 0x29b   : > { %2307 = vpow2.f32 %v829_v13  ;;  %v831_v16 = vmul.f32 1.442695, %v810_v14  ;;  %v2057_v17 = vpop.f32.mrb[8].mxu1 }
 0x29c   : > { %v2298_v18 = vpop.eup %2297  ;;  %2309 = vpow2.f32 %v835_v15  ;;  %v3022_v19 = vadd.f32 %v2057_v17, %v2996_v48  ;;  %v758_v20 = vpop.f32.mrb[9].mxu1 }
 0x29d   : > { %v2300_v21 = vpop.eup %2299  ;;  %v1854_v22 = vadd.f32 -1.0, %v2298_v18  ;;  %2311 = vpow2.f32 %v831_v16  ;;  %v3025_v23 = vadd.f32 %v2996_v48, %v758_v20  ;;  %v2058_v24 = vpop.f32.mrb[10].mxu1 }
 0x29e   : > { %v2302_v25 = vpop.eup %2301  ;;  %v1852_v26 = vadd.f32 -1.0, %v2300_v21  ;;  %v815_v27 = vmin.f32 %v3022_v19, 0.0  ;;  %v3029_v28 = vadd.f32 %v2058_v24, %v2996_v48  ;;  %v761_v29 = vpop.f32.mrb[11].mxu1  ;;  %vm799_vm8 = vcmp.gt.f32.partialorder %v3022_v19, 0.0 }
 0x29f   : > { %v2304_v30 = vpop.eup %2303  ;;  %v1855_v31 = vadd.f32 -1.0, %v2302_v25  ;;  %v813_v32 = vmin.f32 %v3025_v23, 0.0  ;;  %v871_v33 = vsel %vm791_vm0, %v735_v50, %v1854_v22  ;;  %v3035_v39 = vadd.f32 %v2996_v48, %v761_v29 }
 0x2a0   : > { %v1853_v34 = vadd.f32 -1.0, %v2304_v30  ;;  %v841_v35 = vmul.f32 1.442695, %v815_v27  ;;  %v816_v38 = vmin.f32 %v3029_v28, 0.0  ;;  %v869_v40 = vsel %vm789_vm1, %v3000_v52, %v1852_v26 }
 0x2a1   : > { %v872_v36 = vsel %vm792_vm2, %v738_v55, %v1855_v31  ;;  %v837_v37 = vmul.f32 1.442695, %v813_v32  ;;  %v814_v47 = vmin.f32 %v3035_v39, 0.0  ;;  %vm800_vm9 = vcmp.gt.f32.partialorder %v3029_v28, 0.0 }
 0x2a2   : > { %v886_v41 = vpack.c.bf16 %v872_v36, %v871_v33  ;;  %v870_v42 = vsel %vm790_vm3, %v730_v58, %v1853_v34  ;;  %2313 = vpow2.f32 %v841_v35  ;;  %v843_v44 = vmul.f32 1.442695, %v816_v38 }
 0x2a3   : > { %v885_v43 = vpack.c.bf16 %v870_v42, %v869_v40  ;;  %v2061_v45 = vpop.f32.mrb[12].mxu1  ;;  %2315 = vpow2.f32 %v837_v37  ;;  %v839_v57 = vmul.f32 1.442695, %v814_v47  ;;  %vm797_vm10 = vcmp.gt.f32.partialorder %v3025_v23, 0.0 }
 0x2a4   : > { %v2306_v46 = vpop.eup %2305  ;;  %894 = vst [vmem:[#allocation2 + $0x8] sm:$0xff] %v886_v41  ;;  %v3040_v49 = vadd.f32 %v2061_v45, %v2996_v48  ;;  %v774_v50 = vpop.f32.mrb[13].mxu1  ;;  %2317 = vpow2.f32 %v843_v44  ;;  %vm798_vm11 = vcmp.gt.f32.partialorder %v3035_v39, 0.0 }
 0x2a5   : > { %v2308_v51 = vpop.eup %2307  ;;  %893 = vst [vmem:[#allocation2] sm:$0xff] %v885_v43  ;;  %v1858_v52 = vadd.f32 -1.0, %v2306_v46  ;;  %v3044_v53 = vadd.f32 %v2996_v48, %v774_v50  ;;  %v2062_v54 = vpop.f32.mrb[14].mxu1  ;;  %2319 = vpow2.f32 %v839_v57 }
 0x2a6   : > { %v2310_v55 = vpop.eup %2309  ;;  %v1856_v56 = vadd.f32 -1.0, %v2308_v51  ;;  %v819_v58 = vmin.f32 %v3040_v49, 0.0  ;;  %v777_v59 = vpop.f32.mrb[15].mxu1  ;;  %v786_v6 = vadd.f32 %v2062_v54, %v2996_v48  ;;  %vm803_vm12 = vcmp.gt.f32.partialorder %v3040_v49, 0.0 }
 0x2a7   : > { %v2312_v60 = vpop.eup %2311  ;;  %v1859_v61 = vadd.f32 -1.0, %v2310_v55  ;;  %v817_v62 = vmin.f32 %v3044_v53, 0.0  ;;  %v875_v63 = vsel %vm795_vm4, %v3006_v2, %v1858_v52  ;;  %v778_v8 = vadd.f32 %v2996_v48, %v777_v59 }
 0x2a8   : > { %v1857_v0 = vadd.f32 -1.0, %v2312_v60  ;;  %v849_v1 = vmul.f32 1.442695, %v819_v58  ;;  %v873_v9 = vsel %vm793_vm5, %v3009_v4, %v1856_v56  ;;  %v820_v2 = vmin.f32 %v786_v6, 0.0 }
 0x2a9   : > { %v876_v3 = vsel %vm796_vm6, %v3013_v7, %v1859_v61  ;;  %v845_v5 = vmul.f32 1.442695, %v817_v62  ;;  %v818_v15 = vmin.f32 %v778_v8, 0.0  ;;  %vm804_vm13 = vcmp.gt.f32.partialorder %v786_v6, 0.0 }
 0x2aa   : > { %v888_v11 = vpack.c.bf16 %v876_v3, %v875_v63  ;;  %v874_v12 = vsel %vm794_vm7, %v3017_v10, %v1857_v0  ;;  %2321 = vpow2.f32 %v849_v1  ;;  %v851_v7 = vmul.f32 1.442695, %v820_v2 }
 0x2ab   : > { %v887_v13 = vpack.c.bf16 %v874_v12, %v873_v9  ;;  %2323 = vpow2.f32 %v845_v5  ;;  %v847_v18 = vmul.f32 1.442695, %v818_v15  ;;  %vm801_vm14 = vcmp.gt.f32.partialorder %v3044_v53, 0.0 }
 0x2ac   : > { %v2314_v14 = vpop.eup %2313  ;;  %896 = vst [vmem:[#allocation2 + $0x18] sm:$0xff] %v888_v11  ;;  %2325 = vpow2.f32 %v851_v7  ;;  %vm802_vm15 = vcmp.gt.f32.partialorder %v778_v8, 0.0 }
 0x2ad   : > { %895 = vst [vmem:[#allocation2 + $0x10] sm:$0xff] %v887_v13  ;;  %v2316_v16 = vpop.eup %2315  ;;  %v1862_v17 = vadd.f32 -1.0, %v2314_v14  ;;  %2327 = vpow2.f32 %v847_v18 }
 0x2ae   : > { %v2318_v48 = vpop.eup %2317  ;;  %v1860_v4 = vadd.f32 -1.0, %v2316_v16 }
 0x2af   : > { %v1863_v20 = vadd.f32 -1.0, %v2318_v48  ;;  %v2320_v10 = vpop.eup %2319  ;;  %v879_v21 = vsel %vm799_vm8, %v3022_v19, %v1862_v17 }
 0x2b0   : > { %v1861_v25 = vadd.f32 -1.0, %v2320_v10  ;;  %v877_v27 = vsel %vm797_vm10, %v3025_v23, %v1860_v4 }
 0x2b1   : > { %v880_v22 = vsel %vm800_vm9, %v3029_v28, %v1863_v20 }
 0x2b2   : > { %v890_v24 = vpack.c.bf16 %v880_v22, %v879_v21  ;;  %v878_v29 = vsel %vm798_vm11, %v3035_v39, %v1861_v25 }
 0x2b3   : > { %v889_v31 = vpack.c.bf16 %v878_v29, %v877_v27 }
 0x2b4   : > { %v2322_v26 = vpop.eup %2321  ;;  %898 = vst [vmem:[#allocation2 + $0x28] sm:$0xff] %v890_v24 }
 0x2b5   : > { %v2324_v30 = vpop.eup %2323  ;;  %897 = vst [vmem:[#allocation2 + $0x20] sm:$0xff] %v889_v31  ;;  %v1866_v32 = vadd.f32 -1.0, %v2322_v26 }
 0x2b6   : > { %v2326_v33 = vpop.eup %2325  ;;  %v1864_v19 = vadd.f32 -1.0, %v2324_v30 }
 0x2b7   : > { %v2328_v34 = vpop.eup %2327  ;;  %v1867_v28 = vadd.f32 -1.0, %v2326_v33  ;;  %v883_v36 = vsel %vm803_vm12, %v3040_v49, %v1866_v32 }
 0x2b8   : > { %v1865_v35 = vadd.f32 -1.0, %v2328_v34  ;;  %v881_v37 = vsel %vm801_vm14, %v3044_v53, %v1864_v19 }
 0x2b9   : > { %v884_v23 = vsel %vm804_vm13, %v786_v6, %v1867_v28 }
 0x2ba   : > { %v892_v38 = vpack.c.bf16 %v884_v23, %v883_v36  ;;  %v882_v39 = vsel %vm802_vm15, %v778_v8, %v1865_v35 }
 0x2bb   : > { %v891_v40 = vpack.c.bf16 %v882_v39, %v881_v37 }
 0x2bc   : > { %900 = vst [vmem:[#allocation2 + $0x38] sm:$0xff] %v892_v38 }
 0x2bd   : > { %899 = vst [vmem:[#allocation2 + $0x30] sm:$0xff] %v891_v40 }
 0x2be PF: > { %p1868_p0 = scmp.le.s32.totalorder %s2774_s9, 0 }
 0x2bf   : > { %v2329_v41 = vld [vmem:[%s2976_s20] sm:$0xff] (!%p1868_p0)   ;;  %v2330_v42 = vld [vmem:[%s2976_s20 + $0x8] sm:$0xff] (!%p1868_p0)   ;;  %v2331_v43 = vld [vmem:[%s2976_s20 + $0x10] sm:$0xff] (!%p1868_p0)  }
 0x2c0   : > { %904 = sbr.rel (%p1868_p0) target bundleno = 1247 (0x4df), region = 76  ;;  %2063 = vmatprep.subr.bf16.mxu0 (!%p1868_p0), %v2329_v41  ;;  %v2332_v44 = vld [vmem:[%s2976_s20 + $0x18] sm:$0xff] (!%p1868_p0)   ;;  %v905_v45 = vld [vmem:[#allocation2] sm:$0xff] (!%p1868_p0)  ;;  %v2334_v47 = vld [vmem:[%s2976_s20 + $0x28] sm:$0xff] (!%p1868_p0)  }
 0x2c1   : > { %2064 = vmatpush3.bf16.msra.mxu0 (!%p1868_p0), %v2329_v41  ;;  %2079 = vmatprep.mubr.bf16.mxu0 (!%p1868_p0), %v905_v45  ;;  %v2333_v46 = vld [vmem:[%s2976_s20 + $0x20] sm:$0xff] (!%p1868_p0)   ;;  %v2335_v49 = vld [vmem:[%s2976_s20 + $0x30] sm:$0xff] (!%p1868_p0)   ;;  %v2336_v50 = vld [vmem:[%s2976_s20 + $0x38] sm:$0xff] (!%p1868_p0)  }
 0x2c2   : > { %2065 = vmatprep.subr.bf16.mxu0 (!%p1868_p0), %v2330_v42  ;;  %v906_v51 = vld [vmem:[#allocation2 + $0x8] sm:$0xff] (!%p1868_p0)  ;;  %v907_v52 = vld [vmem:[#allocation2 + $0x10] sm:$0xff] (!%p1868_p0)  ;;  %v908_v53 = vld [vmem:[#allocation2 + $0x18] sm:$0xff] (!%p1868_p0) }
 0x2c3   : > { %v909_v54 = vld [vmem:[#allocation2 + $0x20] sm:$0xff] (!%p1868_p0)  ;;  %v910_v55 = vld [vmem:[#allocation2 + $0x28] sm:$0xff] (!%p1868_p0)  ;;  %v912_v57 = vld [vmem:[#allocation2 + $0x38] sm:$0xff] (!%p1868_p0) }
 0x2c4   : > { %v911_v56 = vld [vmem:[#allocation2 + $0x30] sm:$0xff] (!%p1868_p0)  ;;  %v2337_v58 = vld [vmem:[#allocation3] sm:$0xff] (!%p1868_p0)   ;;  %v2338_v4 = vld [vmem:[#allocation3 + $0x8] sm:$0xff] (!%p1868_p0)  }
 0x2c5   : > { %2066 = vmatpush3.bf16.msra.mxu0 (!%p1868_p0), %v2330_v42  ;;  %2111 = vmatprep.mubr.bf16.mxu1 (!%p1868_p0), %v2337_v58  ;;  %v2339_v10 = vld [vmem:[#allocation3 + $0x10] sm:$0xff] (!%p1868_p0)   ;;  %v2340_v21 = vld [vmem:[#allocation3 + $0x18] sm:$0xff] (!%p1868_p0)   ;;  %v2341_v22 = vld [vmem:[#allocation3 + $0x20] sm:$0xff] (!%p1868_p0)  }
 0x2c6   : > { %2067 = vmatprep.subr.bf16.mxu0 (!%p1868_p0), %v2331_v43  ;;  %v2342_v24 = vld [vmem:[#allocation3 + $0x28] sm:$0xff] (!%p1868_p0)   ;;  %v2343_v25 = vld [vmem:[#allocation3 + $0x30] sm:$0xff] (!%p1868_p0)   ;;  %v2344_v26 = vld [vmem:[#allocation3 + $0x38] sm:$0xff] (!%p1868_p0)  }
 0x2c7   : > { %v3083_v27 = vld [vmem:[%s2991_s23] ss:$0 sm:$0xff] }
 0x2c9   : > { %2068 = vmatpush3.bf16.msra.mxu0 %v2331_v43 }
 0x2ca   : > { %2069 = vmatprep.subr.bf16.mxu0 %v2332_v44 }
 0x2cd   : > { %2070 = vmatpush3.bf16.msra.mxu0 %v2332_v44 }
 0x2ce   : > { %2071 = vmatprep.subr.bf16.mxu0 %v2333_v46 }
 0x2d1   : > { %2072 = vmatpush3.bf16.msra.mxu0 %v2333_v46 }
 0x2d2   : > { %2073 = vmatprep.subr.bf16.mxu0 %v2334_v47 }
 0x2d5   : > { %2074 = vmatpush3.bf16.msra.mxu0 %v2334_v47 }
 0x2d6   : > { %2075 = vmatprep.subr.bf16.mxu0 %v2335_v49 }
 0x2d9   : > { %2076 = vmatpush3.bf16.msra.mxu0 %v2335_v49 }
 0x2da   : > { %2077 = vmatprep.subr.bf16.mxu0 %v2336_v50 }
 0x2dd   : > { %2078 = vmatpush3.bf16.msra.mxu0 %v2336_v50 }
 0x2e0   : > { %2080 = vmatmul.mubr.bf16.vlgmr.msra.gmra.mrb[0].mxu0 %v906_v51 }
 0x2e1   : > { %2083 = vmatprep.mubr.bf16.mxu0 %v907_v52 }
 0x2e8   : > { %2084 = vmatmul.mubr.bf16.gmra.mrb[4].mxu0 %v908_v53 }
 0x2e9   : > { %2087 = vmatprep.mubr.bf16.mxu0 %v909_v54 }
 0x2f0   : > { %2088 = vmatmul.mubr.bf16.gmra.mrb[8].mxu0 %v910_v55 }
 0x2f1   : > { %2091 = vmatprep.mubr.bf16.mxu0 %v911_v56 }
 0x2f8   : > { %2092 = vmatmul.mubr.bf16.gmra.mrb[12].mxu0 %v912_v57 }
 0x3b3   : > { %v2081_v59 = vpop.f32.mrb[0].mxu0 }
 0x3b4   : > { %v1011_v60 = vpop.f32.mrb[1].mxu0 }
 0x3b5   : > { %v2082_v61 = vpop.f32.mrb[2].mxu0 }
 0x3b6   : > { %v1091_v62 = vpack.c.bf16 %v2082_v61, %v2081_v59  ;;  %v1014_v63 = vpop.f32.mrb[3].mxu0 }
 0x3b7   : > { %v1090_v0 = vpack.c.bf16 %v1014_v63, %v1011_v60 }
 0x3b9   : > { %2095 = vmatprep.subr.bf16.mxu1 %v1090_v0 }
 0x3ba   : > { %2096 = vmatpush3.bf16.msra.mxu1 %v1090_v0 }
 0x3bb   : > { %v2085_v1 = vpop.f32.mrb[4].mxu0  ;;  %2097 = vmatprep.subr.bf16.mxu1 %v1091_v62 }
 0x3bc   : > { %v1027_v3 = vpop.f32.mrb[5].mxu0 }
 0x3bd   : > { %v2086_v5 = vpop.f32.mrb[6].mxu0 }
 0x3be   : > { %v1093_v6 = vpack.c.bf16 %v2086_v5, %v2085_v1  ;;  %v1030_v8 = vpop.f32.mrb[7].mxu0  ;;  %2098 = vmatpush3.bf16.msra.mxu1 %v1091_v62 }
 0x3bf   : > { %v1092_v9 = vpack.c.bf16 %v1030_v8, %v1027_v3 }
 0x3c1   : > { %2099 = vmatprep.subr.bf16.mxu1 %v1092_v9 }
 0x3c2   : > { %2100 = vmatpush3.bf16.msra.mxu1 %v1092_v9 }
 0x3c3   : > { %v2089_v11 = vpop.f32.mrb[8].mxu0  ;;  %2101 = vmatprep.subr.bf16.mxu1 %v1093_v6 }
 0x3c4   : > { %v1043_v12 = vpop.f32.mrb[9].mxu0 }
 0x3c5   : > { %v2090_v13 = vpop.f32.mrb[10].mxu0 }
 0x3c6   : > { %v1095_v2 = vpack.c.bf16 %v2090_v13, %v2089_v11  ;;  %v1046_v14 = vpop.f32.mrb[11].mxu0  ;;  %2102 = vmatpush3.bf16.msra.mxu1 %v1093_v6 }
 0x3c7   : > { %v1094_v15 = vpack.c.bf16 %v1046_v14, %v1043_v12 }
 0x3c9   : > { %2103 = vmatprep.subr.bf16.mxu1 %v1094_v15 }
 0x3ca   : > { %2104 = vmatpush3.bf16.msra.mxu1 %v1094_v15 }
 0x3cb   : > { %v2093_v7 = vpop.f32.mrb[12].mxu0  ;;  %2105 = vmatprep.subr.bf16.mxu1 %v1095_v2 }
 0x3cc   : > { %v1059_v16 = vpop.f32.mrb[13].mxu0 }
 0x3cd   : > { %v2094_v17 = vpop.f32.mrb[14].mxu0 }
 0x3ce   : > { %v1097_v18 = vpack.c.bf16 %v2094_v17, %v2093_v7  ;;  %v1062_v48 = vpop.f32.mrb[15].mxu0  ;;  %2106 = vmatpush3.bf16.msra.mxu1 %v1095_v2 }
 0x3cf   : > { %v1096_v20 = vpack.c.bf16 %v1062_v48, %v1059_v16 }
 0x3d1   : > { %2107 = vmatprep.subr.bf16.mxu1 %v1096_v20 }
 0x3d2   : > { %2108 = vmatpush3.bf16.msra.mxu1 %v1096_v20 }
 0x3d3   : > { %2109 = vmatprep.subr.bf16.mxu1 %v1097_v18 }
 0x3d6   : > { %2110 = vmatpush3.bf16.msra.mxu1 %v1097_v18 }
 0x3d9   : > { %2112 = vmatmul.mubr.bf16.vlgmr.msra.gmra.mrb[0].mxu1 %v2338_v4 }
 0x3da   : > { %2115 = vmatprep.mubr.bf16.mxu1 %v2339_v10 }
 0x3e1   : > { %2116 = vmatmul.mubr.bf16.gmra.mrb[4].mxu1 %v2340_v21 }
 0x3e2   : > { %2119 = vmatprep.mubr.bf16.mxu1 %v2341_v22 }
 0x3e9   : > { %2120 = vmatmul.mubr.bf16.gmra.mrb[8].mxu1 %v2342_v24 }
 0x3ea   : > { %2123 = vmatprep.mubr.bf16.mxu1 %v2343_v25 }
 0x3f1   : > { %2124 = vmatmul.mubr.bf16.gmra.mrb[12].mxu1 %v2344_v26 }
 0x4ac   : > { %v2113_v29 = vpop.f32.mrb[0].mxu1 }
 0x4ad   : > { %v1196_v30 = vadd.f32 %v2113_v29, %v3083_v27  ;;  %v1187_v31 = vpop.f32.mrb[1].mxu1 }
 0x4ae   : > { %v3087_v32 = vadd.f32 %v3083_v27, %v1187_v31  ;;  %v2114_v33 = vpop.f32.mrb[2].mxu1 }
 0x4af   : > { %v1268_v19 = vmin.f32 %v1196_v30, 0.0  ;;  %v1199_v34 = vadd.f32 %v2114_v33, %v3083_v27  ;;  %v1190_v28 = vpop.f32.mrb[3].mxu1  ;;  %vm1252_vm0 = vcmp.gt.f32.partialorder %v1196_v30, 0.0 }
 0x4b0   : > { %v1266_v35 = vmin.f32 %v3087_v32, 0.0  ;;  %v1191_v36 = vadd.f32 %v3083_v27, %v1190_v28  ;;  %vm1250_vm1 = vcmp.gt.f32.partialorder %v3087_v32, 0.0 }
 0x4b1   : > { %v1286_v23 = vmul.f32 1.442695, %v1268_v19  ;;  %v1269_v37 = vmin.f32 %v1199_v34, 0.0  ;;  %vm1253_vm2 = vcmp.gt.f32.partialorder %v1199_v34, 0.0 }
 0x4b2   : > { %v1282_v38 = vmul.f32 1.442695, %v1266_v35  ;;  %v1267_v39 = vmin.f32 %v1191_v36, 0.0  ;;  %vm1251_vm3 = vcmp.gt.f32.partialorder %v1191_v36, 0.0 }
 0x4b3   : > { %2345 = vpow2.f32 %v1286_v23  ;;  %v1288_v40 = vmul.f32 1.442695, %v1269_v37 }
 0x4b4   : > { %2347 = vpow2.f32 %v1282_v38  ;;  %v1284_v41 = vmul.f32 1.442695, %v1267_v39  ;;  %v2117_v42 = vpop.f32.mrb[4].mxu1 }
 0x4b5   : > { %2349 = vpow2.f32 %v1288_v40  ;;  %v3093_v43 = vadd.f32 %v2117_v42, %v3083_v27  ;;  %v1203_v44 = vpop.f32.mrb[5].mxu1 }
 0x4b6   : > { %2351 = vpow2.f32 %v1284_v41  ;;  %v3096_v45 = vadd.f32 %v3083_v27, %v1203_v44  ;;  %v2118_v46 = vpop.f32.mrb[6].mxu1 }
 0x4b7   : > { %v1272_v47 = vmin.f32 %v3093_v43, 0.0  ;;  %v3100_v49 = vadd.f32 %v2118_v46, %v3083_v27  ;;  %v1206_v50 = vpop.f32.mrb[7].mxu1  ;;  %vm1256_vm4 = vcmp.gt.f32.partialorder %v3093_v43, 0.0 }
 0x4b8   : > { %v1270_v51 = vmin.f32 %v3096_v45, 0.0  ;;  %v3104_v52 = vadd.f32 %v3083_v27, %v1206_v50  ;;  %vm1254_vm5 = vcmp.gt.f32.partialorder %v3096_v45, 0.0 }
 0x4b9   : > { %v1294_v53 = vmul.f32 1.442695, %v1272_v47  ;;  %v1273_v54 = vmin.f32 %v3100_v49, 0.0  ;;  %vm1257_vm6 = vcmp.gt.f32.partialorder %v3100_v49, 0.0 }
 0x4ba   : > { %v1290_v55 = vmul.f32 1.442695, %v1270_v51  ;;  %v1271_v56 = vmin.f32 %v3104_v52, 0.0  ;;  %vm1255_vm7 = vcmp.gt.f32.partialorder %v3104_v52, 0.0 }
 0x4bb   : > { %2353 = vpow2.f32 %v1294_v53  ;;  %v1296_v57 = vmul.f32 1.442695, %v1273_v54 }
 0x4bc   : > { %2355 = vpow2.f32 %v1290_v55  ;;  %v1292_v58 = vmul.f32 1.442695, %v1271_v56  ;;  %v2121_v59 = vpop.f32.mrb[8].mxu1 }
 0x4bd   : > { %v2346_v60 = vpop.eup %2345  ;;  %2357 = vpow2.f32 %v1296_v57  ;;  %v3109_v61 = vadd.f32 %v2121_v59, %v3083_v27  ;;  %v1219_v62 = vpop.f32.mrb[9].mxu1 }
 0x4be   : > { %v2348_v63 = vpop.eup %2347  ;;  %v1888_v0 = vadd.f32 -1.0, %v2346_v60  ;;  %2359 = vpow2.f32 %v1292_v58  ;;  %v3112_v1 = vadd.f32 %v3083_v27, %v1219_v62  ;;  %v2122_v3 = vpop.f32.mrb[10].mxu1 }
 0x4bf   : > { %v2350_v5 = vpop.eup %2349  ;;  %v1886_v6 = vadd.f32 -1.0, %v2348_v63  ;;  %v1276_v8 = vmin.f32 %v3109_v61, 0.0  ;;  %v3116_v9 = vadd.f32 %v2122_v3, %v3083_v27  ;;  %v1222_v11 = vpop.f32.mrb[11].mxu1  ;;  %vm1260_vm8 = vcmp.gt.f32.partialorder %v3109_v61, 0.0 }
 0x4c0   : > { %v2352_v12 = vpop.eup %2351  ;;  %v1889_v13 = vadd.f32 -1.0, %v2350_v5  ;;  %v1274_v2 = vmin.f32 %v3112_v1, 0.0  ;;  %v1332_v14 = vsel %vm1252_vm0, %v1196_v30, %v1888_v0  ;;  %v3122_v48 = vadd.f32 %v3083_v27, %v1222_v11 }
 0x4c1   : > { %v1887_v15 = vadd.f32 -1.0, %v2352_v12  ;;  %v1302_v7 = vmul.f32 1.442695, %v1276_v8  ;;  %v1277_v18 = vmin.f32 %v3116_v9, 0.0  ;;  %v1330_v20 = vsel %vm1250_vm1, %v3087_v32, %v1886_v6 }
 0x4c2   : > { %v1333_v16 = vsel %vm1253_vm2, %v1199_v34, %v1889_v13  ;;  %v1298_v17 = vmul.f32 1.442695, %v1274_v2  ;;  %v1275_v26 = vmin.f32 %v3122_v48, 0.0  ;;  %vm1261_vm9 = vcmp.gt.f32.partialorder %v3116_v9, 0.0 }
 0x4c3   : > { %v1347_v4 = vpack.c.bf16 %v1333_v16, %v1332_v14  ;;  %v1331_v10 = vsel %vm1251_vm3, %v1191_v36, %v1887_v15  ;;  %2361 = vpow2.f32 %v1302_v7  ;;  %v1304_v22 = vmul.f32 1.442695, %v1277_v18 }
 0x4c4   : > { %v1346_v21 = vpack.c.bf16 %v1331_v10, %v1330_v20  ;;  %v2125_v24 = vpop.f32.mrb[12].mxu1  ;;  %2363 = vpow2.f32 %v1298_v17  ;;  %v1300_v35 = vmul.f32 1.442695, %v1275_v26  ;;  %vm1258_vm10 = vcmp.gt.f32.partialorder %v3112_v1, 0.0 }
 0x4c5   : > { %v2354_v25 = vpop.eup %2353  ;;  %1355 = vst [vmem:[#allocation2 + $0x8] sm:$0xff] %v1347_v4  ;;  %v3127_v29 = vadd.f32 %v2125_v24, %v3083_v27  ;;  %v1235_v30 = vpop.f32.mrb[13].mxu1  ;;  %2365 = vpow2.f32 %v1304_v22  ;;  %vm1259_vm11 = vcmp.gt.f32.partialorder %v3122_v48, 0.0 }
 0x4c6   : > { %v2356_v31 = vpop.eup %2355  ;;  %1354 = vst [vmem:[#allocation2] sm:$0xff] %v1346_v21  ;;  %v1892_v32 = vadd.f32 -1.0, %v2354_v25  ;;  %v3131_v33 = vadd.f32 %v3083_v27, %v1235_v30  ;;  %v2126_v19 = vpop.f32.mrb[14].mxu1  ;;  %2367 = vpow2.f32 %v1300_v35 }
 0x4c7   : > { %v2358_v34 = vpop.eup %2357  ;;  %v1890_v28 = vadd.f32 -1.0, %v2356_v31  ;;  %v1280_v36 = vmin.f32 %v3127_v29, 0.0  ;;  %v1238_v23 = vpop.f32.mrb[15].mxu1  ;;  %v1247_v47 = vadd.f32 %v2126_v19, %v3083_v27  ;;  %vm1264_vm12 = vcmp.gt.f32.partialorder %v3127_v29, 0.0 }
 0x4c8   : > { %v2360_v37 = vpop.eup %2359  ;;  %v1893_v38 = vadd.f32 -1.0, %v2358_v34  ;;  %v1278_v39 = vmin.f32 %v3131_v33, 0.0  ;;  %v1336_v40 = vsel %vm1256_vm4, %v3093_v43, %v1892_v32  ;;  %v1239_v50 = vadd.f32 %v3083_v27, %v1238_v23 }
 0x4c9   : > { %v1891_v41 = vadd.f32 -1.0, %v2360_v37  ;;  %v1310_v42 = vmul.f32 1.442695, %v1280_v36  ;;  %v1334_v51 = vsel %vm1254_vm5, %v3096_v45, %v1890_v28  ;;  %v1281_v43 = vmin.f32 %v1247_v47, 0.0 }
 0x4ca   : > { %v1337_v44 = vsel %vm1257_vm6, %v3100_v49, %v1893_v38  ;;  %v1306_v46 = vmul.f32 1.442695, %v1278_v39  ;;  %v1279_v57 = vmin.f32 %v1239_v50, 0.0  ;;  %vm1265_vm13 = vcmp.gt.f32.partialorder %v1247_v47, 0.0 }
 0x4cb   : > { %v1349_v53 = vpack.c.bf16 %v1337_v44, %v1336_v40  ;;  %v1335_v54 = vsel %vm1255_vm7, %v3104_v52, %v1891_v41  ;;  %2369 = vpow2.f32 %v1310_v42  ;;  %v1312_v49 = vmul.f32 1.442695, %v1281_v43 }
 0x4cc   : > { %v1348_v55 = vpack.c.bf16 %v1335_v54, %v1334_v51  ;;  %2371 = vpow2.f32 %v1306_v46  ;;  %v1308_v60 = vmul.f32 1.442695, %v1279_v57  ;;  %vm1262_vm14 = vcmp.gt.f32.partialorder %v3131_v33, 0.0 }
 0x4cd   : > { %v2362_v56 = vpop.eup %2361  ;;  %1357 = vst [vmem:[#allocation2 + $0x18] sm:$0xff] %v1349_v53  ;;  %2373 = vpow2.f32 %v1312_v49  ;;  %vm1263_vm15 = vcmp.gt.f32.partialorder %v1239_v50, 0.0 }
 0x4ce   : > { %1356 = vst [vmem:[#allocation2 + $0x10] sm:$0xff] %v1348_v55  ;;  %v2364_v58 = vpop.eup %2363  ;;  %v1896_v59 = vadd.f32 -1.0, %v2362_v56  ;;  %2375 = vpow2.f32 %v1308_v60 }
 0x4cf   : > { %v2366_v27 = vpop.eup %2365  ;;  %v1894_v45 = vadd.f32 -1.0, %v2364_v58 }
 0x4d0   : > { %v1897_v62 = vadd.f32 -1.0, %v2366_v27  ;;  %v2368_v52 = vpop.eup %2367  ;;  %v1340_v63 = vsel %vm1260_vm8, %v3109_v61, %v1896_v59 }
 0x4d1   : > { %v1895_v5 = vadd.f32 -1.0, %v2368_v52  ;;  %v1338_v8 = vsel %vm1258_vm10, %v3112_v1, %v1894_v45 }
 0x4d2   : > { %v1341_v0 = vsel %vm1261_vm9, %v3116_v9, %v1897_v62 }
 0x4d3   : > { %v1351_v3 = vpack.c.bf16 %v1341_v0, %v1340_v63  ;;  %v1339_v11 = vsel %vm1259_vm11, %v3122_v48, %v1895_v5 }
 0x4d4   : > { %v1350_v13 = vpack.c.bf16 %v1339_v11, %v1338_v8 }
 0x4d5   : > { %v2370_v6 = vpop.eup %2369  ;;  %1359 = vst [vmem:[#allocation2 + $0x28] sm:$0xff] %v1351_v3 }
 0x4d6   : > { %v2372_v12 = vpop.eup %2371  ;;  %1358 = vst [vmem:[#allocation2 + $0x20] sm:$0xff] %v1350_v13  ;;  %v1900_v2 = vadd.f32 -1.0, %v2370_v6 }
 0x4d7   : > { %v2374_v14 = vpop.eup %2373  ;;  %v1898_v61 = vadd.f32 -1.0, %v2372_v12 }
 0x4d8   : > { %v2376_v15 = vpop.eup %2375  ;;  %v1901_v9 = vadd.f32 -1.0, %v2374_v14  ;;  %v1344_v16 = vsel %vm1264_vm12, %v3127_v29, %v1900_v2 }
 0x4d9   : > { %v1899_v7 = vadd.f32 -1.0, %v2376_v15  ;;  %v1342_v17 = vsel %vm1262_vm14, %v3131_v33, %v1898_v61 }
 0x4da   : > { %v1345_v1 = vsel %vm1265_vm13, %v1247_v47, %v1901_v9 }
 0x4db   : > { %v1353_v18 = vpack.c.bf16 %v1345_v1, %v1344_v16  ;;  %v1343_v48 = vsel %vm1263_vm15, %v1239_v50, %v1899_v7 }
 0x4dc   : > { %v1352_v20 = vpack.c.bf16 %v1343_v48, %v1342_v17 }
 0x4dd   : > { %1361 = vst [vmem:[#allocation2 + $0x38] sm:$0xff] %v1353_v18 }
 0x4de   : > { %1360 = vst [vmem:[#allocation2 + $0x30] sm:$0xff] %v1352_v20 }
 0x4df PF: > { %p1902_p3 = scmp.ne.s32.totalorder %s2774_s9, 2 }
 0x4e0   : > { %v1366_v4 = vld [vmem:[#allocation2] sm:$0xff] (!%p1902_p3)  ;;  %v3161_v10 = vld [vmem:[#allocation2 + $0x8] sm:$0xff] (!%p1902_p3)  ;;  %v3163_v21 = vld [vmem:[#allocation2 + $0x10] sm:$0xff] (!%p1902_p3) }
 0x4e1   : > { %1365 = sbr.rel (%p1902_p3) target bundleno = 1554 (0x612), region = 80  ;;  %v3165_v22 = vld [vmem:[#allocation2 + $0x18] sm:$0xff] (!%p1902_p3)  ;;  %v1370_v24 = vld [vmem:[#allocation2 + $0x20] sm:$0xff] (!%p1902_p3)  ;;  %v3167_v25 = vld [vmem:[#allocation2 + $0x28] sm:$0xff] (!%p1902_p3)  ;;  %v1374_v26 = vunpack.c.l.bf16 (!%p1902_p3), %v1366_v4  ;;  %v1375_v29 = vunpack.c.h.bf16 (!%p1902_p3), %v1366_v4  ;;  %v1376_v30 = vunpack.c.l.bf16 (!%p1902_p3), %v3161_v10  ;;  %v1377_v31 = vunpack.c.h.bf16 (!%p1902_p3), %v3161_v10  ;;  %2143 = vmatprep.mubr.bf16.mxu0 (!%p1902_p3), %v1366_v4 }
 0x4e2   : > { %v1378_v19 = vunpack.c.l.bf16 (!%p1902_p3), %v3163_v21  ;;  %v1379_v34 = vunpack.c.h.bf16 (!%p1902_p3), %v3163_v21  ;;  %v1380_v28 = vunpack.c.l.bf16 (!%p1902_p3), %v3165_v22  ;;  %v1381_v35 = vunpack.c.h.bf16 (!%p1902_p3), %v3165_v22  ;;  %2151 = vmatprep.mubr.bf16.mxu1 (!%p1902_p3), %v1370_v24  ;;  %v2377_v39 = vld [vmem:[#allocation11] sm:$0xff] (!%p1902_p3)   ;;  %v2378_v46 = vld [vmem:[#allocation11 + $0x8] sm:$0xff] (!%p1902_p3)   ;;  %v2379_v47 = vld [vmem:[#allocation11 + $0x10] sm:$0xff] (!%p1902_p3)  }
 0x4e3   : > { %v1382_v36 = vunpack.c.l.bf16 (!%p1902_p3), %v1370_v24  ;;  %v1383_v23 = vunpack.c.h.bf16 (!%p1902_p3), %v1370_v24  ;;  %v1384_v37 = vunpack.c.l.bf16 (!%p1902_p3), %v3167_v25  ;;  %v1385_v38 = vunpack.c.h.bf16 (!%p1902_p3), %v3167_v25  ;;  %1390 = vst [vmem:[#allocation13] sm:$0xff] (!%p1902_p3), %v1374_v26  ;;  %1391 = vst [vmem:[#allocation13 + $0x8] sm:$0xff] (!%p1902_p3), %v1375_v29  ;;  %2127 = vmatprep.subr.bf16.mxu0 (!%p1902_p3), %v2377_v39  ;;  %2159 = vmatprep.subr.bf16.mxu1 (!%p1902_p3), %v2377_v39  ;;  %v2380_v50 = vld [vmem:[#allocation11 + $0x18] sm:$0xff] (!%p1902_p3)   ;;  %v2381_v51 = vld [vmem:[#allocation11 + $0x20] sm:$0xff] (!%p1902_p3)  }
 0x4e4   : > { %v3173_v33 = vld [vmem:[#allocation2 + $0x38] sm:$0xff] (!%p1902_p3)  ;;  %1392 = vst [vmem:[#allocation13 + $0x10] sm:$0xff] (!%p1902_p3), %v1376_v30  ;;  %1393 = vst [vmem:[#allocation13 + $0x18] sm:$0xff] (!%p1902_p3), %v1377_v31  ;;  %2128 = vmatpush3.bf16.msra.mxu0 (!%p1902_p3), %v2377_v39  ;;  %2167 = vmatpush3.bf16.msra.mxu1 (!%p1902_p3), %v2377_v39  ;;  %v2382_v53 = vld [vmem:[#allocation11 + $0x28] sm:$0xff] (!%p1902_p3)  }
 0x4e5   : > { %v3171_v32 = vld [vmem:[#allocation2 + $0x30] sm:$0xff] (!%p1902_p3)  ;;  %v1388_v42 = vunpack.c.l.bf16 (!%p1902_p3), %v3173_v33  ;;  %v1389_v44 = vunpack.c.h.bf16 (!%p1902_p3), %v3173_v33  ;;  %1394 = vst [vmem:[#allocation13 + $0x20] sm:$0xff] (!%p1902_p3), %v1378_v19  ;;  %1395 = vst [vmem:[#allocation13 + $0x28] sm:$0xff] (!%p1902_p3), %v1379_v34  ;;  %2129 = vmatprep.subr.bf16.mxu0 (!%p1902_p3), %v2378_v46  ;;  %2160 = vmatprep.subr.bf16.mxu1 (!%p1902_p3), %v2378_v46  ;;  %v2384_v55 = vld [vmem:[#allocation11 + $0x38] sm:$0xff] (!%p1902_p3)  }
 0x4e6   : > { %v1386_v40 = vunpack.c.l.bf16 (!%p1902_p3), %v3171_v32  ;;  %v1387_v41 = vunpack.c.h.bf16 (!%p1902_p3), %v3171_v32  ;;  %1396 = vst [vmem:[#allocation13 + $0x30] sm:$0xff] (!%p1902_p3), %v1380_v28  ;;  %1397 = vst [vmem:[#allocation13 + $0x38] sm:$0xff] (!%p1902_p3), %v1381_v35  ;;  %v2383_v54 = vld [vmem:[#allocation11 + $0x30] sm:$0xff] (!%p1902_p3)   ;;  %v3194_v43 = vld [vmem:[%s3276_s6] ss:$0 sm:$0xff] (!%p1902_p3) }
 0x4e7   : > { %1398 = vst [vmem:[#allocation13 + $0x40] sm:$0xff] (!%p1902_p3), %v1382_v36  ;;  %1399 = vst [vmem:[#allocation13 + $0x48] sm:$0xff] (!%p1902_p3), %v1383_v23 }
 0x4e8   : > { %1400 = vst [vmem:[#allocation13 + $0x50] sm:$0xff] %v1384_v37  ;;  %1401 = vst [vmem:[#allocation13 + $0x58] sm:$0xff] %v1385_v38  ;;  %2130 = vmatpush3.bf16.msra.mxu0 %v2378_v46  ;;  %2168 = vmatpush3.bf16.msra.mxu1 %v2378_v46 }
 0x4e9   : > { %1402 = vst [vmem:[#allocation13 + $0x60] sm:$0xff] %v1386_v40  ;;  %1403 = vst [vmem:[#allocation13 + $0x68] sm:$0xff] %v1387_v41  ;;  %2131 = vmatprep.subr.bf16.mxu0 %v2379_v47  ;;  %2161 = vmatprep.subr.bf16.mxu1 %v2379_v47 }
 0x4ea   : > { %1404 = vst [vmem:[#allocation13 + $0x70] sm:$0xff] %v1388_v42  ;;  %1405 = vst [vmem:[#allocation13 + $0x78] sm:$0xff] %v1389_v44 }
 0x4ec   : > { %2132 = vmatpush3.bf16.msra.mxu0 %v2379_v47  ;;  %2169 = vmatpush3.bf16.msra.mxu1 %v2379_v47 }
 0x4ed   : > { %2133 = vmatprep.subr.bf16.mxu0 %v2380_v50  ;;  %2162 = vmatprep.subr.bf16.mxu1 %v2380_v50 }
 0x4f0   : > { %2134 = vmatpush3.bf16.msra.mxu0 %v2380_v50  ;;  %2170 = vmatpush3.bf16.msra.mxu1 %v2380_v50 }
 0x4f1   : > { %2135 = vmatprep.subr.bf16.mxu0 %v2381_v51  ;;  %2163 = vmatprep.subr.bf16.mxu1 %v2381_v51 }
 0x4f4   : > { %2136 = vmatpush3.bf16.msra.mxu0 %v2381_v51  ;;  %2171 = vmatpush3.bf16.msra.mxu1 %v2381_v51 }
 0x4f5   : > { %2137 = vmatprep.subr.bf16.mxu0 %v2382_v53  ;;  %2164 = vmatprep.subr.bf16.mxu1 %v2382_v53 }
 0x4f8   : > { %2138 = vmatpush3.bf16.msra.mxu0 %v2382_v53  ;;  %2172 = vmatpush3.bf16.msra.mxu1 %v2382_v53 }
 0x4f9   : > { %2139 = vmatprep.subr.bf16.mxu0 %v2383_v54  ;;  %2165 = vmatprep.subr.bf16.mxu1 %v2383_v54 }
 0x4fc   : > { %2140 = vmatpush3.bf16.msra.mxu0 %v2383_v54  ;;  %2173 = vmatpush3.bf16.msra.mxu1 %v2383_v54 }
 0x4fd   : > { %2141 = vmatprep.subr.bf16.mxu0 %v2384_v55  ;;  %2166 = vmatprep.subr.bf16.mxu1 %v2384_v55 }
 0x500   : > { %2142 = vmatpush3.bf16.msra.mxu0 %v2384_v55  ;;  %2174 = vmatpush3.bf16.msra.mxu1 %v2384_v55 }
 0x503   : > { %2144 = vmatmul.mubr.bf16.vlgmr.msra.gmra.mrb[0].mxu0 %v3161_v10  ;;  %2152 = vmatmul.mubr.bf16.vlgmr.msra.gmra.mrb[0].mxu1 %v3167_v25 }
 0x504   : > { %2147 = vmatprep.mubr.bf16.mxu0 %v3163_v21  ;;  %2155 = vmatprep.mubr.bf16.mxu1 %v3171_v32 }
 0x50b   : > { %2148 = vmatmul.mubr.bf16.gmra.mrb[4].mxu0 %v3165_v22  ;;  %2156 = vmatmul.mubr.bf16.gmra.mrb[4].mxu1 %v3173_v33 }
 0x5d6   : > { %v2145_v56 = vpop.f32.mrb[0].mxu0  ;;  %v2153_v57 = vpop.f32.mrb[0].mxu1 }
 0x5d7   : > { %v1528_v49 = vadd.f32 %v2145_v56, %v3194_v43  ;;  %v1560_v58 = vadd.f32 %v2153_v57, %v3194_v43  ;;  %v1519_v59 = vpop.f32.mrb[1].mxu0  ;;  %v1551_v60 = vpop.f32.mrb[1].mxu1 }
 0x5d8   : > { %v1520_v27 = vadd.f32 %v3194_v43, %v1519_v59  ;;  %v1552_v62 = vadd.f32 %v3194_v43, %v1551_v60  ;;  %v2146_v45 = vpop.f32.mrb[2].mxu0  ;;  %v2154_v52 = vpop.f32.mrb[2].mxu1 }
 0x5d9   : > { %v1584_v63 = vsub.f32 0.0, %v1528_v49  ;;  %v1592_v0 = vsub.f32 0.0, %v1560_v58  ;;  %v1531_v3 = vadd.f32 %v2146_v45, %v3194_v43  ;;  %v1563_v5 = vadd.f32 %v2154_v52, %v3194_v43  ;;  %v1522_v6 = vpop.f32.mrb[3].mxu0  ;;  %v1554_v8 = vpop.f32.mrb[3].mxu1 }
 0x5da   : > { %v1582_v11 = vsub.f32 0.0, %v1520_v27  ;;  %v1590_v12 = vsub.f32 0.0, %v1552_v62  ;;  %v1523_v13 = vadd.f32 %v3194_v43, %v1522_v6  ;;  %v1555_v2 = vadd.f32 %v3194_v43, %v1554_v8 }
 0x5db   : > { %v1602_v14 = vmul.f32 1.442695, %v1584_v63  ;;  %v1618_v61 = vmul.f32 1.442695, %v1592_v0  ;;  %v1585_v15 = vsub.f32 0.0, %v1531_v3  ;;  %v1593_v9 = vsub.f32 0.0, %v1563_v5 }
 0x5dc   : > { %v1598_v7 = vmul.f32 1.442695, %v1582_v11  ;;  %v1614_v16 = vmul.f32 1.442695, %v1590_v12  ;;  %v1583_v1 = vsub.f32 0.0, %v1523_v13  ;;  %v1591_v17 = vsub.f32 0.0, %v1555_v2 }
 0x5dd   : > { %2385 = vpow2.f32 %v1602_v14  ;;  %v1604_v18 = vmul.f32 1.442695, %v1585_v15  ;;  %v1620_v48 = vmul.f32 1.442695, %v1593_v9 }
 0x5de   : > { %2387 = vpow2.f32 %v1618_v61  ;;  %v2149_v20 = vpop.f32.mrb[4].mxu0  ;;  %v2157_v4 = vpop.f32.mrb[4].mxu1  ;;  %v1600_v10 = vmul.f32 1.442695, %v1583_v1  ;;  %v1616_v26 = vmul.f32 1.442695, %v1591_v17 }
 0x5df   : > { %2389 = vpow2.f32 %v1598_v7  ;;  %v1544_v21 = vadd.f32 %v2149_v20, %v3194_v43  ;;  %v1576_v22 = vadd.f32 %v2157_v4, %v3194_v43  ;;  %v1535_v24 = vpop.f32.mrb[5].mxu0  ;;  %v1567_v25 = vpop.f32.mrb[5].mxu1 }
 0x5e0   : > { %2391 = vpow2.f32 %v1614_v16  ;;  %v1536_v29 = vadd.f32 %v3194_v43, %v1535_v24  ;;  %v1568_v30 = vadd.f32 %v3194_v43, %v1567_v25  ;;  %v2150_v31 = vpop.f32.mrb[6].mxu0  ;;  %v2158_v32 = vpop.f32.mrb[6].mxu1 }
 0x5e1   : > { %2393 = vpow2.f32 %v1604_v18  ;;  %v1588_v33 = vsub.f32 0.0, %v1544_v21  ;;  %v1596_v19 = vsub.f32 0.0, %v1576_v22  ;;  %v1547_v34 = vadd.f32 %v2150_v31, %v3194_v43  ;;  %v1538_v28 = vpop.f32.mrb[7].mxu0  ;;  %v1570_v35 = vpop.f32.mrb[7].mxu1 }
 0x5e2   : > { %2395 = vpow2.f32 %v1620_v48  ;;  %v1586_v36 = vsub.f32 0.0, %v1536_v29  ;;  %v1594_v23 = vsub.f32 0.0, %v1568_v30  ;;  %v1579_v57 = vadd.f32 %v2158_v32, %v3194_v43 }
 0x5e3   : > { %2397 = vpow2.f32 %v1600_v10  ;;  %v1610_v37 = vmul.f32 1.442695, %v1588_v33  ;;  %v1626_v38 = vmul.f32 1.442695, %v1596_v19  ;;  %v1589_v39 = vsub.f32 0.0, %v1547_v34 }
 0x5e4   : > { %2399 = vpow2.f32 %v1616_v26  ;;  %v1606_v40 = vmul.f32 1.442695, %v1586_v36  ;;  %v1622_v41 = vmul.f32 1.442695, %v1594_v23  ;;  %v1539_v59 = vadd.f32 %v3194_v43, %v1538_v28 }
 0x5e5   : > { %2401 = vpow2.f32 %v1610_v37  ;;  %v1612_v42 = vmul.f32 1.442695, %v1589_v39  ;;  %v1571_v62 = vadd.f32 %v3194_v43, %v1570_v35  ;;  %v1597_v3 = vsub.f32 0.0, %v1579_v57 }
 0x5e6   : > { %2403 = vpow2.f32 %v1626_v38  ;;  %v1587_v8 = vsub.f32 0.0, %v1539_v59 }
 0x5e7   : > { %v2386_v44 = vpop.eup %2385  ;;  %2405 = vpow2.f32 %v1606_v40  ;;  %v1595_v13 = vsub.f32 0.0, %v1571_v62  ;;  %v1628_v15 = vmul.f32 1.442695, %v1597_v3 }
 0x5e8   : > { %v2388_v46 = vpop.eup %2387  ;;  %v1632_v47 = vadd.f32 1.0, %v2386_v44  ;;  %2407 = vpow2.f32 %v1622_v41  ;;  %v1608_v16 = vmul.f32 1.442695, %v1587_v8 }
 0x5e9   : > { %v2390_v50 = vpop.eup %2389  ;;  %v1640_v51 = vadd.f32 1.0, %v2388_v46  ;;  %2409 = vpow2.f32 %v1612_v42  ;;  %v1624_v17 = vmul.f32 1.442695, %v1595_v13 }
 0x5ea   : > { %v2392_v53 = vpop.eup %2391  ;;  %2411 = vrcp.f32 %v1632_v47  ;;  %v1630_v54 = vadd.f32 1.0, %v2390_v50 }
 0x5eb   : > { %v2394_v55 = vpop.eup %2393  ;;  %2413 = vrcp.f32 %v1640_v51  ;;  %v1638_v56 = vadd.f32 1.0, %v2392_v53 }
 0x5ec   : > { %v2396_v49 = vpop.eup %2395  ;;  %2415 = vrcp.f32 %v1630_v54  ;;  %v1633_v58 = vadd.f32 1.0, %v2394_v55 }
 0x5ed   : > { %v2398_v60 = vpop.eup %2397  ;;  %2417 = vrcp.f32 %v1638_v56  ;;  %v1641_v27 = vadd.f32 1.0, %v2396_v49 }
 0x5ee   : > { %v2400_v45 = vpop.eup %2399  ;;  %2419 = vrcp.f32 %v1633_v58  ;;  %v1631_v52 = vadd.f32 1.0, %v2398_v60 }
 0x5ef   : > { %v2402_v63 = vpop.eup %2401  ;;  %2421 = vrcp.f32 %v1641_v27  ;;  %v1639_v0 = vadd.f32 1.0, %v2400_v45 }
 0x5f0   : > { %v2404_v5 = vpop.eup %2403  ;;  %2423 = vrcp.f32 %v1631_v52  ;;  %v1636_v6 = vadd.f32 1.0, %v2402_v63 }
 0x5f1   : > { %v2406_v11 = vpop.eup %2405  ;;  %2425 = vrcp.f32 %v1639_v0  ;;  %v1644_v12 = vadd.f32 1.0, %v2404_v5 }
 0x5f2   : > { %v2408_v2 = vpop.eup %2407  ;;  %2427 = vrcp.f32 %v1636_v6  ;;  %v1634_v14 = vadd.f32 1.0, %v2406_v11 }
 0x5f3   : > { %v2410_v61 = vpop.eup %2409  ;;  %2429 = vrcp.f32 %v1644_v12  ;;  %v1642_v43 = vadd.f32 1.0, %v2408_v2 }
 0x5f4   : > { %v2412_v9 = vpop.eup %2411  ;;  %2431 = vrcp.f32 %v1634_v14  ;;  %v1637_v7 = vadd.f32 1.0, %v2410_v61 }
 0x5f5   : > { %v2414_v1 = vpop.eup %2413  ;;  %1664 = vst [vmem:[#allocation12 + $0x10] sm:$0xff] %v2412_v9  ;;  %2433 = vrcp.f32 %v1642_v43 }
 0x5f6   : > { %v2416_v18 = vpop.eup %2415  ;;  %1672 = vst [vmem:[#allocation12 + $0x50] sm:$0xff] %v2414_v1  ;;  %2435 = vrcp.f32 %v1637_v7 }
 0x5f7   : > { %v2418_v48 = vpop.eup %2417  ;;  %1662 = vst [vmem:[#allocation12] sm:$0xff] %v2416_v18  ;;  %2437 = vpow2.f32 %v1628_v15 }
 0x5f8   : > { %v2420_v20 = vpop.eup %2419  ;;  %1670 = vst [vmem:[#allocation12 + $0x40] sm:$0xff] %v2418_v48  ;;  %2439 = vpow2.f32 %v1608_v16 }
 0x5f9   : > { %v2422_v4 = vpop.eup %2421  ;;  %1665 = vst [vmem:[#allocation12 + $0x18] sm:$0xff] %v2420_v20  ;;  %2441 = vpow2.f32 %v1624_v17 }
 0x5fa   : > { %v2424_v10 = vpop.eup %2423  ;;  %1673 = vst [vmem:[#allocation12 + $0x58] sm:$0xff] %v2422_v4 }
 0x5fb   : > { %v2426_v21 = vpop.eup %2425  ;;  %1663 = vst [vmem:[#allocation12 + $0x8] sm:$0xff] %v2424_v10 }
 0x5fc   : > { %v2428_v22 = vpop.eup %2427  ;;  %1671 = vst [vmem:[#allocation12 + $0x48] sm:$0xff] %v2426_v21 }
 0x5fd   : > { %v2430_v24 = vpop.eup %2429  ;;  %1668 = vst [vmem:[#allocation12 + $0x30] sm:$0xff] %v2428_v22 }
 0x5fe   : > { %v2432_v25 = vpop.eup %2431  ;;  %1676 = vst [vmem:[#allocation12 + $0x70] sm:$0xff] %v2430_v24 }
 0x5ff   : > { %v2434_v26 = vpop.eup %2433  ;;  %1666 = vst [vmem:[#allocation12 + $0x20] sm:$0xff] %v2432_v25 }
 0x600   : > { %v2436_v29 = vpop.eup %2435  ;;  %1674 = vst [vmem:[#allocation12 + $0x60] sm:$0xff] %v2434_v26 }
 0x601   : > { %v2438_v30 = vpop.eup %2437  ;;  %1669 = vst [vmem:[#allocation12 + $0x38] sm:$0xff] %v2436_v29 }
 0x602   : > { %v2440_v31 = vpop.eup %2439  ;;  %v1645_v32 = vadd.f32 1.0, %v2438_v30 }
 0x603   : > { %v2442_v33 = vpop.eup %2441  ;;  %v1635_v19 = vadd.f32 1.0, %v2440_v31 }
 0x604   : > { %2443 = vrcp.f32 %v1645_v32  ;;  %v1643_v34 = vadd.f32 1.0, %v2442_v33 }
 0x605   : > { %2445 = vrcp.f32 %v1635_v19 }
 0x606   : > { %2447 = vrcp.f32 %v1643_v34 }
 0x60e   : > { %v2444_v28 = vpop.eup %2443 }
 0x60f   : > { %v2446_v35 = vpop.eup %2445  ;;  %1677 = vst [vmem:[#allocation12 + $0x78] sm:$0xff] %v2444_v28 }
 0x610   : > { %v2448_v36 = vpop.eup %2447  ;;  %1667 = vst [vmem:[#allocation12 + $0x28] sm:$0xff] %v2446_v35 }
 0x611   : > { %1675 = vst [vmem:[#allocation12 + $0x68] sm:$0xff] %v2448_v36 }
 0x612 PF: > { %p2227_p9 = scmp.eq.s32.totalorder %s2774_s9, 2  ;;  %s2706_s27 = smov [#allocation12]  }
 0x613   : > { %s1684_s13 = sshll.u32 %s2706_s27, 4  ;;  %s1685_s13 = int_to_ptr.vmem [resolvable:$true] %s1684_s13 }
 0x614   : > { %s2591_s21 = scalar_lea.vmem %s1685_s13, 2048  ;;  %p2598_p1 = scmp.lt.s32.totalorder %s1685_s13, %s1685_s13 }
 0x615   : > { %p2592_p11 = scmp.ne.s32.totalorder %s1685_s13, %s2591_s21  ;;  %p2599_p4 = scmp.lt.s32.totalorder %s2591_s21, %s2591_s21 }
 0x617   : > { %p2593_p2 = pnand %p2592_p11, %p2227_p9  ;;  %p2600_p10 = por %p2599_p4, %p2598_p1 }
 0x619   : > { %p2594_p7 = pneg %p2593_p2 }
 0x61b   : > { %p2601_p8 = pnand %p2600_p10, %p2594_p7 }
 0x61d   : > { %2604 = shalt.err (!%p2601_p8)
}
 0x61e   : > { %s2605_s19 = scalar_lea.hbm %s3277_s7, 2048 }
 0x61f   : > { %p2606_p5 = scmp.ne.s32.totalorder %s3277_s7, %s2605_s19  ;;  %p2611_p13 = scmp.lt.u32.totalorder %s2605_s19, %s3277_s7 }
 0x621   : > { %p2607_p6 = pnand %p2606_p5, %p2227_p9 }
 0x623   : > { %p2608_p12 = pneg %p2607_p6 }
 0x625   : > { %p2613_p0 = pnand %p2611_p13, %p2608_p12 }
 0x627   : > { %2616 = shalt.err (!%p2613_p0)
}
 0x628   : > { %s2707_s20 = smov 128   ;;  %s2708_s17 = smov 8  }
 0x629   : > { %2194 = dma.vmem_to_hbm [thread:$0]  (%p2227_p9), %s1685_s13, 2048, %s3277_s7, [#allocation5], %s2707_s20, %s2707_s20, %s2708_s17  }
 0x62a   : > { %s2709_s23 = smov [#allocation13]  }
 0x62b   : > { %s1697_s10 = sshll.u32 %s2709_s23, 4  ;;  %s1698_s10 = int_to_ptr.vmem [resolvable:$true] %s1697_s10 }
 0x62c   : > { %s2617_s25 = scalar_lea.vmem %s1698_s10, 2048  ;;  %p2624_p7 = scmp.lt.s32.totalorder %s1698_s10, %s1698_s10 }
 0x62d   : > { %p2618_p3 = scmp.ne.s32.totalorder %s1698_s10, %s2617_s25  ;;  %p2625_p1 = scmp.lt.s32.totalorder %s2617_s25, %s2617_s25 }
 0x62f   : > { %p2619_p11 = pnand %p2618_p3, %p2227_p9  ;;  %p2626_p4 = por %p2625_p1, %p2624_p7 }
 0x631   : > { %p2620_p2 = pneg %p2619_p11 }
 0x633   : > { %p2627_p10 = pnand %p2626_p4, %p2620_p2 }
 0x635   : > { %2630 = shalt.err (!%p2627_p10)
}
 0x636   : > { %s2631_s26 = scalar_lea.hbm %s3278_s8, 2048 }
 0x637   : > { %p2632_p8 = scmp.ne.s32.totalorder %s3278_s8, %s2631_s26  ;;  %p2637_p12 = scmp.lt.u32.totalorder %s2631_s26, %s3278_s8 }
 0x639   : > { %p2633_p5 = pnand %p2632_p8, %p2227_p9 }
 0x63b   : > { %p2634_p6 = pneg %p2633_p5 }
 0x63d   : > { %p2639_p13 = pnand %p2637_p12, %p2634_p6 }
 0x63f   : > { %2642 = shalt.err (!%p2639_p13)
}
 0x640   : > { %2196 = dma.vmem_to_hbm [thread:$0]  (%p2227_p9), %s1698_s10, 2048, %s3278_s8, [#allocation14], %s2707_s20, %s2707_s20, %s2708_s17  }
 0x641   : > { %2676 = dma.done.wait (%p2227_p9), [#allocation5], 2048  }
 0x642   : > { %2678 = vsyncadd (%p2227_p9), [#allocation5], 4294965248 }
 0x643   : > { %2680 = dma.done.wait (%p2227_p9), [#allocation14], 2048  }
 0x644   : > { %2682 = vsyncadd (%p2227_p9), [#allocation14], 4294965248 }
 0x645 PF: > { %p23_p0 = scmp.ge.s32.totalorder %s2907_s24, 5   ;;  %s3296_s27 = smov %s2689_s28 }
 0x646   : > { %s3297_s28 = smov %s2693_s29  ;;  %s3298_s29 = smov %s2918_s22 }
 0x647   : > { %s3299_s30 = smov %s2907_s24  ;;  %25 = sbr.rel (!%p23_p0) target bundleno = 7 (0x7), region = 125 }
 0x64e   :  { %1717 = vsyncpa [#allocation4], 1 }
 0x64f   :  { %1719 = vsyncpa [#allocation4 + $0x1], 1 }
 0x650   :  { %1720 = vsyncpa [#allocation7], 1 }
 0x651   :  { %1721 = vsyncpa [#allocation10], 1 }
 0x652   :  { %1723 = vsyncpa [#allocation10 + $0x1], 1 }
 0x653   :  { %1724 = vsyncpa [#allocation5], 1 }
 0x654   :  { %1726 = vsyncpa [#allocation5 + $0x1], 1 }
 0x655   :  { %1727 = vsyncpa [#allocation14], 1 }

// kernel: tpu_custom_call.1
= control target key start
LH: loop header
LB: loop body
LE: loop exit
PB: predicated region body
PF: predicated region fallthrough
CT: control target
= control target key end

     0   :  { %14 = vsyncpa [#allocation4], 0  ;;  %s3270_s0 = inlined_call_operand.hbm [shape: bf16[128,128], index: 0, kind: input, shape index: {}]   ;;  %s3271_s1 = inlined_call_operand.hbm [shape: bf16[128,128], index: 1, kind: input, shape index: {}]   ;;  %s3272_s2 = inlined_call_operand.hbm [shape: bf16[128,128], index: 2, kind: input, shape index: {}]   ;;  %s3273_s3 = inlined_call_operand.hbm [shape: bf16[3,128,128], index: 3, kind: input, shape index: {}]   ;;  %s3274_s4 = inlined_call_operand.vmem [shape: f32[3,1,128], index: 4, kind: input, shape index: {}]   ;;  %s3275_s5 = inlined_call_operand.hbm [shape: bf16[128,128], index: 5, kind: input, shape index: {}]   ;;  %s3276_s6 = inlined_call_operand.vmem [shape: f32[1,128], index: 6, kind: input, shape index: {}]   ;;  %s3277_s7 = inlined_call_operand.hbm [shape: f32[128,128], index: 7, kind: output, shape index: {0}]   ;;  %s3278_s8 = inlined_call_operand.hbm [shape: f32[128,128], index: 8, kind: output, shape index: {1}]  }
   0x1   :  { %15 = vsyncpa [#allocation7], 0 }
   0x2   :  { %16 = vsyncpa [#allocation10], 0 }
   0x3   :  { %18 = vsyncpa [#allocation10 + $0x1], 0 }
   0x4   :  { %19 = vsyncpa [#allocation5], 0 }
   0x5   :  { %20 = vsyncpa [#allocation14], 0  ;;  %s2755_s27 = smov 0   ;;  %s2757_s28 = smov 0  }
   0x6   :  { %s2759_s29 = smov 0   ;;  %s2761_s30 = smov 0  }
   0x7 LB: > { %s2774_s9 = sadd.s32 4294967295, %s2697_s30   ;;  %p109_p0 = scmp.ne.s32.totalorder %s2689_s28, %s2685_s27  ;;  %s2697_s30 = sphi %s2761_s30, %s3299_s30   ;;  %s2693_s29 = sphi %s2759_s29, %s3298_s29   ;;  %s2689_s28 = sphi %s2757_s28, %s3297_s28   ;;  %s2685_s27 = sphi %s2755_s27, %s3296_s27  }
   0x8   : > { %p3279_p1 = scmp.eq.s32.totalorder %s2774_s9, 0  ;;  %p1811_p2 = scmp.ge.s32.totalorder %s2697_s30, 1 }
   0x9   : > { %p230_p3 = scmp.lt.s32.totalorder %s2697_s30, 4  ;;  %s2699_s12 = smov [#allocation6]  }
   0xa   : > { %p2783_p5 = por %p3279_p1, %p109_p0  ;;  %s255_s13 = sshll.u32 %s2699_s12, 4  ;;  %s2793_s13 = int_to_ptr.vmem [resolvable:$true] %s255_s13 }
   0xb   : > { %p2787_p6 = pnand %p1811_p2, %p230_p3  ;;  %s2700_s15 = smov [#allocation11]  }
   0xc   : > { %s3282_s10 = scalar_select %p2783_p5, 1, 0 }
   0xd   : > { %s3283_s11 = scalar_select %p2787_p6, 1, 0 }
   0xe   : > { %p2201_p7 = pneg %p2787_p6  ;;  %s281_s16 = sshll.u32 %s2700_s15, 4  ;;  %s2801_s16 = int_to_ptr.vmem [resolvable:$true] %s281_s16 }
   0xf   : > { %s2701_s17 = smov [#allocation3]   ;;  %s2449_s21 = scalar_lea.hbm %s3271_s1, 1024 }
  0x10   : > { %p2797_p8 = pnand %p2201_p7, %p3279_p1  ;;  %s2803_s18 = sshll.u32 %s2701_s17, 4  ;;  %s243_s18 = int_to_ptr.vmem [resolvable:$true] %s2803_s18 }
  0x11   : > { %p2450_p9 = scmp.ne.s32.totalorder %s3271_s1, %s2449_s21  ;;  %p2456_p13 = scmp.lt.u32.totalorder %s2449_s21, %s3271_s1 }
  0x12   : > { %p2813_p10 = pneg %p2797_p8 }
  0x14   : > { %p2452_p11 = pnand %p2813_p10, %p2450_p9 }
  0x16   : > { %p2453_p12 = pneg %p2452_p11 }
  0x18   : > { %p2458_p0 = pnand %p2456_p13, %p2453_p12 }
  0x1a   : > { %2461 = shalt.err (!%p2458_p0)
}
  0x1b   : > { %s2462_s27 = scalar_lea.vmem %s2793_s13, 1024  ;;  %p2470_p4 = scmp.lt.s32.totalorder %s2793_s13, %s2793_s13 }
  0x1c   : > { %p2463_p2 = scmp.ne.s32.totalorder %s2793_s13, %s2462_s27  ;;  %p2471_p1 = scmp.lt.s32.totalorder %s2462_s27, %s2462_s27 }
  0x1e   : > { %p2465_p3 = pnand %p2463_p2, %p2813_p10  ;;  %p2472_p9 = por %p2471_p1, %p2470_p4 }
  0x20   : > { %p2466_p7 = pneg %p2465_p3 }
  0x22   : > { %p2473_p11 = pnand %p2472_p9, %p2466_p7 }
  0x24   : > { %2476 = shalt.err (!%p2473_p11)
}
  0x25   : > { %s2702_s12 = smov 64   ;;  %s2703_s15 = smov 4  }
  0x26   : > { %2207 = dma.hbm_to_vmem [thread:$0]  (!%p2797_p8), %s3271_s1, 1024, %s2793_s13, [#allocation7], %s2702_s12, %s2702_s12, %s2703_s15  }
  0x27   : > { %s2477_s22 = scalar_lea.hbm %s3275_s5, 1024 }
  0x28   : > { %p2478_p1 = scmp.ne.s32.totalorder %s3275_s5, %s2477_s22  ;;  %p2484_p13 = scmp.lt.u32.totalorder %s2477_s22, %s3275_s5 }
  0x2a   : > { %p2480_p4 = pnand %p2478_p1, %p2813_p10 }
  0x2c   : > { %p2481_p12 = pneg %p2480_p4 }
  0x2e   : > { %p2486_p0 = pnand %p2484_p13, %p2481_p12 }
  0x30   : > { %2489 = shalt.err (!%p2486_p0)
}
  0x31   : > { %s2490_s13 = scalar_lea.vmem %s2801_s16, 1024  ;;  %p2498_p9 = scmp.lt.s32.totalorder %s2801_s16, %s2801_s16 }
  0x32   : > { %p2491_p2 = scmp.ne.s32.totalorder %s2801_s16, %s2490_s13  ;;  %p2499_p11 = scmp.lt.s32.totalorder %s2490_s13, %s2490_s13 }
  0x34   : > { %p2493_p3 = pnand %p2491_p2, %p2813_p10  ;;  %p2500_p1 = por %p2499_p11, %p2498_p9 }
  0x36   : > { %p2494_p7 = pneg %p2493_p3 }
  0x38   : > { %p2501_p4 = pnand %p2500_p1, %p2494_p7 }
  0x3a   : > { %2504 = shalt.err (!%p2501_p4)
}
  0x3b   : > { %2213 = dma.hbm_to_vmem [thread:$0]  (!%p2797_p8), %s3275_s5, 1024, %s2801_s16, [#allocation10], %s2702_s12, %s2702_s12, %s2703_s15  }
  0x3c   : > { %s2505_s22 = scalar_lea.hbm %s3270_s0, 1024 }
  0x3d   : > { %p2506_p12 = scmp.ne.s32.totalorder %s3270_s0, %s2505_s22  ;;  %p2512_p2 = scmp.lt.u32.totalorder %s2505_s22, %s3270_s0 }
  0x3f   : > { %p2508_p13 = pnand %p2506_p12, %p2813_p10 }
  0x41   : > { %p2509_p0 = pneg %p2508_p13 }
  0x43   : > { %p2514_p3 = pnand %p2512_p2, %p2509_p0 }
  0x45   : > { %2517 = shalt.err (!%p2514_p3)
}
  0x46   : > { %s2518_s13 = scalar_lea.vmem %s243_s18, 1024  ;;  %p2526_p1 = scmp.lt.s32.totalorder %s243_s18, %s243_s18 }
  0x47   : > { %p2519_p7 = scmp.ne.s32.totalorder %s243_s18, %s2518_s13  ;;  %p2527_p4 = scmp.lt.s32.totalorder %s2518_s13, %s2518_s13 }
  0x49   : > { %p2521_p9 = pnand %p2519_p7, %p2813_p10  ;;  %p2528_p5 = por %p2527_p4, %p2526_p1 }
  0x4b   : > { %p2522_p11 = pneg %p2521_p9 }
  0x4d   : > { %p2529_p6 = pnand %p2528_p5, %p2522_p11 }
  0x4f   : > { %2532 = shalt.err (!%p2529_p6)
}
  0x50   : > { %2204 = dma.hbm_to_vmem [thread:$0]  (!%p2797_p8), %s3270_s0, 1024, %s243_s18, [#allocation4], %s2702_s12, %s2702_s12, %s2703_s15  }
  0x51   : > { %s2704_s19 = smov [#allocation8]   ;;  %s2533_s23 = scalar_lea.hbm %s3272_s2, 1024 }
  0x52   : > { %s268_s20 = sshll.u32 %s2704_s19, 4  ;;  %p2534_p5 = scmp.ne.s32.totalorder %s3272_s2, %s2533_s23  ;;  %s269_s20 = int_to_ptr.vmem [resolvable:$true] %s268_s20 }
  0x53   : > { %p2540_p13 = scmp.lt.u32.totalorder %s2533_s23, %s3272_s2 }
  0x54   : > { %p2536_p6 = pnand %p2534_p5, %p2813_p10 }
  0x56   : > { %p2537_p12 = pneg %p2536_p6 }
  0x58   : > { %p2542_p0 = pnand %p2540_p13, %p2537_p12 }
  0x5a   : > { %2545 = shalt.err (!%p2542_p0)
}
  0x5b   : > { %s2546_s18 = scalar_lea.vmem %s269_s20, 1024  ;;  %p2554_p9 = scmp.lt.s32.totalorder %s269_s20, %s269_s20 }
  0x5c   : > { %p2547_p2 = scmp.ne.s32.totalorder %s269_s20, %s2546_s18  ;;  %p2555_p11 = scmp.lt.s32.totalorder %s2546_s18, %s2546_s18 }
  0x5e   : > { %p2549_p3 = pnand %p2547_p2, %p2813_p10  ;;  %p2556_p1 = por %p2555_p11, %p2554_p9 }
  0x60   : > { %p2550_p7 = pneg %p2549_p3 }
  0x62   : > { %p2557_p4 = pnand %p2556_p1, %p2550_p7 }
  0x64   : > { %2560 = shalt.err (!%p2557_p4)
}
  0x65   : > { %2210 = dma.hbm_to_vmem [thread:$0]  (!%p2797_p8), %s3272_s2, 1024, %s269_s20, [#allocation7], %s2702_s12, %s2702_s12, %s2703_s15  }
  0x66   : > { %s2907_s24 = sadd.s32 1, %s2697_s30   ;;  %s96_s14 = sadd.s32 1, %s2693_s29 }
  0x67   : > { %s93_s19 = ssub.s32 %s2697_s30, %s2907_s24  ;;  %p103_p10 = scmp.ne.s32.totalorder %s2693_s29, %s2689_s28 }
  0x68   : > { %p94_p5 = scmp.eq.s32.totalorder %s93_s19, 0  ;;  %p104_p6 = scmp.eq.s32.totalorder %s2697_s30, 0 }
  0x69   : > { %p2222_p12 = scmp.lt.s32.totalorder %s2697_s30, 3  ;;  %s298_s21 = sand.u32 1, %s2697_s30  }
  0x6a   : > { %s2918_s22 = scalar_select %p94_p5, %s2693_s29, %s96_s14  }
  0x6b   : > { %p105_p13 = por %p104_p6, %p103_p10  ;;  %s300_s23 = sand.u32 1, %s2693_s29  }
  0x6c   : > { %s1918_s25 = sshll.u32 %s2697_s30, 10  ;;  %s1817_s26 = sshll.u32 %s300_s23, 6 }
  0x6d   : > { %s2925_s20 = scalar_lea.hbm %s3273_s3, %s1918_s25  ;;  %p2927_p8 = pnand %p2222_p12, %p105_p13 }
  0x6e   : > { %s302_s16 = scalar_lea.vmem [#allocation9], %s1817_s26  ;;  %s2933_s30 = scalar_lea.sflag [#allocation10], %s298_s21 }
  0x6f   : > { %s309_s17 = sshll.u32 %s302_s16, 4  ;;  %s2561_s14 = scalar_lea.hbm %s2925_s20, 1024  ;;  %s2931_s17 = int_to_ptr.vmem [resolvable:$true] %s309_s17 }
  0x70   : > { %p2562_p0 = scmp.ne.s32.totalorder %s2925_s20, %s2561_s14  ;;  %p2563_p2 = pneg %p2927_p8 }
  0x71   : > { %s2566_s25 = scalar_lea.hbm %s3273_s3, 3072  ;;  %p2567_p9 = scmp.lt.u32.totalorder %s2925_s20, %s3273_s3 }
  0x72   : > { %p2564_p3 = pnand %p2563_p2, %p2562_p0  ;;  %p2568_p11 = scmp.lt.u32.totalorder %s2566_s25, %s2561_s14 }
  0x73   : > { %p2570_p4 = scmp.lt.u32.totalorder %s2561_s14, %s2925_s20 }
  0x74   : > { %p2565_p7 = pneg %p2564_p3  ;;  %p2569_p1 = por %p2568_p11, %p2567_p9 }
  0x76   : > { %p2571_p10 = por %p2570_p4, %p2569_p1 }
  0x78   : > { %p2572_p5 = pnand %p2571_p10, %p2565_p7 }
  0x7a   : > { %2575 = shalt.err (!%p2572_p5)
}
  0x7b   : > { %s2576_s21 = scalar_lea.vmem %s2931_s17, 1024  ;;  %s2705_s26 = smov [#allocation9]  }
  0x7c   : > { %p2577_p6 = scmp.ne.s32.totalorder %s2931_s17, %s2576_s21  ;;  %s2581_s16 = sshll.u32 %s2705_s26, 4  ;;  %s2582_s16 = int_to_ptr.vmem [resolvable:$false] %s2581_s16 }
  0x7d   : > { %s2583_s19 = scalar_lea.vmem %s2582_s16, 2048  ;;  %p2584_p0 = scmp.lt.s32.totalorder %s2931_s17, %s2582_s16 }
  0x7e   : > { %p2579_p12 = pnand %p2577_p6, %p2563_p2  ;;  %p2585_p3 = scmp.lt.s32.totalorder %s2583_s19, %s2576_s21 }
  0x80   : > { %p2580_p13 = pneg %p2579_p12  ;;  %p2586_p9 = por %p2585_p3, %p2584_p0 }
  0x82   : > { %p2587_p11 = pnand %p2586_p9, %p2580_p13 }
  0x84   : > { %2590 = shalt.err (!%p2587_p11)
}
  0x85   : > { %2217 = dma.hbm_to_vmem [thread:$0]  (!%p2927_p8), %s2925_s20, 1024, %s2931_s17, %s2933_s30, %s2702_s12, %s2702_s12, %s2703_s15  }
  0x86   : > { %p3287_p2 = scmp.ne.s32.totalorder %s3283_s11, 0 }
  0x87   : > { %p3288_p7 = scmp.eq.s32.totalorder (!%p3287_p2), %s2774_s9, 0 }
  0x88   : > { %327 = sbr.rel (%p3287_p2) target bundleno = 1605 (0x645), region = 48 }
  0x8f   : > { %2660 = dma.done.wait (%p3288_p7), [#allocation4], 1024   ;;  %p3289_p1 = pmov %p3288_p7 }
  0x91   : > { %2662 = vsyncadd (%p3289_p1), [#allocation4], 4294966272  ;;  %p3290_p4 = pmov %p3289_p1 }
  0x92   : > { %p3291_p10 = pmov %p3289_p1 }
  0x93   : > { %2664 = dma.done.wait (%p3290_p4), [#allocation7], 2048  }
  0x94   : > { %2666 = vsyncadd (%p3291_p10), [#allocation7], 4294965248  ;;  %s341_s18 = sand.u32 1, %s2774_s9   ;;  %s343_s12 = sand.u32 1, %s2689_s28  }
  0x95   : > { %s1824_s15 = sshll.u32 %s343_s12, 6  ;;  %s342_s11 = scalar_lea.sflag [#allocation10], %s341_s18 }
  0x96   : > { %s2976_s20 = scalar_lea.vmem [#allocation9], %s1824_s15  ;;  %p3292_p8 = scmp.ne.s32.totalorder %s3282_s10, 0 }
  0x98   : > { %2668 = dma.done.wait (%p3292_p8), %s342_s11, 1024  }
  0x99   : > { %2670 = vsyncadd (%p3292_p8), %s342_s11, 4294966272  ;;  %p3293_p5 = pmov %p3289_p1 }
  0x9a   : > { %p3294_p6 = pmov %p3289_p1 }
  0x9b   : > { %2672 = dma.done.wait (%p3293_p5), [#allocation10], 1024  }
  0x9c   : > { %2674 = vsyncadd (%p3294_p6), [#allocation10], 4294966272  ;;  %p380_p12 = scmp.lt.s32.totalorder %s2774_s9, 2  ;;  %p3295_p13 = scmp.ne.s32.totalorder %s2774_s9, 0 }
  0x9d   : > { %v2273_v0 = vld [vmem:[#allocation8] sm:$0xff] (!%p3295_p13)   ;;  %v2274_v1 = vld [vmem:[#allocation8 + $0x8] sm:$0xff] (!%p3295_p13)   ;;  %v2275_v2 = vld [vmem:[#allocation8 + $0x10] sm:$0xff] (!%p3295_p13)  }
  0x9e   : > { %s381_s17 = scalar_select %p380_p12, %s2774_s9, 2 }
  0x9f   : > { %387 = sbr.rel (%p3295_p13) target bundleno = 702 (0x2be), region = 72  ;;  %1999 = vmatprep.subr.bf16.mxu0 (!%p3295_p13), %v2273_v0  ;;  %v2276_v3 = vld [vmem:[#allocation8 + $0x18] sm:$0xff] (!%p3295_p13)   ;;  %v2281_v4 = vld [vmem:[#allocation6] sm:$0xff] (!%p3295_p13)   ;;  %v2278_v6 = vld [vmem:[#allocation8 + $0x28] sm:$0xff] (!%p3295_p13)  }
  0xa0   : > { %s2991_s23 = scalar_lea.vmem %s3274_s4, %s381_s17  ;;  %2000 = vmatpush3.bf16.msra.mxu0 (!%p3295_p13), %v2273_v0  ;;  %2015 = vmatprep.mubr.bf16.mxu0 (!%p3295_p13), %v2281_v4  ;;  %v2277_v5 = vld [vmem:[#allocation8 + $0x20] sm:$0xff] (!%p3295_p13)   ;;  %v2279_v7 = vld [vmem:[#allocation8 + $0x30] sm:$0xff] (!%p3295_p13)   ;;  %v2280_v8 = vld [vmem:[#allocation8 + $0x38] sm:$0xff] (!%p3295_p13)  }
  0xa1   : > { %2001 = vmatprep.subr.bf16.mxu0 (!%p3295_p13), %v2274_v1  ;;  %v2282_v9 = vld [vmem:[#allocation6 + $0x8] sm:$0xff] (!%p3295_p13)   ;;  %v2283_v10 = vld [vmem:[#allocation6 + $0x10] sm:$0xff] (!%p3295_p13)   ;;  %v2284_v11 = vld [vmem:[#allocation6 + $0x18] sm:$0xff] (!%p3295_p13)  }
  0xa2   : > { %v2285_v12 = vld [vmem:[#allocation6 + $0x20] sm:$0xff] (!%p3295_p13)   ;;  %v2286_v13 = vld [vmem:[#allocation6 + $0x28] sm:$0xff] (!%p3295_p13)   ;;  %v2287_v14 = vld [vmem:[#allocation6 + $0x30] sm:$0xff] (!%p3295_p13)  }
  0xa3   : > { %v2288_v15 = vld [vmem:[#allocation6 + $0x38] sm:$0xff] (!%p3295_p13)   ;;  %v2289_v16 = vld [vmem:[#allocation3] sm:$0xff] (!%p3295_p13)   ;;  %v2290_v41 = vld [vmem:[#allocation3 + $0x8] sm:$0xff] (!%p3295_p13)  }
  0xa4   : > { %2002 = vmatpush3.bf16.msra.mxu0 (!%p3295_p13), %v2274_v1  ;;  %2047 = vmatprep.mubr.bf16.mxu1 (!%p3295_p13), %v2289_v16  ;;  %v2291_v42 = vld [vmem:[#allocation3 + $0x10] sm:$0xff] (!%p3295_p13)   ;;  %v2292_v43 = vld [vmem:[#allocation3 + $0x18] sm:$0xff] (!%p3295_p13)   ;;  %v2293_v44 = vld [vmem:[#allocation3 + $0x20] sm:$0xff] (!%p3295_p13)  }
  0xa5   : > { %2003 = vmatprep.subr.bf16.mxu0 (!%p3295_p13), %v2275_v2  ;;  %v2294_v45 = vld [vmem:[#allocation3 + $0x28] sm:$0xff] (!%p3295_p13)   ;;  %v2295_v46 = vld [vmem:[#allocation3 + $0x30] sm:$0xff] (!%p3295_p13)   ;;  %v2296_v47 = vld [vmem:[#allocation3 + $0x38] sm:$0xff] (!%p3295_p13)  }
  0xa6   : > { %v2996_v48 = vld [vmem:[%s2991_s23] ss:$0 sm:$0xff] }
  0xa8   : > { %2004 = vmatpush3.bf16.msra.mxu0 %v2275_v2 }
  0xa9   : > { %2005 = vmatprep.subr.bf16.mxu0 %v2276_v3 }
  0xac   : > { %2006 = vmatpush3.bf16.msra.mxu0 %v2276_v3 }
  0xad   : > { %2007 = vmatprep.subr.bf16.mxu0 %v2277_v5 }
  0xb0   : > { %2008 = vmatpush3.bf16.msra.mxu0 %v2277_v5 }
  0xb1   : > { %2009 = vmatprep.subr.bf16.mxu0 %v2278_v6 }
  0xb4   : > { %2010 = vmatpush3.bf16.msra.mxu0 %v2278_v6 }
  0xb5   : > { %2011 = vmatprep.subr.bf16.mxu0 %v2279_v7 }
  0xb8   : > { %2012 = vmatpush3.bf16.msra.mxu0 %v2279_v7 }
  0xb9   : > { %2013 = vmatprep.subr.bf16.mxu0 %v2280_v8 }
  0xbc   : > { %2014 = vmatpush3.bf16.msra.mxu0 %v2280_v8 }
  0xbf   : > { %2016 = vmatmul.mubr.bf16.vlgmr.msra.gmra.mrb[0].mxu0 %v2282_v9 }
  0xc0   : > { %2019 = vmatprep.mubr.bf16.mxu0 %v2283_v10 }
  0xc7   : > { %2020 = vmatmul.mubr.bf16.gmra.mrb[4].mxu0 %v2284_v11 }
  0xc8   : > { %2023 = vmatprep.mubr.bf16.mxu0 %v2285_v12 }
  0xcf   : > { %2024 = vmatmul.mubr.bf16.gmra.mrb[8].mxu0 %v2286_v13 }
  0xd0   : > { %2027 = vmatprep.mubr.bf16.mxu0 %v2287_v14 }
  0xd7   : > { %2028 = vmatmul.mubr.bf16.gmra.mrb[12].mxu0 %v2288_v15 }
 0x192   : > { %v2017_v17 = vpop.f32.mrb[0].mxu0 }
 0x193   : > { %v550_v18 = vpop.f32.mrb[1].mxu0 }
 0x194   : > { %v2018_v19 = vpop.f32.mrb[2].mxu0 }
 0x195   : > { %v630_v20 = vpack.c.bf16 %v2018_v19, %v2017_v17  ;;  %v553_v21 = vpop.f32.mrb[3].mxu0 }
 0x196   : > { %v629_v22 = vpack.c.bf16 %v553_v21, %v550_v18 }
 0x198   : > { %2031 = vmatprep.subr.bf16.mxu1 %v629_v22 }
 0x199   : > { %2032 = vmatpush3.bf16.msra.mxu1 %v629_v22 }
 0x19a   : > { %v2021_v23 = vpop.f32.mrb[4].mxu0  ;;  %2033 = vmatprep.subr.bf16.mxu1 %v630_v20 }
 0x19b   : > { %v566_v24 = vpop.f32.mrb[5].mxu0 }
 0x19c   : > { %v2022_v25 = vpop.f32.mrb[6].mxu0 }
 0x19d   : > { %v632_v26 = vpack.c.bf16 %v2022_v25, %v2021_v23  ;;  %v569_v27 = vpop.f32.mrb[7].mxu0  ;;  %2034 = vmatpush3.bf16.msra.mxu1 %v630_v20 }
 0x19e   : > { %v631_v28 = vpack.c.bf16 %v569_v27, %v566_v24 }
 0x1a0   : > { %2035 = vmatprep.subr.bf16.mxu1 %v631_v28 }
 0x1a1   : > { %2036 = vmatpush3.bf16.msra.mxu1 %v631_v28 }
 0x1a2   : > { %v2025_v29 = vpop.f32.mrb[8].mxu0  ;;  %2037 = vmatprep.subr.bf16.mxu1 %v632_v26 }
 0x1a3   : > { %v582_v30 = vpop.f32.mrb[9].mxu0 }
 0x1a4   : > { %v2026_v31 = vpop.f32.mrb[10].mxu0 }
 0x1a5   : > { %v634_v32 = vpack.c.bf16 %v2026_v31, %v2025_v29  ;;  %v585_v33 = vpop.f32.mrb[11].mxu0  ;;  %2038 = vmatpush3.bf16.msra.mxu1 %v632_v26 }
 0x1a6   : > { %v633_v34 = vpack.c.bf16 %v585_v33, %v582_v30 }
 0x1a8   : > { %2039 = vmatprep.subr.bf16.mxu1 %v633_v34 }
 0x1a9   : > { %2040 = vmatpush3.bf16.msra.mxu1 %v633_v34 }
 0x1aa   : > { %v2029_v35 = vpop.f32.mrb[12].mxu0  ;;  %2041 = vmatprep.subr.bf16.mxu1 %v634_v32 }
 0x1ab   : > { %v598_v36 = vpop.f32.mrb[13].mxu0 }
 0x1ac   : > { %v2030_v37 = vpop.f32.mrb[14].mxu0 }
 0x1ad   : > { %v636_v38 = vpack.c.bf16 %v2030_v37, %v2029_v35  ;;  %v601_v39 = vpop.f32.mrb[15].mxu0  ;;  %2042 = vmatpush3.bf16.msra.mxu1 %v634_v32 }
 0x1ae   : > { %v635_v40 = vpack.c.bf16 %v601_v39, %v598_v36 }
 0x1b0   : > { %2043 = vmatprep.subr.bf16.mxu1 %v635_v40 }
 0x1b1   : > { %2044 = vmatpush3.bf16.msra.mxu1 %v635_v40 }
 0x1b2   : > { %2045 = vmatprep.subr.bf16.mxu1 %v636_v38 }
 0x1b5   : > { %2046 = vmatpush3.bf16.msra.mxu1 %v636_v38 }
 0x1b8   : > { %2048 = vmatmul.mubr.bf16.vlgmr.msra.gmra.mrb[0].mxu1 %v2290_v41 }
 0x1b9   : > { %2051 = vmatprep.mubr.bf16.mxu1 %v2291_v42 }
 0x1c0   : > { %2052 = vmatmul.mubr.bf16.gmra.mrb[4].mxu1 %v2292_v43 }
 0x1c1   : > { %2055 = vmatprep.mubr.bf16.mxu1 %v2293_v44 }
 0x1c8   : > { %2056 = vmatmul.mubr.bf16.gmra.mrb[8].mxu1 %v2294_v45 }
 0x1c9   : > { %2059 = vmatprep.mubr.bf16.mxu1 %v2295_v46 }
 0x1d0   : > { %2060 = vmatmul.mubr.bf16.gmra.mrb[12].mxu1 %v2296_v47 }
 0x28b   : > { %v2049_v49 = vpop.f32.mrb[0].mxu1 }
 0x28c   : > { %v735_v50 = vadd.f32 %v2049_v49, %v2996_v48  ;;  %v726_v51 = vpop.f32.mrb[1].mxu1 }
 0x28d   : > { %v3000_v52 = vadd.f32 %v2996_v48, %v726_v51  ;;  %v2050_v53 = vpop.f32.mrb[2].mxu1 }
 0x28e   : > { %v807_v54 = vmin.f32 %v735_v50, 0.0  ;;  %v738_v55 = vadd.f32 %v2050_v53, %v2996_v48  ;;  %v729_v56 = vpop.f32.mrb[3].mxu1  ;;  %vm791_vm0 = vcmp.gt.f32.partialorder %v735_v50, 0.0 }
 0x28f   : > { %v805_v57 = vmin.f32 %v3000_v52, 0.0  ;;  %v730_v58 = vadd.f32 %v2996_v48, %v729_v56  ;;  %vm789_vm1 = vcmp.gt.f32.partialorder %v3000_v52, 0.0 }
 0x290   : > { %v825_v59 = vmul.f32 1.442695, %v807_v54  ;;  %v808_v60 = vmin.f32 %v738_v55, 0.0  ;;  %vm792_vm2 = vcmp.gt.f32.partialorder %v738_v55, 0.0 }
 0x291   : > { %v821_v61 = vmul.f32 1.442695, %v805_v57  ;;  %v806_v62 = vmin.f32 %v730_v58, 0.0  ;;  %vm790_vm3 = vcmp.gt.f32.partialorder %v730_v58, 0.0 }
 0x292   : > { %2297 = vpow2.f32 %v825_v59  ;;  %v827_v63 = vmul.f32 1.442695, %v808_v60 }
 0x293   : > { %2299 = vpow2.f32 %v821_v61  ;;  %v823_v0 = vmul.f32 1.442695, %v806_v62  ;;  %v2053_v1 = vpop.f32.mrb[4].mxu1 }
 0x294   : > { %2301 = vpow2.f32 %v827_v63  ;;  %v3006_v2 = vadd.f32 %v2053_v1, %v2996_v48  ;;  %v742_v3 = vpop.f32.mrb[5].mxu1 }
 0x295   : > { %2303 = vpow2.f32 %v823_v0  ;;  %v3009_v4 = vadd.f32 %v2996_v48, %v742_v3  ;;  %v2054_v5 = vpop.f32.mrb[6].mxu1 }
 0x296   : > { %v811_v6 = vmin.f32 %v3006_v2, 0.0  ;;  %v3013_v7 = vadd.f32 %v2054_v5, %v2996_v48  ;;  %v745_v8 = vpop.f32.mrb[7].mxu1  ;;  %vm795_vm4 = vcmp.gt.f32.partialorder %v3006_v2, 0.0 }
 0x297   : > { %v809_v9 = vmin.f32 %v3009_v4, 0.0  ;;  %v3017_v10 = vadd.f32 %v2996_v48, %v745_v8  ;;  %vm793_vm5 = vcmp.gt.f32.partialorder %v3009_v4, 0.0 }
 0x298   : > { %v833_v11 = vmul.f32 1.442695, %v811_v6  ;;  %v812_v12 = vmin.f32 %v3013_v7, 0.0  ;;  %vm796_vm6 = vcmp.gt.f32.partialorder %v3013_v7, 0.0 }
 0x299   : > { %v829_v13 = vmul.f32 1.442695, %v809_v9  ;;  %v810_v14 = vmin.f32 %v3017_v10, 0.0  ;;  %vm794_vm7 = vcmp.gt.f32.partialorder %v3017_v10, 0.0 }
 0x29a   : > { %2305 = vpow2.f32 %v833_v11  ;;  %v835_v15 = vmul.f32 1.442695, %v812_v12 }
 0x29b   : > { %2307 = vpow2.f32 %v829_v13  ;;  %v831_v16 = vmul.f32 1.442695, %v810_v14  ;;  %v2057_v17 = vpop.f32.mrb[8].mxu1 }
 0x29c   : > { %v2298_v18 = vpop.eup %2297  ;;  %2309 = vpow2.f32 %v835_v15  ;;  %v3022_v19 = vadd.f32 %v2057_v17, %v2996_v48  ;;  %v758_v20 = vpop.f32.mrb[9].mxu1 }
 0x29d   : > { %v2300_v21 = vpop.eup %2299  ;;  %v1854_v22 = vadd.f32 -1.0, %v2298_v18  ;;  %2311 = vpow2.f32 %v831_v16  ;;  %v3025_v23 = vadd.f32 %v2996_v48, %v758_v20  ;;  %v2058_v24 = vpop.f32.mrb[10].mxu1 }
 0x29e   : > { %v2302_v25 = vpop.eup %2301  ;;  %v1852_v26 = vadd.f32 -1.0, %v2300_v21  ;;  %v815_v27 = vmin.f32 %v3022_v19, 0.0  ;;  %v3029_v28 = vadd.f32 %v2058_v24, %v2996_v48  ;;  %v761_v29 = vpop.f32.mrb[11].mxu1  ;;  %vm799_vm8 = vcmp.gt.f32.partialorder %v3022_v19, 0.0 }
 0x29f   : > { %v2304_v30 = vpop.eup %2303  ;;  %v1855_v31 = vadd.f32 -1.0, %v2302_v25  ;;  %v813_v32 = vmin.f32 %v3025_v23, 0.0  ;;  %v871_v33 = vsel %vm791_vm0, %v735_v50, %v1854_v22  ;;  %v3035_v39 = vadd.f32 %v2996_v48, %v761_v29 }
 0x2a0   : > { %v1853_v34 = vadd.f32 -1.0, %v2304_v30  ;;  %v841_v35 = vmul.f32 1.442695, %v815_v27  ;;  %v816_v38 = vmin.f32 %v3029_v28, 0.0  ;;  %v869_v40 = vsel %vm789_vm1, %v3000_v52, %v1852_v26 }
 0x2a1   : > { %v872_v36 = vsel %vm792_vm2, %v738_v55, %v1855_v31  ;;  %v837_v37 = vmul.f32 1.442695, %v813_v32  ;;  %v814_v47 = vmin.f32 %v3035_v39, 0.0  ;;  %vm800_vm9 = vcmp.gt.f32.partialorder %v3029_v28, 0.0 }
 0x2a2   : > { %v886_v41 = vpack.c.bf16 %v872_v36, %v871_v33  ;;  %v870_v42 = vsel %vm790_vm3, %v730_v58, %v1853_v34  ;;  %2313 = vpow2.f32 %v841_v35  ;;  %v843_v44 = vmul.f32 1.442695, %v816_v38 }
 0x2a3   : > { %v885_v43 = vpack.c.bf16 %v870_v42, %v869_v40  ;;  %v2061_v45 = vpop.f32.mrb[12].mxu1  ;;  %2315 = vpow2.f32 %v837_v37  ;;  %v839_v57 = vmul.f32 1.442695, %v814_v47  ;;  %vm797_vm10 = vcmp.gt.f32.partialorder %v3025_v23, 0.0 }
 0x2a4   : > { %v2306_v46 = vpop.eup %2305  ;;  %894 = vst [vmem:[#allocation2 + $0x8] sm:$0xff] %v886_v41  ;;  %v3040_v49 = vadd.f32 %v2061_v45, %v2996_v48  ;;  %v774_v50 = vpop.f32.mrb[13].mxu1  ;;  %2317 = vpow2.f32 %v843_v44  ;;  %vm798_vm11 = vcmp.gt.f32.partialorder %v3035_v39, 0.0 }
 0x2a5   : > { %v2308_v51 = vpop.eup %2307  ;;  %893 = vst [vmem:[#allocation2] sm:$0xff] %v885_v43  ;;  %v1858_v52 = vadd.f32 -1.0, %v2306_v46  ;;  %v3044_v53 = vadd.f32 %v2996_v48, %v774_v50  ;;  %v2062_v54 = vpop.f32.mrb[14].mxu1  ;;  %2319 = vpow2.f32 %v839_v57 }
 0x2a6   : > { %v2310_v55 = vpop.eup %2309  ;;  %v1856_v56 = vadd.f32 -1.0, %v2308_v51  ;;  %v819_v58 = vmin.f32 %v3040_v49, 0.0  ;;  %v777_v59 = vpop.f32.mrb[15].mxu1  ;;  %v786_v6 = vadd.f32 %v2062_v54, %v2996_v48  ;;  %vm803_vm12 = vcmp.gt.f32.partialorder %v3040_v49, 0.0 }
 0x2a7   : > { %v2312_v60 = vpop.eup %2311  ;;  %v1859_v61 = vadd.f32 -1.0, %v2310_v55  ;;  %v817_v62 = vmin.f32 %v3044_v53, 0.0  ;;  %v875_v63 = vsel %vm795_vm4, %v3006_v2, %v1858_v52  ;;  %v778_v8 = vadd.f32 %v2996_v48, %v777_v59 }
 0x2a8   : > { %v1857_v0 = vadd.f32 -1.0, %v2312_v60  ;;  %v849_v1 = vmul.f32 1.442695, %v819_v58  ;;  %v873_v9 = vsel %vm793_vm5, %v3009_v4, %v1856_v56  ;;  %v820_v2 = vmin.f32 %v786_v6, 0.0 }
 0x2a9   : > { %v876_v3 = vsel %vm796_vm6, %v3013_v7, %v1859_v61  ;;  %v845_v5 = vmul.f32 1.442695, %v817_v62  ;;  %v818_v15 = vmin.f32 %v778_v8, 0.0  ;;  %vm804_vm13 = vcmp.gt.f32.partialorder %v786_v6, 0.0 }
 0x2aa   : > { %v888_v11 = vpack.c.bf16 %v876_v3, %v875_v63  ;;  %v874_v12 = vsel %vm794_vm7, %v3017_v10, %v1857_v0  ;;  %2321 = vpow2.f32 %v849_v1  ;;  %v851_v7 = vmul.f32 1.442695, %v820_v2 }
 0x2ab   : > { %v887_v13 = vpack.c.bf16 %v874_v12, %v873_v9  ;;  %2323 = vpow2.f32 %v845_v5  ;;  %v847_v18 = vmul.f32 1.442695, %v818_v15  ;;  %vm801_vm14 = vcmp.gt.f32.partialorder %v3044_v53, 0.0 }
 0x2ac   : > { %v2314_v14 = vpop.eup %2313  ;;  %896 = vst [vmem:[#allocation2 + $0x18] sm:$0xff] %v888_v11  ;;  %2325 = vpow2.f32 %v851_v7  ;;  %vm802_vm15 = vcmp.gt.f32.partialorder %v778_v8, 0.0 }
 0x2ad   : > { %895 = vst [vmem:[#allocation2 + $0x10] sm:$0xff] %v887_v13  ;;  %v2316_v16 = vpop.eup %2315  ;;  %v1862_v17 = vadd.f32 -1.0, %v2314_v14  ;;  %2327 = vpow2.f32 %v847_v18 }
 0x2ae   : > { %v2318_v48 = vpop.eup %2317  ;;  %v1860_v4 = vadd.f32 -1.0, %v2316_v16 }
 0x2af   : > { %v1863_v20 = vadd.f32 -1.0, %v2318_v48  ;;  %v2320_v10 = vpop.eup %2319  ;;  %v879_v21 = vsel %vm799_vm8, %v3022_v19, %v1862_v17 }
 0x2b0   : > { %v1861_v25 = vadd.f32 -1.0, %v2320_v10  ;;  %v877_v27 = vsel %vm797_vm10, %v3025_v23, %v1860_v4 }
 0x2b1   : > { %v880_v22 = vsel %vm800_vm9, %v3029_v28, %v1863_v20 }
 0x2b2   : > { %v890_v24 = vpack.c.bf16 %v880_v22, %v879_v21  ;;  %v878_v29 = vsel %vm798_vm11, %v3035_v39, %v1861_v25 }
 0x2b3   : > { %v889_v31 = vpack.c.bf16 %v878_v29, %v877_v27 }
 0x2b4   : > { %v2322_v26 = vpop.eup %2321  ;;  %898 = vst [vmem:[#allocation2 + $0x28] sm:$0xff] %v890_v24 }
 0x2b5   : > { %v2324_v30 = vpop.eup %2323  ;;  %897 = vst [vmem:[#allocation2 + $0x20] sm:$0xff] %v889_v31  ;;  %v1866_v32 = vadd.f32 -1.0, %v2322_v26 }
 0x2b6   : > { %v2326_v33 = vpop.eup %2325  ;;  %v1864_v19 = vadd.f32 -1.0, %v2324_v30 }
 0x2b7   : > { %v2328_v34 = vpop.eup %2327  ;;  %v1867_v28 = vadd.f32 -1.0, %v2326_v33  ;;  %v883_v36 = vsel %vm803_vm12, %v3040_v49, %v1866_v32 }
 0x2b8   : > { %v1865_v35 = vadd.f32 -1.0, %v2328_v34  ;;  %v881_v37 = vsel %vm801_vm14, %v3044_v53, %v1864_v19 }
 0x2b9   : > { %v884_v23 = vsel %vm804_vm13, %v786_v6, %v1867_v28 }
 0x2ba   : > { %v892_v38 = vpack.c.bf16 %v884_v23, %v883_v36  ;;  %v882_v39 = vsel %vm802_vm15, %v778_v8, %v1865_v35 }
 0x2bb   : > { %v891_v40 = vpack.c.bf16 %v882_v39, %v881_v37 }
 0x2bc   : > { %900 = vst [vmem:[#allocation2 + $0x38] sm:$0xff] %v892_v38 }
 0x2bd   : > { %899 = vst [vmem:[#allocation2 + $0x30] sm:$0xff] %v891_v40 }
 0x2be PF: > { %p1868_p0 = scmp.le.s32.totalorder %s2774_s9, 0 }
 0x2bf   : > { %v2329_v41 = vld [vmem:[%s2976_s20] sm:$0xff] (!%p1868_p0)   ;;  %v2330_v42 = vld [vmem:[%s2976_s20 + $0x8] sm:$0xff] (!%p1868_p0)   ;;  %v2331_v43 = vld [vmem:[%s2976_s20 + $0x10] sm:$0xff] (!%p1868_p0)  }
 0x2c0   : > { %904 = sbr.rel (%p1868_p0) target bundleno = 1247 (0x4df), region = 76  ;;  %2063 = vmatprep.subr.bf16.mxu0 (!%p1868_p0), %v2329_v41  ;;  %v2332_v44 = vld [vmem:[%s2976_s20 + $0x18] sm:$0xff] (!%p1868_p0)   ;;  %v905_v45 = vld [vmem:[#allocation2] sm:$0xff] (!%p1868_p0)  ;;  %v2334_v47 = vld [vmem:[%s2976_s20 + $0x28] sm:$0xff] (!%p1868_p0)  }
 0x2c1   : > { %2064 = vmatpush3.bf16.msra.mxu0 (!%p1868_p0), %v2329_v41  ;;  %2079 = vmatprep.mubr.bf16.mxu0 (!%p1868_p0), %v905_v45  ;;  %v2333_v46 = vld [vmem:[%s2976_s20 + $0x20] sm:$0xff] (!%p1868_p0)   ;;  %v2335_v49 = vld [vmem:[%s2976_s20 + $0x30] sm:$0xff] (!%p1868_p0)   ;;  %v2336_v50 = vld [vmem:[%s2976_s20 + $0x38] sm:$0xff] (!%p1868_p0)  }
 0x2c2   : > { %2065 = vmatprep.subr.bf16.mxu0 (!%p1868_p0), %v2330_v42  ;;  %v906_v51 = vld [vmem:[#allocation2 + $0x8] sm:$0xff] (!%p1868_p0)  ;;  %v907_v52 = vld [vmem:[#allocation2 + $0x10] sm:$0xff] (!%p1868_p0)  ;;  %v908_v53 = vld [vmem:[#allocation2 + $0x18] sm:$0xff] (!%p1868_p0) }
 0x2c3   : > { %v909_v54 = vld [vmem:[#allocation2 + $0x20] sm:$0xff] (!%p1868_p0)  ;;  %v910_v55 = vld [vmem:[#allocation2 + $0x28] sm:$0xff] (!%p1868_p0)  ;;  %v912_v57 = vld [vmem:[#allocation2 + $0x38] sm:$0xff] (!%p1868_p0) }
 0x2c4   : > { %v911_v56 = vld [vmem:[#allocation2 + $0x30] sm:$0xff] (!%p1868_p0)  ;;  %v2337_v58 = vld [vmem:[#allocation3] sm:$0xff] (!%p1868_p0)   ;;  %v2338_v4 = vld [vmem:[#allocation3 + $0x8] sm:$0xff] (!%p1868_p0)  }
 0x2c5   : > { %2066 = vmatpush3.bf16.msra.mxu0 (!%p1868_p0), %v2330_v42  ;;  %2111 = vmatprep.mubr.bf16.mxu1 (!%p1868_p0), %v2337_v58  ;;  %v2339_v10 = vld [vmem:[#allocation3 + $0x10] sm:$0xff] (!%p1868_p0)   ;;  %v2340_v21 = vld [vmem:[#allocation3 + $0x18] sm:$0xff] (!%p1868_p0)   ;;  %v2341_v22 = vld [vmem:[#allocation3 + $0x20] sm:$0xff] (!%p1868_p0)  }
 0x2c6   : > { %2067 = vmatprep.subr.bf16.mxu0 (!%p1868_p0), %v2331_v43  ;;  %v2342_v24 = vld [vmem:[#allocation3 + $0x28] sm:$0xff] (!%p1868_p0)   ;;  %v2343_v25 = vld [vmem:[#allocation3 + $0x30] sm:$0xff] (!%p1868_p0)   ;;  %v2344_v26 = vld [vmem:[#allocation3 + $0x38] sm:$0xff] (!%p1868_p0)  }
 0x2c7   : > { %v3083_v27 = vld [vmem:[%s2991_s23] ss:$0 sm:$0xff] }
 0x2c9   : > { %2068 = vmatpush3.bf16.msra.mxu0 %v2331_v43 }
 0x2ca   : > { %2069 = vmatprep.subr.bf16.mxu0 %v2332_v44 }
 0x2cd   : > { %2070 = vmatpush3.bf16.msra.mxu0 %v2332_v44 }
 0x2ce   : > { %2071 = vmatprep.subr.bf16.mxu0 %v2333_v46 }
 0x2d1   : > { %2072 = vmatpush3.bf16.msra.mxu0 %v2333_v46 }
 0x2d2   : > { %2073 = vmatprep.subr.bf16.mxu0 %v2334_v47 }
 0x2d5   : > { %2074 = vmatpush3.bf16.msra.mxu0 %v2334_v47 }
 0x2d6   : > { %2075 = vmatprep.subr.bf16.mxu0 %v2335_v49 }
 0x2d9   : > { %2076 = vmatpush3.bf16.msra.mxu0 %v2335_v49 }
 0x2da   : > { %2077 = vmatprep.subr.bf16.mxu0 %v2336_v50 }
 0x2dd   : > { %2078 = vmatpush3.bf16.msra.mxu0 %v2336_v50 }
 0x2e0   : > { %2080 = vmatmul.mubr.bf16.vlgmr.msra.gmra.mrb[0].mxu0 %v906_v51 }
 0x2e1   : > { %2083 = vmatprep.mubr.bf16.mxu0 %v907_v52 }
 0x2e8   : > { %2084 = vmatmul.mubr.bf16.gmra.mrb[4].mxu0 %v908_v53 }
 0x2e9   : > { %2087 = vmatprep.mubr.bf16.mxu0 %v909_v54 }
 0x2f0   : > { %2088 = vmatmul.mubr.bf16.gmra.mrb[8].mxu0 %v910_v55 }
 0x2f1   : > { %2091 = vmatprep.mubr.bf16.mxu0 %v911_v56 }
 0x2f8   : > { %2092 = vmatmul.mubr.bf16.gmra.mrb[12].mxu0 %v912_v57 }
 0x3b3   : > { %v2081_v59 = vpop.f32.mrb[0].mxu0 }
 0x3b4   : > { %v1011_v60 = vpop.f32.mrb[1].mxu0 }
 0x3b5   : > { %v2082_v61 = vpop.f32.mrb[2].mxu0 }
 0x3b6   : > { %v1091_v62 = vpack.c.bf16 %v2082_v61, %v2081_v59  ;;  %v1014_v63 = vpop.f32.mrb[3].mxu0 }
 0x3b7   : > { %v1090_v0 = vpack.c.bf16 %v1014_v63, %v1011_v60 }
 0x3b9   : > { %2095 = vmatprep.subr.bf16.mxu1 %v1090_v0 }
 0x3ba   : > { %2096 = vmatpush3.bf16.msra.mxu1 %v1090_v0 }
 0x3bb   : > { %v2085_v1 = vpop.f32.mrb[4].mxu0  ;;  %2097 = vmatprep.subr.bf16.mxu1 %v1091_v62 }
 0x3bc   : > { %v1027_v3 = vpop.f32.mrb[5].mxu0 }
 0x3bd   : > { %v2086_v5 = vpop.f32.mrb[6].mxu0 }
 0x3be   : > { %v1093_v6 = vpack.c.bf16 %v2086_v5, %v2085_v1  ;;  %v1030_v8 = vpop.f32.mrb[7].mxu0  ;;  %2098 = vmatpush3.bf16.msra.mxu1 %v1091_v62 }
 0x3bf   : > { %v1092_v9 = vpack.c.bf16 %v1030_v8, %v1027_v3 }
 0x3c1   : > { %2099 = vmatprep.subr.bf16.mxu1 %v1092_v9 }
 0x3c2   : > { %2100 = vmatpush3.bf16.msra.mxu1 %v1092_v9 }
 0x3c3   : > { %v2089_v11 = vpop.f32.mrb[8].mxu0  ;;  %2101 = vmatprep.subr.bf16.mxu1 %v1093_v6 }
 0x3c4   : > { %v1043_v12 = vpop.f32.mrb[9].mxu0 }
 0x3c5   : > { %v2090_v13 = vpop.f32.mrb[10].mxu0 }
 0x3c6   : > { %v1095_v2 = vpack.c.bf16 %v2090_v13, %v2089_v11  ;;  %v1046_v14 = vpop.f32.mrb[11].mxu0  ;;  %2102 = vmatpush3.bf16.msra.mxu1 %v1093_v6 }
 0x3c7   : > { %v1094_v15 = vpack.c.bf16 %v1046_v14, %v1043_v12 }
 0x3c9   : > { %2103 = vmatprep.subr.bf16.mxu1 %v1094_v15 }
 0x3ca   : > { %2104 = vmatpush3.bf16.msra.mxu1 %v1094_v15 }
 0x3cb   : > { %v2093_v7 = vpop.f32.mrb[12].mxu0  ;;  %2105 = vmatprep.subr.bf16.mxu1 %v1095_v2 }
 0x3cc   : > { %v1059_v16 = vpop.f32.mrb[13].mxu0 }
 0x3cd   : > { %v2094_v17 = vpop.f32.mrb[14].mxu0 }
 0x3ce   : > { %v1097_v18 = vpack.c.bf16 %v2094_v17, %v2093_v7  ;;  %v1062_v48 = vpop.f32.mrb[15].mxu0  ;;  %2106 = vmatpush3.bf16.msra.mxu1 %v1095_v2 }
 0x3cf   : > { %v1096_v20 = vpack.c.bf16 %v1062_v48, %v1059_v16 }
 0x3d1   : > { %2107 = vmatprep.subr.bf16.mxu1 %v1096_v20 }
 0x3d2   : > { %2108 = vmatpush3.bf16.msra.mxu1 %v1096_v20 }
 0x3d3   : > { %2109 = vmatprep.subr.bf16.mxu1 %v1097_v18 }
 0x3d6   : > { %2110 = vmatpush3.bf16.msra.mxu1 %v1097_v18 }
 0x3d9   : > { %2112 = vmatmul.mubr.bf16.vlgmr.msra.gmra.mrb[0].mxu1 %v2338_v4 }
 0x3da   : > { %2115 = vmatprep.mubr.bf16.mxu1 %v2339_v10 }
 0x3e1   : > { %2116 = vmatmul.mubr.bf16.gmra.mrb[4].mxu1 %v2340_v21 }
 0x3e2   : > { %2119 = vmatprep.mubr.bf16.mxu1 %v2341_v22 }
 0x3e9   : > { %2120 = vmatmul.mubr.bf16.gmra.mrb[8].mxu1 %v2342_v24 }
 0x3ea   : > { %2123 = vmatprep.mubr.bf16.mxu1 %v2343_v25 }
 0x3f1   : > { %2124 = vmatmul.mubr.bf16.gmra.mrb[12].mxu1 %v2344_v26 }
 0x4ac   : > { %v2113_v29 = vpop.f32.mrb[0].mxu1 }
 0x4ad   : > { %v1196_v30 = vadd.f32 %v2113_v29, %v3083_v27  ;;  %v1187_v31 = vpop.f32.mrb[1].mxu1 }
 0x4ae   : > { %v3087_v32 = vadd.f32 %v3083_v27, %v1187_v31  ;;  %v2114_v33 = vpop.f32.mrb[2].mxu1 }
 0x4af   : > { %v1268_v19 = vmin.f32 %v1196_v30, 0.0  ;;  %v1199_v34 = vadd.f32 %v2114_v33, %v3083_v27  ;;  %v1190_v28 = vpop.f32.mrb[3].mxu1  ;;  %vm1252_vm0 = vcmp.gt.f32.partialorder %v1196_v30, 0.0 }
 0x4b0   : > { %v1266_v35 = vmin.f32 %v3087_v32, 0.0  ;;  %v1191_v36 = vadd.f32 %v3083_v27, %v1190_v28  ;;  %vm1250_vm1 = vcmp.gt.f32.partialorder %v3087_v32, 0.0 }
 0x4b1   : > { %v1286_v23 = vmul.f32 1.442695, %v1268_v19  ;;  %v1269_v37 = vmin.f32 %v1199_v34, 0.0  ;;  %vm1253_vm2 = vcmp.gt.f32.partialorder %v1199_v34, 0.0 }
 0x4b2   : > { %v1282_v38 = vmul.f32 1.442695, %v1266_v35  ;;  %v1267_v39 = vmin.f32 %v1191_v36, 0.0  ;;  %vm1251_vm3 = vcmp.gt.f32.partialorder %v1191_v36, 0.0 }
 0x4b3   : > { %2345 = vpow2.f32 %v1286_v23  ;;  %v1288_v40 = vmul.f32 1.442695, %v1269_v37 }
 0x4b4   : > { %2347 = vpow2.f32 %v1282_v38  ;;  %v1284_v41 = vmul.f32 1.442695, %v1267_v39  ;;  %v2117_v42 = vpop.f32.mrb[4].mxu1 }
 0x4b5   : > { %2349 = vpow2.f32 %v1288_v40  ;;  %v3093_v43 = vadd.f32 %v2117_v42, %v3083_v27  ;;  %v1203_v44 = vpop.f32.mrb[5].mxu1 }
 0x4b6   : > { %2351 = vpow2.f32 %v1284_v41  ;;  %v3096_v45 = vadd.f32 %v3083_v27, %v1203_v44  ;;  %v2118_v46 = vpop.f32.mrb[6].mxu1 }
 0x4b7   : > { %v1272_v47 = vmin.f32 %v3093_v43, 0.0  ;;  %v3100_v49 = vadd.f32 %v2118_v46, %v3083_v27  ;;  %v1206_v50 = vpop.f32.mrb[7].mxu1  ;;  %vm1256_vm4 = vcmp.gt.f32.partialorder %v3093_v43, 0.0 }
 0x4b8   : > { %v1270_v51 = vmin.f32 %v3096_v45, 0.0  ;;  %v3104_v52 = vadd.f32 %v3083_v27, %v1206_v50  ;;  %vm1254_vm5 = vcmp.gt.f32.partialorder %v3096_v45, 0.0 }
 0x4b9   : > { %v1294_v53 = vmul.f32 1.442695, %v1272_v47  ;;  %v1273_v54 = vmin.f32 %v3100_v49, 0.0  ;;  %vm1257_vm6 = vcmp.gt.f32.partialorder %v3100_v49, 0.0 }
 0x4ba   : > { %v1290_v55 = vmul.f32 1.442695, %v1270_v51  ;;  %v1271_v56 = vmin.f32 %v3104_v52, 0.0  ;;  %vm1255_vm7 = vcmp.gt.f32.partialorder %v3104_v52, 0.0 }
 0x4bb   : > { %2353 = vpow2.f32 %v1294_v53  ;;  %v1296_v57 = vmul.f32 1.442695, %v1273_v54 }
 0x4bc   : > { %2355 = vpow2.f32 %v1290_v55  ;;  %v1292_v58 = vmul.f32 1.442695, %v1271_v56  ;;  %v2121_v59 = vpop.f32.mrb[8].mxu1 }
 0x4bd   : > { %v2346_v60 = vpop.eup %2345  ;;  %2357 = vpow2.f32 %v1296_v57  ;;  %v3109_v61 = vadd.f32 %v2121_v59, %v3083_v27  ;;  %v1219_v62 = vpop.f32.mrb[9].mxu1 }
 0x4be   : > { %v2348_v63 = vpop.eup %2347  ;;  %v1888_v0 = vadd.f32 -1.0, %v2346_v60  ;;  %2359 = vpow2.f32 %v1292_v58  ;;  %v3112_v1 = vadd.f32 %v3083_v27, %v1219_v62  ;;  %v2122_v3 = vpop.f32.mrb[10].mxu1 }
 0x4bf   : > { %v2350_v5 = vpop.eup %2349  ;;  %v1886_v6 = vadd.f32 -1.0, %v2348_v63  ;;  %v1276_v8 = vmin.f32 %v3109_v61, 0.0  ;;  %v3116_v9 = vadd.f32 %v2122_v3, %v3083_v27  ;;  %v1222_v11 = vpop.f32.mrb[11].mxu1  ;;  %vm1260_vm8 = vcmp.gt.f32.partialorder %v3109_v61, 0.0 }
 0x4c0   : > { %v2352_v12 = vpop.eup %2351  ;;  %v1889_v13 = vadd.f32 -1.0, %v2350_v5  ;;  %v1274_v2 = vmin.f32 %v3112_v1, 0.0  ;;  %v1332_v14 = vsel %vm1252_vm0, %v1196_v30, %v1888_v0  ;;  %v3122_v48 = vadd.f32 %v3083_v27, %v1222_v11 }
 0x4c1   : > { %v1887_v15 = vadd.f32 -1.0, %v2352_v12  ;;  %v1302_v7 = vmul.f32 1.442695, %v1276_v8  ;;  %v1277_v18 = vmin.f32 %v3116_v9, 0.0  ;;  %v1330_v20 = vsel %vm1250_vm1, %v3087_v32, %v1886_v6 }
 0x4c2   : > { %v1333_v16 = vsel %vm1253_vm2, %v1199_v34, %v1889_v13  ;;  %v1298_v17 = vmul.f32 1.442695, %v1274_v2  ;;  %v1275_v26 = vmin.f32 %v3122_v48, 0.0  ;;  %vm1261_vm9 = vcmp.gt.f32.partialorder %v3116_v9, 0.0 }
 0x4c3   : > { %v1347_v4 = vpack.c.bf16 %v1333_v16, %v1332_v14  ;;  %v1331_v10 = vsel %vm1251_vm3, %v1191_v36, %v1887_v15  ;;  %2361 = vpow2.f32 %v1302_v7  ;;  %v1304_v22 = vmul.f32 1.442695, %v1277_v18 }
 0x4c4   : > { %v1346_v21 = vpack.c.bf16 %v1331_v10, %v1330_v20  ;;  %v2125_v24 = vpop.f32.mrb[12].mxu1  ;;  %2363 = vpow2.f32 %v1298_v17  ;;  %v1300_v35 = vmul.f32 1.442695, %v1275_v26  ;;  %vm1258_vm10 = vcmp.gt.f32.partialorder %v3112_v1, 0.0 }
 0x4c5   : > { %v2354_v25 = vpop.eup %2353  ;;  %1355 = vst [vmem:[#allocation2 + $0x8] sm:$0xff] %v1347_v4  ;;  %v3127_v29 = vadd.f32 %v2125_v24, %v3083_v27  ;;  %v1235_v30 = vpop.f32.mrb[13].mxu1  ;;  %2365 = vpow2.f32 %v1304_v22  ;;  %vm1259_vm11 = vcmp.gt.f32.partialorder %v3122_v48, 0.0 }
 0x4c6   : > { %v2356_v31 = vpop.eup %2355  ;;  %1354 = vst [vmem:[#allocation2] sm:$0xff] %v1346_v21  ;;  %v1892_v32 = vadd.f32 -1.0, %v2354_v25  ;;  %v3131_v33 = vadd.f32 %v3083_v27, %v1235_v30  ;;  %v2126_v19 = vpop.f32.mrb[14].mxu1  ;;  %2367 = vpow2.f32 %v1300_v35 }
 0x4c7   : > { %v2358_v34 = vpop.eup %2357  ;;  %v1890_v28 = vadd.f32 -1.0, %v2356_v31  ;;  %v1280_v36 = vmin.f32 %v3127_v29, 0.0  ;;  %v1238_v23 = vpop.f32.mrb[15].mxu1  ;;  %v1247_v47 = vadd.f32 %v2126_v19, %v3083_v27  ;;  %vm1264_vm12 = vcmp.gt.f32.partialorder %v3127_v29, 0.0 }
 0x4c8   : > { %v2360_v37 = vpop.eup %2359  ;;  %v1893_v38 = vadd.f32 -1.0, %v2358_v34  ;;  %v1278_v39 = vmin.f32 %v3131_v33, 0.0  ;;  %v1336_v40 = vsel %vm1256_vm4, %v3093_v43, %v1892_v32  ;;  %v1239_v50 = vadd.f32 %v3083_v27, %v1238_v23 }
 0x4c9   : > { %v1891_v41 = vadd.f32 -1.0, %v2360_v37  ;;  %v1310_v42 = vmul.f32 1.442695, %v1280_v36  ;;  %v1334_v51 = vsel %vm1254_vm5, %v3096_v45, %v1890_v28  ;;  %v1281_v43 = vmin.f32 %v1247_v47, 0.0 }
 0x4ca   : > { %v1337_v44 = vsel %vm1257_vm6, %v3100_v49, %v1893_v38  ;;  %v1306_v46 = vmul.f32 1.442695, %v1278_v39  ;;  %v1279_v57 = vmin.f32 %v1239_v50, 0.0  ;;  %vm1265_vm13 = vcmp.gt.f32.partialorder %v1247_v47, 0.0 }
 0x4cb   : > { %v1349_v53 = vpack.c.bf16 %v1337_v44, %v1336_v40  ;;  %v1335_v54 = vsel %vm1255_vm7, %v3104_v52, %v1891_v41  ;;  %2369 = vpow2.f32 %v1310_v42  ;;  %v1312_v49 = vmul.f32 1.442695, %v1281_v43 }
 0x4cc   : > { %v1348_v55 = vpack.c.bf16 %v1335_v54, %v1334_v51  ;;  %2371 = vpow2.f32 %v1306_v46  ;;  %v1308_v60 = vmul.f32 1.442695, %v1279_v57  ;;  %vm1262_vm14 = vcmp.gt.f32.partialorder %v3131_v33, 0.0 }
 0x4cd   : > { %v2362_v56 = vpop.eup %2361  ;;  %1357 = vst [vmem:[#allocation2 + $0x18] sm:$0xff] %v1349_v53  ;;  %2373 = vpow2.f32 %v1312_v49  ;;  %vm1263_vm15 = vcmp.gt.f32.partialorder %v1239_v50, 0.0 }
 0x4ce   : > { %1356 = vst [vmem:[#allocation2 + $0x10] sm:$0xff] %v1348_v55  ;;  %v2364_v58 = vpop.eup %2363  ;;  %v1896_v59 = vadd.f32 -1.0, %v2362_v56  ;;  %2375 = vpow2.f32 %v1308_v60 }
 0x4cf   : > { %v2366_v27 = vpop.eup %2365  ;;  %v1894_v45 = vadd.f32 -1.0, %v2364_v58 }
 0x4d0   : > { %v1897_v62 = vadd.f32 -1.0, %v2366_v27  ;;  %v2368_v52 = vpop.eup %2367  ;;  %v1340_v63 = vsel %vm1260_vm8, %v3109_v61, %v1896_v59 }
 0x4d1   : > { %v1895_v5 = vadd.f32 -1.0, %v2368_v52  ;;  %v1338_v8 = vsel %vm1258_vm10, %v3112_v1, %v1894_v45 }
 0x4d2   : > { %v1341_v0 = vsel %vm1261_vm9, %v3116_v9, %v1897_v62 }
 0x4d3   : > { %v1351_v3 = vpack.c.bf16 %v1341_v0, %v1340_v63  ;;  %v1339_v11 = vsel %vm1259_vm11, %v3122_v48, %v1895_v5 }
 0x4d4   : > { %v1350_v13 = vpack.c.bf16 %v1339_v11, %v1338_v8 }
 0x4d5   : > { %v2370_v6 = vpop.eup %2369  ;;  %1359 = vst [vmem:[#allocation2 + $0x28] sm:$0xff] %v1351_v3 }
 0x4d6   : > { %v2372_v12 = vpop.eup %2371  ;;  %1358 = vst [vmem:[#allocation2 + $0x20] sm:$0xff] %v1350_v13  ;;  %v1900_v2 = vadd.f32 -1.0, %v2370_v6 }
 0x4d7   : > { %v2374_v14 = vpop.eup %2373  ;;  %v1898_v61 = vadd.f32 -1.0, %v2372_v12 }
 0x4d8   : > { %v2376_v15 = vpop.eup %2375  ;;  %v1901_v9 = vadd.f32 -1.0, %v2374_v14  ;;  %v1344_v16 = vsel %vm1264_vm12, %v3127_v29, %v1900_v2 }
 0x4d9   : > { %v1899_v7 = vadd.f32 -1.0, %v2376_v15  ;;  %v1342_v17 = vsel %vm1262_vm14, %v3131_v33, %v1898_v61 }
 0x4da   : > { %v1345_v1 = vsel %vm1265_vm13, %v1247_v47, %v1901_v9 }
 0x4db   : > { %v1353_v18 = vpack.c.bf16 %v1345_v1, %v1344_v16  ;;  %v1343_v48 = vsel %vm1263_vm15, %v1239_v50, %v1899_v7 }
 0x4dc   : > { %v1352_v20 = vpack.c.bf16 %v1343_v48, %v1342_v17 }
 0x4dd   : > { %1361 = vst [vmem:[#allocation2 + $0x38] sm:$0xff] %v1353_v18 }
 0x4de   : > { %1360 = vst [vmem:[#allocation2 + $0x30] sm:$0xff] %v1352_v20 }
 0x4df PF: > { %p1902_p3 = scmp.ne.s32.totalorder %s2774_s9, 2 }
 0x4e0   : > { %v1366_v4 = vld [vmem:[#allocation2] sm:$0xff] (!%p1902_p3)  ;;  %v3161_v10 = vld [vmem:[#allocation2 + $0x8] sm:$0xff] (!%p1902_p3)  ;;  %v3163_v21 = vld [vmem:[#allocation2 + $0x10] sm:$0xff] (!%p1902_p3) }
 0x4e1   : > { %1365 = sbr.rel (%p1902_p3) target bundleno = 1554 (0x612), region = 80  ;;  %v3165_v22 = vld [vmem:[#allocation2 + $0x18] sm:$0xff] (!%p1902_p3)  ;;  %v1370_v24 = vld [vmem:[#allocation2 + $0x20] sm:$0xff] (!%p1902_p3)  ;;  %v3167_v25 = vld [vmem:[#allocation2 + $0x28] sm:$0xff] (!%p1902_p3)  ;;  %v1374_v26 = vunpack.c.l.bf16 (!%p1902_p3), %v1366_v4  ;;  %v1375_v29 = vunpack.c.h.bf16 (!%p1902_p3), %v1366_v4  ;;  %v1376_v30 = vunpack.c.l.bf16 (!%p1902_p3), %v3161_v10  ;;  %v1377_v31 = vunpack.c.h.bf16 (!%p1902_p3), %v3161_v10  ;;  %2143 = vmatprep.mubr.bf16.mxu0 (!%p1902_p3), %v1366_v4 }
 0x4e2   : > { %v1378_v19 = vunpack.c.l.bf16 (!%p1902_p3), %v3163_v21  ;;  %v1379_v34 = vunpack.c.h.bf16 (!%p1902_p3), %v3163_v21  ;;  %v1380_v28 = vunpack.c.l.bf16 (!%p1902_p3), %v3165_v22  ;;  %v1381_v35 = vunpack.c.h.bf16 (!%p1902_p3), %v3165_v22  ;;  %2151 = vmatprep.mubr.bf16.mxu1 (!%p1902_p3), %v1370_v24  ;;  %v2377_v39 = vld [vmem:[#allocation11] sm:$0xff] (!%p1902_p3)   ;;  %v2378_v46 = vld [vmem:[#allocation11 + $0x8] sm:$0xff] (!%p1902_p3)   ;;  %v2379_v47 = vld [vmem:[#allocation11 + $0x10] sm:$0xff] (!%p1902_p3)  }
 0x4e3   : > { %v1382_v36 = vunpack.c.l.bf16 (!%p1902_p3), %v1370_v24  ;;  %v1383_v23 = vunpack.c.h.bf16 (!%p1902_p3), %v1370_v24  ;;  %v1384_v37 = vunpack.c.l.bf16 (!%p1902_p3), %v3167_v25  ;;  %v1385_v38 = vunpack.c.h.bf16 (!%p1902_p3), %v3167_v25  ;;  %1390 = vst [vmem:[#allocation13] sm:$0xff] (!%p1902_p3), %v1374_v26  ;;  %1391 = vst [vmem:[#allocation13 + $0x8] sm:$0xff] (!%p1902_p3), %v1375_v29  ;;  %2127 = vmatprep.subr.bf16.mxu0 (!%p1902_p3), %v2377_v39  ;;  %2159 = vmatprep.subr.bf16.mxu1 (!%p1902_p3), %v2377_v39  ;;  %v2380_v50 = vld [vmem:[#allocation11 + $0x18] sm:$0xff] (!%p1902_p3)   ;;  %v2381_v51 = vld [vmem:[#allocation11 + $0x20] sm:$0xff] (!%p1902_p3)  }
 0x4e4   : > { %v3173_v33 = vld [vmem:[#allocation2 + $0x38] sm:$0xff] (!%p1902_p3)  ;;  %1392 = vst [vmem:[#allocation13 + $0x10] sm:$0xff] (!%p1902_p3), %v1376_v30  ;;  %1393 = vst [vmem:[#allocation13 + $0x18] sm:$0xff] (!%p1902_p3), %v1377_v31  ;;  %2128 = vmatpush3.bf16.msra.mxu0 (!%p1902_p3), %v2377_v39  ;;  %2167 = vmatpush3.bf16.msra.mxu1 (!%p1902_p3), %v2377_v39  ;;  %v2382_v53 = vld [vmem:[#allocation11 + $0x28] sm:$0xff] (!%p1902_p3)  }
 0x4e5   : > { %v3171_v32 = vld [vmem:[#allocation2 + $0x30] sm:$0xff] (!%p1902_p3)  ;;  %v1388_v42 = vunpack.c.l.bf16 (!%p1902_p3), %v3173_v33  ;;  %v1389_v44 = vunpack.c.h.bf16 (!%p1902_p3), %v3173_v33  ;;  %1394 = vst [vmem:[#allocation13 + $0x20] sm:$0xff] (!%p1902_p3), %v1378_v19  ;;  %1395 = vst [vmem:[#allocation13 + $0x28] sm:$0xff] (!%p1902_p3), %v1379_v34  ;;  %2129 = vmatprep.subr.bf16.mxu0 (!%p1902_p3), %v2378_v46  ;;  %2160 = vmatprep.subr.bf16.mxu1 (!%p1902_p3), %v2378_v46  ;;  %v2384_v55 = vld [vmem:[#allocation11 + $0x38] sm:$0xff] (!%p1902_p3)  }
 0x4e6   : > { %v1386_v40 = vunpack.c.l.bf16 (!%p1902_p3), %v3171_v32  ;;  %v1387_v41 = vunpack.c.h.bf16 (!%p1902_p3), %v3171_v32  ;;  %1396 = vst [vmem:[#allocation13 + $0x30] sm:$0xff] (!%p1902_p3), %v1380_v28  ;;  %1397 = vst [vmem:[#allocation13 + $0x38] sm:$0xff] (!%p1902_p3), %v1381_v35  ;;  %v2383_v54 = vld [vmem:[#allocation11 + $0x30] sm:$0xff] (!%p1902_p3)   ;;  %v3194_v43 = vld [vmem:[%s3276_s6] ss:$0 sm:$0xff] (!%p1902_p3) }
 0x4e7   : > { %1398 = vst [vmem:[#allocation13 + $0x40] sm:$0xff] (!%p1902_p3), %v1382_v36  ;;  %1399 = vst [vmem:[#allocation13 + $0x48] sm:$0xff] (!%p1902_p3), %v1383_v23 }
 0x4e8   : > { %1400 = vst [vmem:[#allocation13 + $0x50] sm:$0xff] %v1384_v37  ;;  %1401 = vst [vmem:[#allocation13 + $0x58] sm:$0xff] %v1385_v38  ;;  %2130 = vmatpush3.bf16.msra.mxu0 %v2378_v46  ;;  %2168 = vmatpush3.bf16.msra.mxu1 %v2378_v46 }
 0x4e9   : > { %1402 = vst [vmem:[#allocation13 + $0x60] sm:$0xff] %v1386_v40  ;;  %1403 = vst [vmem:[#allocation13 + $0x68] sm:$0xff] %v1387_v41  ;;  %2131 = vmatprep.subr.bf16.mxu0 %v2379_v47  ;;  %2161 = vmatprep.subr.bf16.mxu1 %v2379_v47 }
 0x4ea   : > { %1404 = vst [vmem:[#allocation13 + $0x70] sm:$0xff] %v1388_v42  ;;  %1405 = vst [vmem:[#allocation13 + $0x78] sm:$0xff] %v1389_v44 }
 0x4ec   : > { %2132 = vmatpush3.bf16.msra.mxu0 %v2379_v47  ;;  %2169 = vmatpush3.bf16.msra.mxu1 %v2379_v47 }
 0x4ed   : > { %2133 = vmatprep.subr.bf16.mxu0 %v2380_v50  ;;  %2162 = vmatprep.subr.bf16.mxu1 %v2380_v50 }
 0x4f0   : > { %2134 = vmatpush3.bf16.msra.mxu0 %v2380_v50  ;;  %2170 = vmatpush3.bf16.msra.mxu1 %v2380_v50 }
 0x4f1   : > { %2135 = vmatprep.subr.bf16.mxu0 %v2381_v51  ;;  %2163 = vmatprep.subr.bf16.mxu1 %v2381_v51 }
 0x4f4   : > { %2136 = vmatpush3.bf16.msra.mxu0 %v2381_v51  ;;  %2171 = vmatpush3.bf16.msra.mxu1 %v2381_v51 }
 0x4f5   : > { %2137 = vmatprep.subr.bf16.mxu0 %v2382_v53  ;;  %2164 = vmatprep.subr.bf16.mxu1 %v2382_v53 }
 0x4f8   : > { %2138 = vmatpush3.bf16.msra.mxu0 %v2382_v53  ;;  %2172 = vmatpush3.bf16.msra.mxu1 %v2382_v53 }
 0x4f9   : > { %2139 = vmatprep.subr.bf16.mxu0 %v2383_v54  ;;  %2165 = vmatprep.subr.bf16.mxu1 %v2383_v54 }
 0x4fc   : > { %2140 = vmatpush3.bf16.msra.mxu0 %v2383_v54  ;;  %2173 = vmatpush3.bf16.msra.mxu1 %v2383_v54 }
 0x4fd   : > { %2141 = vmatprep.subr.bf16.mxu0 %v2384_v55  ;;  %2166 = vmatprep.subr.bf16.mxu1 %v2384_v55 }
 0x500   : > { %2142 = vmatpush3.bf16.msra.mxu0 %v2384_v55  ;;  %2174 = vmatpush3.bf16.msra.mxu1 %v2384_v55 }
 0x503   : > { %2144 = vmatmul.mubr.bf16.vlgmr.msra.gmra.mrb[0].mxu0 %v3161_v10  ;;  %2152 = vmatmul.mubr.bf16.vlgmr.msra.gmra.mrb[0].mxu1 %v3167_v25 }
 0x504   : > { %2147 = vmatprep.mubr.bf16.mxu0 %v3163_v21  ;;  %2155 = vmatprep.mubr.bf16.mxu1 %v3171_v32 }
 0x50b   : > { %2148 = vmatmul.mubr.bf16.gmra.mrb[4].mxu0 %v3165_v22  ;;  %2156 = vmatmul.mubr.bf16.gmra.mrb[4].mxu1 %v3173_v33 }
 0x5d6   : > { %v2145_v56 = vpop.f32.mrb[0].mxu0  ;;  %v2153_v57 = vpop.f32.mrb[0].mxu1 }
 0x5d7   : > { %v1528_v49 = vadd.f32 %v2145_v56, %v3194_v43  ;;  %v1560_v58 = vadd.f32 %v2153_v57, %v3194_v43  ;;  %v1519_v59 = vpop.f32.mrb[1].mxu0  ;;  %v1551_v60 = vpop.f32.mrb[1].mxu1 }
 0x5d8   : > { %v1520_v27 = vadd.f32 %v3194_v43, %v1519_v59  ;;  %v1552_v62 = vadd.f32 %v3194_v43, %v1551_v60  ;;  %v2146_v45 = vpop.f32.mrb[2].mxu0  ;;  %v2154_v52 = vpop.f32.mrb[2].mxu1 }
 0x5d9   : > { %v1584_v63 = vsub.f32 0.0, %v1528_v49  ;;  %v1592_v0 = vsub.f32 0.0, %v1560_v58  ;;  %v1531_v3 = vadd.f32 %v2146_v45, %v3194_v43  ;;  %v1563_v5 = vadd.f32 %v2154_v52, %v3194_v43  ;;  %v1522_v6 = vpop.f32.mrb[3].mxu0  ;;  %v1554_v8 = vpop.f32.mrb[3].mxu1 }
 0x5da   : > { %v1582_v11 = vsub.f32 0.0, %v1520_v27  ;;  %v1590_v12 = vsub.f32 0.0, %v1552_v62  ;;  %v1523_v13 = vadd.f32 %v3194_v43, %v1522_v6  ;;  %v1555_v2 = vadd.f32 %v3194_v43, %v1554_v8 }
 0x5db   : > { %v1602_v14 = vmul.f32 1.442695, %v1584_v63  ;;  %v1618_v61 = vmul.f32 1.442695, %v1592_v0  ;;  %v1585_v15 = vsub.f32 0.0, %v1531_v3  ;;  %v1593_v9 = vsub.f32 0.0, %v1563_v5 }
 0x5dc   : > { %v1598_v7 = vmul.f32 1.442695, %v1582_v11  ;;  %v1614_v16 = vmul.f32 1.442695, %v1590_v12  ;;  %v1583_v1 = vsub.f32 0.0, %v1523_v13  ;;  %v1591_v17 = vsub.f32 0.0, %v1555_v2 }
 0x5dd   : > { %2385 = vpow2.f32 %v1602_v14  ;;  %v1604_v18 = vmul.f32 1.442695, %v1585_v15  ;;  %v1620_v48 = vmul.f32 1.442695, %v1593_v9 }
 0x5de   : > { %2387 = vpow2.f32 %v1618_v61  ;;  %v2149_v20 = vpop.f32.mrb[4].mxu0  ;;  %v2157_v4 = vpop.f32.mrb[4].mxu1  ;;  %v1600_v10 = vmul.f32 1.442695, %v1583_v1  ;;  %v1616_v26 = vmul.f32 1.442695, %v1591_v17 }
 0x5df   : > { %2389 = vpow2.f32 %v1598_v7  ;;  %v1544_v21 = vadd.f32 %v2149_v20, %v3194_v43  ;;  %v1576_v22 = vadd.f32 %v2157_v4, %v3194_v43  ;;  %v1535_v24 = vpop.f32.mrb[5].mxu0  ;;  %v1567_v25 = vpop.f32.mrb[5].mxu1 }
 0x5e0   : > { %2391 = vpow2.f32 %v1614_v16  ;;  %v1536_v29 = vadd.f32 %v3194_v43, %v1535_v24  ;;  %v1568_v30 = vadd.f32 %v3194_v43, %v1567_v25  ;;  %v2150_v31 = vpop.f32.mrb[6].mxu0  ;;  %v2158_v32 = vpop.f32.mrb[6].mxu1 }
 0x5e1   : > { %2393 = vpow2.f32 %v1604_v18  ;;  %v1588_v33 = vsub.f32 0.0, %v1544_v21  ;;  %v1596_v19 = vsub.f32 0.0, %v1576_v22  ;;  %v1547_v34 = vadd.f32 %v2150_v31, %v3194_v43  ;;  %v1538_v28 = vpop.f32.mrb[7].mxu0  ;;  %v1570_v35 = vpop.f32.mrb[7].mxu1 }
 0x5e2   : > { %2395 = vpow2.f32 %v1620_v48  ;;  %v1586_v36 = vsub.f32 0.0, %v1536_v29  ;;  %v1594_v23 = vsub.f32 0.0, %v1568_v30  ;;  %v1579_v57 = vadd.f32 %v2158_v32, %v3194_v43 }
 0x5e3   : > { %2397 = vpow2.f32 %v1600_v10  ;;  %v1610_v37 = vmul.f32 1.442695, %v1588_v33  ;;  %v1626_v38 = vmul.f32 1.442695, %v1596_v19  ;;  %v1589_v39 = vsub.f32 0.0, %v1547_v34 }
 0x5e4   : > { %2399 = vpow2.f32 %v1616_v26  ;;  %v1606_v40 = vmul.f32 1.442695, %v1586_v36  ;;  %v1622_v41 = vmul.f32 1.442695, %v1594_v23  ;;  %v1539_v59 = vadd.f32 %v3194_v43, %v1538_v28 }
 0x5e5   : > { %2401 = vpow2.f32 %v1610_v37  ;;  %v1612_v42 = vmul.f32 1.442695, %v1589_v39  ;;  %v1571_v62 = vadd.f32 %v3194_v43, %v1570_v35  ;;  %v1597_v3 = vsub.f32 0.0, %v1579_v57 }
 0x5e6   : > { %2403 = vpow2.f32 %v1626_v38  ;;  %v1587_v8 = vsub.f32 0.0, %v1539_v59 }
 0x5e7   : > { %v2386_v44 = vpop.eup %2385  ;;  %2405 = vpow2.f32 %v1606_v40  ;;  %v1595_v13 = vsub.f32 0.0, %v1571_v62  ;;  %v1628_v15 = vmul.f32 1.442695, %v1597_v3 }
 0x5e8   : > { %v2388_v46 = vpop.eup %2387  ;;  %v1632_v47 = vadd.f32 1.0, %v2386_v44  ;;  %2407 = vpow2.f32 %v1622_v41  ;;  %v1608_v16 = vmul.f32 1.442695, %v1587_v8 }
 0x5e9   : > { %v2390_v50 = vpop.eup %2389  ;;  %v1640_v51 = vadd.f32 1.0, %v2388_v46  ;;  %2409 = vpow2.f32 %v1612_v42  ;;  %v1624_v17 = vmul.f32 1.442695, %v1595_v13 }
 0x5ea   : > { %v2392_v53 = vpop.eup %2391  ;;  %2411 = vrcp.f32 %v1632_v47  ;;  %v1630_v54 = vadd.f32 1.0, %v2390_v50 }
 0x5eb   : > { %v2394_v55 = vpop.eup %2393  ;;  %2413 = vrcp.f32 %v1640_v51  ;;  %v1638_v56 = vadd.f32 1.0, %v2392_v53 }
 0x5ec   : > { %v2396_v49 = vpop.eup %2395  ;;  %2415 = vrcp.f32 %v1630_v54  ;;  %v1633_v58 = vadd.f32 1.0, %v2394_v55 }
 0x5ed   : > { %v2398_v60 = vpop.eup %2397  ;;  %2417 = vrcp.f32 %v1638_v56  ;;  %v1641_v27 = vadd.f32 1.0, %v2396_v49 }
 0x5ee   : > { %v2400_v45 = vpop.eup %2399  ;;  %2419 = vrcp.f32 %v1633_v58  ;;  %v1631_v52 = vadd.f32 1.0, %v2398_v60 }
 0x5ef   : > { %v2402_v63 = vpop.eup %2401  ;;  %2421 = vrcp.f32 %v1641_v27  ;;  %v1639_v0 = vadd.f32 1.0, %v2400_v45 }
 0x5f0   : > { %v2404_v5 = vpop.eup %2403  ;;  %2423 = vrcp.f32 %v1631_v52  ;;  %v1636_v6 = vadd.f32 1.0, %v2402_v63 }
 0x5f1   : > { %v2406_v11 = vpop.eup %2405  ;;  %2425 = vrcp.f32 %v1639_v0  ;;  %v1644_v12 = vadd.f32 1.0, %v2404_v5 }
 0x5f2   : > { %v2408_v2 = vpop.eup %2407  ;;  %2427 = vrcp.f32 %v1636_v6  ;;  %v1634_v14 = vadd.f32 1.0, %v2406_v11 }
 0x5f3   : > { %v2410_v61 = vpop.eup %2409  ;;  %2429 = vrcp.f32 %v1644_v12  ;;  %v1642_v43 = vadd.f32 1.0, %v2408_v2 }
 0x5f4   : > { %v2412_v9 = vpop.eup %2411  ;;  %2431 = vrcp.f32 %v1634_v14  ;;  %v1637_v7 = vadd.f32 1.0, %v2410_v61 }
 0x5f5   : > { %v2414_v1 = vpop.eup %2413  ;;  %1664 = vst [vmem:[#allocation12 + $0x10] sm:$0xff] %v2412_v9  ;;  %2433 = vrcp.f32 %v1642_v43 }
 0x5f6   : > { %v2416_v18 = vpop.eup %2415  ;;  %1672 = vst [vmem:[#allocation12 + $0x50] sm:$0xff] %v2414_v1  ;;  %2435 = vrcp.f32 %v1637_v7 }
 0x5f7   : > { %v2418_v48 = vpop.eup %2417  ;;  %1662 = vst [vmem:[#allocation12] sm:$0xff] %v2416_v18  ;;  %2437 = vpow2.f32 %v1628_v15 }
 0x5f8   : > { %v2420_v20 = vpop.eup %2419  ;;  %1670 = vst [vmem:[#allocation12 + $0x40] sm:$0xff] %v2418_v48  ;;  %2439 = vpow2.f32 %v1608_v16 }
 0x5f9   : > { %v2422_v4 = vpop.eup %2421  ;;  %1665 = vst [vmem:[#allocation12 + $0x18] sm:$0xff] %v2420_v20  ;;  %2441 = vpow2.f32 %v1624_v17 }
 0x5fa   : > { %v2424_v10 = vpop.eup %2423  ;;  %1673 = vst [vmem:[#allocation12 + $0x58] sm:$0xff] %v2422_v4 }
 0x5fb   : > { %v2426_v21 = vpop.eup %2425  ;;  %1663 = vst [vmem:[#allocation12 + $0x8] sm:$0xff] %v2424_v10 }
 0x5fc   : > { %v2428_v22 = vpop.eup %2427  ;;  %1671 = vst [vmem:[#allocation12 + $0x48] sm:$0xff] %v2426_v21 }
 0x5fd   : > { %v2430_v24 = vpop.eup %2429  ;;  %1668 = vst [vmem:[#allocation12 + $0x30] sm:$0xff] %v2428_v22 }
 0x5fe   : > { %v2432_v25 = vpop.eup %2431  ;;  %1676 = vst [vmem:[#allocation12 + $0x70] sm:$0xff] %v2430_v24 }
 0x5ff   : > { %v2434_v26 = vpop.eup %2433  ;;  %1666 = vst [vmem:[#allocation12 + $0x20] sm:$0xff] %v2432_v25 }
 0x600   : > { %v2436_v29 = vpop.eup %2435  ;;  %1674 = vst [vmem:[#allocation12 + $0x60] sm:$0xff] %v2434_v26 }
 0x601   : > { %v2438_v30 = vpop.eup %2437  ;;  %1669 = vst [vmem:[#allocation12 + $0x38] sm:$0xff] %v2436_v29 }
 0x602   : > { %v2440_v31 = vpop.eup %2439  ;;  %v1645_v32 = vadd.f32 1.0, %v2438_v30 }
 0x603   : > { %v2442_v33 = vpop.eup %2441  ;;  %v1635_v19 = vadd.f32 1.0, %v2440_v31 }
 0x604   : > { %2443 = vrcp.f32 %v1645_v32  ;;  %v1643_v34 = vadd.f32 1.0, %v2442_v33 }
 0x605   : > { %2445 = vrcp.f32 %v1635_v19 }
 0x606   : > { %2447 = vrcp.f32 %v1643_v34 }
 0x60e   : > { %v2444_v28 = vpop.eup %2443 }
 0x60f   : > { %v2446_v35 = vpop.eup %2445  ;;  %1677 = vst [vmem:[#allocation12 + $0x78] sm:$0xff] %v2444_v28 }
 0x610   : > { %v2448_v36 = vpop.eup %2447  ;;  %1667 = vst [vmem:[#allocation12 + $0x28] sm:$0xff] %v2446_v35 }
 0x611   : > { %1675 = vst [vmem:[#allocation12 + $0x68] sm:$0xff] %v2448_v36 }
 0x612 PF: > { %p2227_p9 = scmp.eq.s32.totalorder %s2774_s9, 2  ;;  %s2706_s27 = smov [#allocation12]  }
 0x613   : > { %s1684_s13 = sshll.u32 %s2706_s27, 4  ;;  %s1685_s13 = int_to_ptr.vmem [resolvable:$true] %s1684_s13 }
 0x614   : > { %s2591_s21 = scalar_lea.vmem %s1685_s13, 2048  ;;  %p2598_p1 = scmp.lt.s32.totalorder %s1685_s13, %s1685_s13 }
 0x615   : > { %p2592_p11 = scmp.ne.s32.totalorder %s1685_s13, %s2591_s21  ;;  %p2599_p4 = scmp.lt.s32.totalorder %s2591_s21, %s2591_s21 }
 0x617   : > { %p2593_p2 = pnand %p2592_p11, %p2227_p9  ;;  %p2600_p10 = por %p2599_p4, %p2598_p1 }
 0x619   : > { %p2594_p7 = pneg %p2593_p2 }
 0x61b   : > { %p2601_p8 = pnand %p2600_p10, %p2594_p7 }
 0x61d   : > { %2604 = shalt.err (!%p2601_p8)
}
 0x61e   : > { %s2605_s19 = scalar_lea.hbm %s3277_s7, 2048 }
 0x61f   : > { %p2606_p5 = scmp.ne.s32.totalorder %s3277_s7, %s2605_s19  ;;  %p2611_p13 = scmp.lt.u32.totalorder %s2605_s19, %s3277_s7 }
 0x621   : > { %p2607_p6 = pnand %p2606_p5, %p2227_p9 }
 0x623   : > { %p2608_p12 = pneg %p2607_p6 }
 0x625   : > { %p2613_p0 = pnand %p2611_p13, %p2608_p12 }
 0x627   : > { %2616 = shalt.err (!%p2613_p0)
}
 0x628   : > { %s2707_s20 = smov 128   ;;  %s2708_s17 = smov 8  }
 0x629   : > { %2194 = dma.vmem_to_hbm [thread:$0]  (%p2227_p9), %s1685_s13, 2048, %s3277_s7, [#allocation5], %s2707_s20, %s2707_s20, %s2708_s17  }
 0x62a   : > { %s2709_s23 = smov [#allocation13]  }
 0x62b   : > { %s1697_s10 = sshll.u32 %s2709_s23, 4  ;;  %s1698_s10 = int_to_ptr.vmem [resolvable:$true] %s1697_s10 }
 0x62c   : > { %s2617_s25 = scalar_lea.vmem %s1698_s10, 2048  ;;  %p2624_p7 = scmp.lt.s32.totalorder %s1698_s10, %s1698_s10 }
 0x62d   : > { %p2618_p3 = scmp.ne.s32.totalorder %s1698_s10, %s2617_s25  ;;  %p2625_p1 = scmp.lt.s32.totalorder %s2617_s25, %s2617_s25 }
 0x62f   : > { %p2619_p11 = pnand %p2618_p3, %p2227_p9  ;;  %p2626_p4 = por %p2625_p1, %p2624_p7 }
 0x631   : > { %p2620_p2 = pneg %p2619_p11 }
 0x633   : > { %p2627_p10 = pnand %p2626_p4, %p2620_p2 }
 0x635   : > { %2630 = shalt.err (!%p2627_p10)
}
 0x636   : > { %s2631_s26 = scalar_lea.hbm %s3278_s8, 2048 }
 0x637   : > { %p2632_p8 = scmp.ne.s32.totalorder %s3278_s8, %s2631_s26  ;;  %p2637_p12 = scmp.lt.u32.totalorder %s2631_s26, %s3278_s8 }
 0x639   : > { %p2633_p5 = pnand %p2632_p8, %p2227_p9 }
 0x63b   : > { %p2634_p6 = pneg %p2633_p5 }
 0x63d   : > { %p2639_p13 = pnand %p2637_p12, %p2634_p6 }
 0x63f   : > { %2642 = shalt.err (!%p2639_p13)
}
 0x640   : > { %2196 = dma.vmem_to_hbm [thread:$0]  (%p2227_p9), %s1698_s10, 2048, %s3278_s8, [#allocation14], %s2707_s20, %s2707_s20, %s2708_s17  }
 0x641   : > { %2676 = dma.done.wait (%p2227_p9), [#allocation5], 2048  }
 0x642   : > { %2678 = vsyncadd (%p2227_p9), [#allocation5], 4294965248 }
 0x643   : > { %2680 = dma.done.wait (%p2227_p9), [#allocation14], 2048  }
 0x644   : > { %2682 = vsyncadd (%p2227_p9), [#allocation14], 4294965248 }
 0x645 PF: > { %p23_p0 = scmp.ge.s32.totalorder %s2907_s24, 5   ;;  %s3296_s27 = smov %s2689_s28 }
 0x646   : > { %s3297_s28 = smov %s2693_s29  ;;  %s3298_s29 = smov %s2918_s22 }
 0x647   : > { %s3299_s30 = smov %s2907_s24  ;;  %25 = sbr.rel (!%p23_p0) target bundleno = 7 (0x7), region = 125 }
 0x64e   :  { %1717 = vsyncpa [#allocation4], 1 }
 0x64f   :  { %1719 = vsyncpa [#allocation4 + $0x1], 1 }
 0x650   :  { %1720 = vsyncpa [#allocation7], 1 }
 0x651   :  { %1721 = vsyncpa [#allocation10], 1 }
 0x652   :  { %1723 = vsyncpa [#allocation10 + $0x1], 1 }
 0x653   :  { %1724 = vsyncpa [#allocation5], 1 }
 0x654   :  { %1726 = vsyncpa [#allocation5 + $0x1], 1 }
 0x655   :  { %1727 = vsyncpa [#allocation14], 1 }

</bundles_post_ra>
